<compile_context>
chip_gen: v6e
topology: v6e:2x2x1
jax: 0.10.0
libtpu: 0.0.40
codegen_flags: <defaults>
</compile_context>

<pallas_src>
import functools

import jax
import jax.numpy as jnp
import numpy as np
from jax import lax
from jax.experimental import pallas as pl
from jax.experimental.pallas import tpu as pltpu

BN_EPS = 1e-5
LANE = 128


# ----------------------------------------------------------------------------
# Kernel 1: 3x3 conv (+ReLU) as 9 accumulating MXU matmuls -> running global
# max pool across spatial row tiles (VMEM scratch, pl.when init/finalize).
# ----------------------------------------------------------------------------
def _conv_pool_kernel(W, cin_pad, row_tile,
                      x_ref, cw_ref, cb_ref, pooled_ref, pool_ref):
    t = pl.program_id(1)
    n_t = pl.num_programs(1)
    r0 = pl.multiple_of(t * row_tile, row_tile)   # first output row of tile
    M = row_tile * W

    # 3x3 conv: one lane-dense (M, 128) x (128, C_FEAT) matmul per tap,
    # accumulated in f32.  No lane concatenate, no tile-crossing relayout.
    acc = None
    k = 0
    for di in range(3):
        for dj in range(3):
            tap = x_ref[:, pl.ds(r0 + di, row_tile), dj:dj + W, :]
            tap = tap.reshape(M, cin_pad)                       # layout no-op
            part = jnp.dot(tap, cw_ref[k * cin_pad:(k + 1) * cin_pad, :],
                           preferred_element_type=jnp.float32)
            acc = part if acc is None else acc + part
            k += 1
    feat = jnp.maximum(acc + cb_ref[...], 0.0)      # (M, C_FEAT) f32, ReLU

    # AdaptiveMaxPool2d(1): running max over spatial tiles in VMEM scratch.
    @pl.when(t == 0)
    def _init():
        pool_ref[...] = jnp.full(pool_ref.shape, -jnp.inf, pool_ref.dtype)

    pool_ref[...] = jnp.maximum(pool_ref[...],
                                jnp.max(feat, axis=0, keepdims=True))

    @pl.when(t == n_t - 1)
    def _store():
        pooled_ref[...] = pool_ref[...].reshape(pooled_ref.shape)


# ----------------------------------------------------------------------------
# Kernel 2: fused orientation+scale heads (BN folded, block-diagonal layers),
# run once with M = B rows.  f32 weights/activations (head FLOPs negligible).
# ----------------------------------------------------------------------------
def _heads_kernel(pooled_ref, w1_ref, b1_ref, w2_ref, b2_ref,
                  w3_ref, b3_ref, w4_ref, b4_ref, out_ref):
    h = pooled_ref[...]                                          # (B, C_FEAT)
    h = jnp.maximum(jnp.dot(h, w1_ref[...],
                            preferred_element_type=jnp.float32) + b1_ref[...], 0.0)
    h = jnp.maximum(jnp.dot(h, w2_ref[...],
                            preferred_element_type=jnp.float32) + b2_ref[...], 0.0)
    h = jnp.maximum(jnp.dot(h, w3_ref[...],
                            preferred_element_type=jnp.float32) + b3_ref[...], 0.0)
    out_ref[...] = jnp.dot(h, w4_ref[...],
                           preferred_element_type=jnp.float32) + b4_ref[...]


def patch_pose_forward(x_nchw, packed, out_ori, out_sca, row_tile=None):
    """Full PatchPoseNet forward (eval mode): conv+pool kernel, then head kernel."""
    cw, cb, w1, b1, w2, b2, w3, b3, w4, b4 = packed
    B, cin, H, W = x_nchw.shape
    c_feat = cw.shape[1]
    cin_pad = cw.shape[0] // 9
    out_pad = w4.shape[1]
    out_tot = out_ori + out_sca

    if row_tile is None or H % row_tile != 0:
        # TODO(synk): mask ragged row tiles / VMEM-budget row_tile for real sizes.
        row_tile = H
    n_row = H // row_tile
    Hp, Wp = H + 2, W + 2

    # Glue: NCHW -> padded NHWC, cin zero-padded to a lane-dense 128, bf16.
    x_pad = jnp.pad(jnp.transpose(x_nchw, (0, 2, 3, 1)),
                    ((0, 0), (1, 1), (1, 1), (0, cin_pad - cin))
                    ).astype(jnp.bfloat16)

    # Explicit VMEM budget: double-buffered slab + weights + output, plus the
    # per-step f32 feature tile, with generous headroom (capped for v7x 64MiB).
    x_block_bytes = Hp * Wp * cin_pad * 2
    vmem_need = (2 * (x_block_bytes + cw.size * 2 + cb.size * 4 + c_feat * 4)
                 + 2 * row_tile * W * c_feat * 4 + c_feat * 4)
    vmem_limit = int(min(max(4 * vmem_need, 16 << 20), 64 << 20))

    cost = pl.CostEstimate(
        flops=2 * B * H * W * 9 * cin_pad * c_feat,
        transcendentals=0,
        bytes_accessed=int(x_pad.size * 2 + cw.size * 2 + cb.size * 4
                           + B * c_feat * 4))

    const2 = lambda b, t: (0, 0)
    pooled = pl.pallas_call(
        functools.partial(_conv_pool_kernel, W, cin_pad, row_tile),
        out_shape=jax.ShapeDtypeStruct((B, 1, c_feat), jnp.float32),
        grid=(B, n_row),
        in_specs=[
            pl.BlockSpec((1, Hp, Wp, cin_pad), lambda b, t: (b, 0, 0, 0)),
            pl.BlockSpec((9 * cin_pad, c_feat), const2),
            pl.BlockSpec((1, c_feat), const2),
        ],
        out_specs=pl.BlockSpec((1, 1, c_feat), lambda b, t: (b, 0, 0)),
        scratch_shapes=[pltpu.VMEM((1, c_feat), jnp.float32)],
        compiler_params=pltpu.CompilerParams(
            dimension_semantics=("parallel", "arbitrary"),
            vmem_limit_bytes=vmem_limit),
        cost_estimate=cost,
    )(x_pad, cw, cb)

    pooled = pooled.reshape(B, c_feat)          # tiny (B*C_FEAT*4 B) round trip

    const1 = lambda i: (0, 0)
    y = pl.pallas_call(
        _heads_kernel,
        out_shape=jax.ShapeDtypeStruct((B, out_pad), jnp.float32),
        grid=(1,),
        in_specs=[pl.BlockSpec((B, c_feat), const1),
                  pl.BlockSpec(w1.shape, const1), pl.BlockSpec(b1.shape, const1),
                  pl.BlockSpec(w2.shape, const1), pl.BlockSpec(b2.shape, const1),
                  pl.BlockSpec(w3.shape, const1), pl.BlockSpec(b3.shape, const1),
                  pl.BlockSpec(w4.shape, const1), pl.BlockSpec(b4.shape, const1)],
        out_specs=pl.BlockSpec((B, out_pad), const1),
    )(pooled, w1, b1, w2, b2, w3, b3, w4, b4)

    return y[:, :out_ori], y[:, out_ori:out_tot]


# ----------------------------------------------------------------------------
# Parameter construction, BN folding, head fusion, lane padding (host-side).
# ----------------------------------------------------------------------------
def _linear_params(key, n_in, n_out):
    kw, kb = jax.random.split(key)
    w = jax.random.normal(kw, (n_out, n_in), jnp.float32) / jnp.sqrt(n_in)
    b = jax.random.normal(kb, (n_out,), jnp.float32) * 0.01
    return w, b                                     # PyTorch layout: (out, in)


def _bn_params(key, n):
    kg, kb, km, kv = jax.random.split(key, 4)
    gamma = 1.0 + 0.1 * jax.random.normal(kg, (n,), jnp.float32)
    beta = 0.1 * jax.random.normal(kb, (n,), jnp.float32)
    mean = 0.1 * jax.random.normal(km, (n,), jnp.float32)
    var = jax.random.uniform(kv, (n,), jnp.float32, minval=0.5, maxval=1.5)
    return gamma, beta, mean, var                   # eval-mode running stats


def build_head_raw(key, c_feat, n_out):
    # Sequential(Linear(C,C), BN(C), ReLU, Linear(C,128), BN(128), ReLU,
    #            Linear(128,64), BN(64), ReLU, Linear(64, n_out))
    dims = [(c_feat, c_feat), (c_feat, 128), (128, 64), (64, n_out)]
    keys = jax.random.split(key, 8)
    layers = []
    for li, (din, dout) in enumerate(dims):
        w, b = _linear_params(keys[2 * li], din, dout)
        if li < 3:
            layers.append((w, b, _bn_params(keys[2 * li + 1], dout)))
        else:
            layers.append((w, b))
    return layers


def _fold_linear_bn(w, b, bn):
    """Exact eval-mode fold: y = BN(xW^T + b) == x(W^T*s) + (b*s + beta - m*s)."""
    gamma, beta, mean, var = bn
    s = gamma * lax.rsqrt(var + BN_EPS)
    return w.T * s[None, :], b * s + beta - mean * s


def _block_diag(a, b):
    z_tr = jnp.zeros((a.shape[0], b.shape[1]), a.dtype)
    z_bl = jnp.zeros((b.shape[0], a.shape[1]), a.dtype)
    return jnp.concatenate(
        [jnp.concatenate([a, z_tr], axis=1),
         jnp.concatenate([z_bl, b], axis=1)], axis=0)


def pack_params(conv_w, conv_b, ori_raw, sca_raw, cin_pad=LANE):
    """Fold BN, fuse the two heads, lane-pad conv K and the final output dim."""
    cout, cin = conv_w.shape[0], conv_w.shape[1]
    # (Cout, Cin, 3, 3) -> (kh, kw, Cin_pad, Cout) -> (9*Cin_pad, Cout): matches
    # the in-kernel tap ordering (di outer, dj middle, channel fastest).
    w = jnp.transpose(conv_w, (2, 3, 1, 0))
    w = jnp.pad(w, ((0, 0), (0, 0), (0, cin_pad - cin), (0, 0)))
    cw = w.reshape(9 * cin_pad, cout).astype(jnp.bfloat16)
    cb = conv_b.reshape(1, cout).astype(jnp.float32)

    def folded(raw):
        outs = [_fold_linear_bn(*layer) for layer in raw[:-1]]
        wl, bl = raw[-1]
        outs.append((wl.T, bl))
        return outs

    o, s = folded(ori_raw), folded(sca_raw)
    fused = [(jnp.concatenate([o[0][0], s[0][0]], axis=1),      # shared input
              jnp.concatenate([o[0][1], s[0][1]], axis=0))]
    for li in range(1, 4):                                      # separate inputs
        fused.append((_block_diag(o[li][0], s[li][0]),
                      jnp.concatenate([o[li][1], s[li][1]], axis=0)))

    # Lane-pad the final layer so the kernel's output store is lane-dense.
    w4, b4 = fused[3]
    out_tot = w4.shape[1]
    out_pad = ((out_tot + LANE - 1) // LANE) * LANE
    fused[3] = (jnp.pad(w4, ((0, 0), (0, out_pad - out_tot))),
                jnp.pad(b4, ((0, out_pad - out_tot),)))

    packed = [cw, cb]
    for wf, bf in fused:
        packed.append(wf.astype(jnp.float32))           # heads stay f32 (tiny)
        packed.append(bf.reshape(1, -1).astype(jnp.float32))
    return tuple(packed)


# ----------------------------------------------------------------------------
# References: exact f32 PyTorch semantics, and a mirror of the kernel math.
# ----------------------------------------------------------------------------
def reference_forward_f32(x_nchw, conv_w, conv_b, ori_raw, sca_raw):
    feat = lax.conv_general_dilated(
        x_nchw, conv_w, window_strides=(1, 1), padding=((1, 1), (1, 1)),
        dimension_numbers=("NCHW", "OIHW", "NCHW"),
        precision=lax.Precision.HIGHEST)
    feat = jnp.maximum(feat + conv_b.reshape(1, -1, 1, 1), 0.0)
    pooled = jnp.max(feat, axis=(2, 3))

    def head(x, raw):
        for w, b, (gamma, beta, mean, var) in raw[:-1]:
            z = jnp.dot(x, w.T, precision=lax.Precision.HIGHEST) + b
            z = (z - mean) / jnp.sqrt(var + BN_EPS) * gamma + beta
            x = jnp.maximum(z, 0.0)
        w, b = raw[-1]
        return jnp.dot(x, w.T, precision=lax.Precision.HIGHEST) + b

    return head(pooled, ori_raw), head(pooled, sca_raw)


def reference_forward_mirror(x_nchw, packed, out_ori, out_sca):
    """Pure-JAX mirror of the kernel math (bf16 conv matmuls, f32 heads)."""
    cw, cb, w1, b1, w2, b2, w3, b3, w4, b4 = packed
    B, cin, H, W = x_nchw.shape
    cin_pad = cw.shape[0] // 9
    x_pad = jnp.pad(jnp.transpose(x_nchw, (0, 2, 3, 1)),
                    ((0, 0), (1, 1), (1, 1), (0, cin_pad - cin))
                    ).astype(jnp.bfloat16)
    taps = [x_pad[:, di:di + H, dj:dj + W, :].reshape(B * H * W, cin_pad)
            for di in range(3) for dj in range(3)]
    patches = jnp.concatenate(taps, axis=-1)
    feat = jnp.dot(patches, cw, preferred_element_type=jnp.float32)
    feat = jnp.maximum(feat + cb, 0.0).reshape(B, H * W, -1)
    h = jnp.max(feat, axis=1)
    h = jnp.maximum(jnp.dot(h, w1, preferred_element_type=jnp.float32) + b1, 0.0)
    h = jnp.maximum(jnp.dot(h, w2, preferred_element_type=jnp.float32) + b2, 0.0)
    h = jnp.maximum(jnp.dot(h, w3, preferred_element_type=jnp.float32) + b3, 0.0)
    y = jnp.dot(h, w4, preferred_element_type=jnp.float32) + b4
    return y[:, :out_ori], y[:, out_ori:out_ori + out_sca]


if __name__ == "__main__":
    key = jax.random.PRNGKey(0)
    B, CIN, H, W = 2, 4, 16, 16
    C_FEAT = 128              # stands in for resnet final_output_channel
    OUT_ORI, OUT_SCA = 8, 8

    k_x, k_cw, k_cb, k_ori, k_sca = jax.random.split(key, 5)
    x = jax.random.normal(k_x, (B, CIN, H, W), jnp.float32)       # NCHW input
    conv_w = jax.random.normal(k_cw, (C_FEAT, CIN, 3, 3), jnp.float32) * 0.1
    conv_b = jax.random.normal(k_cb, (C_FEAT,), jnp.float32) * 0.01
    ori_raw = build_head_raw(k_ori, C_FEAT, OUT_ORI)
    sca_raw = build_head_raw(k_sca, C_FEAT, OUT_SCA)
    packed = pack_params(conv_w, conv_b, ori_raw, sca_raw)

    x_ori, x_sca = patch_pose_forward(x, packed, OUT_ORI, OUT_SCA)
    jax.block_until_ready((x_ori, x_sca))
    assert x_ori.shape == (B, OUT_ORI) and x_sca.shape == (B, OUT_SCA)

    # Tight structural check: kernel vs pure-JAX mirror of the same math.
    m_ori, m_sca = reference_forward_mirror(x, packed, OUT_ORI, OUT_SCA)
    np.testing.assert_allclose(np.asarray(x_ori), np.asarray(m_ori),
                               rtol=1e-3, atol=1e-3)
    np.testing.assert_allclose(np.asarray(x_sca), np.asarray(m_sca),
                               rtol=1e-3, atol=1e-3)

    # Semantic check: kernel vs exact f32 PyTorch-style forward
    # (slack covers the intentional bf16 conv MXU path).
    r_ori, r_sca = reference_forward_f32(x, conv_w, conv_b, ori_raw, sca_raw)
    np.testing.assert_allclose(np.asarray(x_ori), np.asarray(r_ori),
                               rtol=5e-2, atol=5e-2)
    np.testing.assert_allclose(np.asarray(x_sca), np.asarray(r_sca),
                               rtol=5e-2, atol=5e-2)

    print("KERNEL_OK")
</pallas_src>

<mosaic_0001>
module attributes {stable_mosaic.version = 11 : i64} {
  func.func @_conv_pool_kernel(%arg0: i32, %arg1: i32, %arg2: memref<1x18x18x128xbf16, #tpu.memory_space<vmem>>, %arg3: memref<1152x128xbf16, #tpu.memory_space<vmem>>, %arg4: memref<1x128xf32, #tpu.memory_space<vmem>>, %arg5: memref<1x1x128xf32, #tpu.memory_space<vmem>>, %arg6: memref<1x128xf32, #tpu.memory_space<vmem>>) attributes {dimension_semantics = [#tpu.dimension_semantics<parallel>, #tpu.dimension_semantics<arbitrary>], iteration_bounds = array<i64: 2, 1>, scalar_prefetch = 0 : i64, scratch_operands = 1 : i64, tpu.core_type = #tpu.core_type<tc>, window_params = [{transform_indices = @transform_0, window_bounds = array<i64: 1, 18, 18, 128>}, {pipeline_mode = #tpu.pipeline_mode<synchronous>, transform_indices = @transform_1, window_bounds = array<i64: 1152, 128>}, {pipeline_mode = #tpu.pipeline_mode<synchronous>, transform_indices = @transform_2, window_bounds = array<i64: 1, 128>}, {transform_indices = @transform_3, window_bounds = array<i64: 1, 1, 128>}]} {
    %c16_i32 = arith.constant 16 : i32
    %0 = arith.muli %arg1, %c16_i32 : i32
    %1 = tpu.assume_multiple %0, 16 : i32
    %c0_i32 = arith.constant 0 : i32
    %2 = arith.addi %1, %c0_i32 : i32
    %c0 = arith.constant 0 : index
    %3 = arith.index_cast %2 : i32 to index
    %c0_0 = arith.constant 0 : index
    %c0_1 = arith.constant 0 : index
    %4 = vector.load %arg2[%c0, %3, %c0_0, %c0_1] : memref<1x18x18x128xbf16, #tpu.memory_space<vmem>>, vector<1x16x16x128xbf16>
    %5 = vector.shape_cast %4 : vector<1x16x16x128xbf16> to vector<256x128xbf16>
    %c0_2 = arith.constant 0 : index
    %c0_3 = arith.constant 0 : index
    %6 = vector.load %arg3[%c0_2, %c0_3] : memref<1152x128xbf16, #tpu.memory_space<vmem>>, vector<128x128xbf16>
    %cst = arith.constant dense<0.000000e+00> : vector<256x128xf32>
    %7 = tpu.matmul %5, %6, %cst {dimension_numbers = #tpu.dot_dimension_numbers<[1], [0], [0], [1], [0, 0, 1, 1], [], []>} : vector<256x128xbf16>, vector<128x128xbf16>, vector<256x128xf32> -> vector<256x128xf32>
    %c0_i32_4 = arith.constant 0 : i32
    %8 = arith.addi %1, %c0_i32_4 : i32
    %c0_5 = arith.constant 0 : index
    %9 = arith.index_cast %8 : i32 to index
    %c1 = arith.constant 1 : index
    %c0_6 = arith.constant 0 : index
    %10 = vector.load %arg2[%c0_5, %9, %c1, %c0_6] : memref<1x18x18x128xbf16, #tpu.memory_space<vmem>>, vector<1x16x16x128xbf16>
    %11 = vector.shape_cast %10 : vector<1x16x16x128xbf16> to vector<256x128xbf16>
    %c128 = arith.constant 128 : index
    %c0_7 = arith.constant 0 : index
    %12 = vector.load %arg3[%c128, %c0_7] : memref<1152x128xbf16, #tpu.memory_space<vmem>>, vector<128x128xbf16>
    %cst_8 = arith.constant dense<0.000000e+00> : vector<256x128xf32>
    %13 = tpu.matmul %11, %12, %cst_8 {dimension_numbers = #tpu.dot_dimension_numbers<[1], [0], [0], [1], [0, 0, 1, 1], [], []>} : vector<256x128xbf16>, vector<128x128xbf16>, vector<256x128xf32> -> vector<256x128xf32>
    %14 = arith.addf %7, %13 : vector<256x128xf32>
    %c0_i32_9 = arith.constant 0 : i32
    %15 = arith.addi %1, %c0_i32_9 : i32
    %c0_10 = arith.constant 0 : index
    %16 = arith.index_cast %15 : i32 to index
    %c2 = arith.constant 2 : index
    %c0_11 = arith.constant 0 : index
    %17 = vector.load %arg2[%c0_10, %16, %c2, %c0_11] : memref<1x18x18x128xbf16, #tpu.memory_space<vmem>>, vector<1x16x16x128xbf16>
    %18 = vector.shape_cast %17 : vector<1x16x16x128xbf16> to vector<256x128xbf16>
    %c256 = arith.constant 256 : index
    %c0_12 = arith.constant 0 : index
    %19 = vector.load %arg3[%c256, %c0_12] : memref<1152x128xbf16, #tpu.memory_space<vmem>>, vector<128x128xbf16>
    %cst_13 = arith.constant dense<0.000000e+00> : vector<256x128xf32>
    %20 = tpu.matmul %18, %19, %cst_13 {dimension_numbers = #tpu.dot_dimension_numbers<[1], [0], [0], [1], [0, 0, 1, 1], [], []>} : vector<256x128xbf16>, vector<128x128xbf16>, vector<256x128xf32> -> vector<256x128xf32>
    %21 = arith.addf %14, %20 : vector<256x128xf32>
    %c1_i32 = arith.constant 1 : i32
    %22 = arith.addi %1, %c1_i32 : i32
    %c0_14 = arith.constant 0 : index
    %23 = arith.index_cast %22 : i32 to index
    %c0_15 = arith.constant 0 : index
    %c0_16 = arith.constant 0 : index
    %24 = vector.load %arg2[%c0_14, %23, %c0_15, %c0_16] : memref<1x18x18x128xbf16, #tpu.memory_space<vmem>>, vector<1x16x16x128xbf16>
    %25 = vector.shape_cast %24 : vector<1x16x16x128xbf16> to vector<256x128xbf16>
    %c384 = arith.constant 384 : index
    %c0_17 = arith.constant 0 : index
    %26 = vector.load %arg3[%c384, %c0_17] : memref<1152x128xbf16, #tpu.memory_space<vmem>>, vector<128x128xbf16>
    %cst_18 = arith.constant dense<0.000000e+00> : vector<256x128xf32>
    %27 = tpu.matmul %25, %26, %cst_18 {dimension_numbers = #tpu.dot_dimension_numbers<[1], [0], [0], [1], [0, 0, 1, 1], [], []>} : vector<256x128xbf16>, vector<128x128xbf16>, vector<256x128xf32> -> vector<256x128xf32>
    %28 = arith.addf %21, %27 : vector<256x128xf32>
    %c1_i32_19 = arith.constant 1 : i32
    %29 = arith.addi %1, %c1_i32_19 : i32
    %c0_20 = arith.constant 0 : index
    %30 = arith.index_cast %29 : i32 to index
    %c1_21 = arith.constant 1 : index
    %c0_22 = arith.constant 0 : index
    %31 = vector.load %arg2[%c0_20, %30, %c1_21, %c0_22] : memref<1x18x18x128xbf16, #tpu.memory_space<vmem>>, vector<1x16x16x128xbf16>
    %32 = vector.shape_cast %31 : vector<1x16x16x128xbf16> to vector<256x128xbf16>
    %c512 = arith.constant 512 : index
    %c0_23 = arith.constant 0 : index
    %33 = vector.load %arg3[%c512, %c0_23] : memref<1152x128xbf16, #tpu.memory_space<vmem>>, vector<128x128xbf16>
    %cst_24 = arith.constant dense<0.000000e+00> : vector<256x128xf32>
    %34 = tpu.matmul %32, %33, %cst_24 {dimension_numbers = #tpu.dot_dimension_numbers<[1], [0], [0], [1], [0, 0, 1, 1], [], []>} : vector<256x128xbf16>, vector<128x128xbf16>, vector<256x128xf32> -> vector<256x128xf32>
    %35 = arith.addf %28, %34 : vector<256x128xf32>
    %c1_i32_25 = arith.constant 1 : i32
    %36 = arith.addi %1, %c1_i32_25 : i32
    %c0_26 = arith.constant 0 : index
    %37 = arith.index_cast %36 : i32 to index
    %c2_27 = arith.constant 2 : index
    %c0_28 = arith.constant 0 : index
    %38 = vector.load %arg2[%c0_26, %37, %c2_27, %c0_28] : memref<1x18x18x128xbf16, #tpu.memory_space<vmem>>, vector<1x16x16x128xbf16>
    %39 = vector.shape_cast %38 : vector<1x16x16x128xbf16> to vector<256x128xbf16>
    %c640 = arith.constant 640 : index
    %c0_29 = arith.constant 0 : index
    %40 = vector.load %arg3[%c640, %c0_29] : memref<1152x128xbf16, #tpu.memory_space<vmem>>, vector<128x128xbf16>
    %cst_30 = arith.constant dense<0.000000e+00> : vector<256x128xf32>
    %41 = tpu.matmul %39, %40, %cst_30 {dimension_numbers = #tpu.dot_dimension_numbers<[1], [0], [0], [1], [0, 0, 1, 1], [], []>} : vector<256x128xbf16>, vector<128x128xbf16>, vector<256x128xf32> -> vector<256x128xf32>
    %42 = arith.addf %35, %41 : vector<256x128xf32>
    %c2_i32 = arith.constant 2 : i32
    %43 = arith.addi %1, %c2_i32 : i32
    %c0_31 = arith.constant 0 : index
    %44 = arith.index_cast %43 : i32 to index
    %c0_32 = arith.constant 0 : index
    %c0_33 = arith.constant 0 : index
    %45 = vector.load %arg2[%c0_31, %44, %c0_32, %c0_33] : memref<1x18x18x128xbf16, #tpu.memory_space<vmem>>, vector<1x16x16x128xbf16>
    %46 = vector.shape_cast %45 : vector<1x16x16x128xbf16> to vector<256x128xbf16>
    %c768 = arith.constant 768 : index
    %c0_34 = arith.constant 0 : index
    %47 = vector.load %arg3[%c768, %c0_34] : memref<1152x128xbf16, #tpu.memory_space<vmem>>, vector<128x128xbf16>
    %cst_35 = arith.constant dense<0.000000e+00> : vector<256x128xf32>
    %48 = tpu.matmul %46, %47, %cst_35 {dimension_numbers = #tpu.dot_dimension_numbers<[1], [0], [0], [1], [0, 0, 1, 1], [], []>} : vector<256x128xbf16>, vector<128x128xbf16>, vector<256x128xf32> -> vector<256x128xf32>
    %49 = arith.addf %42, %48 : vector<256x128xf32>
    %c2_i32_36 = arith.constant 2 : i32
    %50 = arith.addi %1, %c2_i32_36 : i32
    %c0_37 = arith.constant 0 : index
    %51 = arith.index_cast %50 : i32 to index
    %c1_38 = arith.constant 1 : index
    %c0_39 = arith.constant 0 : index
    %52 = vector.load %arg2[%c0_37, %51, %c1_38, %c0_39] : memref<1x18x18x128xbf16, #tpu.memory_space<vmem>>, vector<1x16x16x128xbf16>
    %53 = vector.shape_cast %52 : vector<1x16x16x128xbf16> to vector<256x128xbf16>
    %c896 = arith.constant 896 : index
    %c0_40 = arith.constant 0 : index
    %54 = vector.load %arg3[%c896, %c0_40] : memref<1152x128xbf16, #tpu.memory_space<vmem>>, vector<128x128xbf16>
    %cst_41 = arith.constant dense<0.000000e+00> : vector<256x128xf32>
    %55 = tpu.matmul %53, %54, %cst_41 {dimension_numbers = #tpu.dot_dimension_numbers<[1], [0], [0], [1], [0, 0, 1, 1], [], []>} : vector<256x128xbf16>, vector<128x128xbf16>, vector<256x128xf32> -> vector<256x128xf32>
    %56 = arith.addf %49, %55 : vector<256x128xf32>
    %c2_i32_42 = arith.constant 2 : i32
    %57 = arith.addi %1, %c2_i32_42 : i32
    %c0_43 = arith.constant 0 : index
    %58 = arith.index_cast %57 : i32 to index
    %c2_44 = arith.constant 2 : index
    %c0_45 = arith.constant 0 : index
    %59 = vector.load %arg2[%c0_43, %58, %c2_44, %c0_45] : memref<1x18x18x128xbf16, #tpu.memory_space<vmem>>, vector<1x16x16x128xbf16>
    %60 = vector.shape_cast %59 : vector<1x16x16x128xbf16> to vector<256x128xbf16>
    %c1024 = arith.constant 1024 : index
    %c0_46 = arith.constant 0 : index
    %61 = vector.load %arg3[%c1024, %c0_46] : memref<1152x128xbf16, #tpu.memory_space<vmem>>, vector<128x128xbf16>
    %cst_47 = arith.constant dense<0.000000e+00> : vector<256x128xf32>
    %62 = tpu.matmul %60, %61, %cst_47 {dimension_numbers = #tpu.dot_dimension_numbers<[1], [0], [0], [1], [0, 0, 1, 1], [], []>} : vector<256x128xbf16>, vector<128x128xbf16>, vector<256x128xf32> -> vector<256x128xf32>
    %63 = arith.addf %56, %62 : vector<256x128xf32>
    %c0_48 = arith.constant 0 : index
    %c0_49 = arith.constant 0 : index
    %64 = vector.load %arg4[%c0_48, %c0_49] : memref<1x128xf32, #tpu.memory_space<vmem>>, vector<1x128xf32>
    %65 = vector.broadcast %64 : vector<1x128xf32> to vector<256x128xf32>
    %66 = arith.addf %63, %65 : vector<256x128xf32>
    %cst_50 = arith.constant 0.000000e+00 : f32
    %67 = vector.broadcast %cst_50 : f32 to vector<256x128xf32>
    %68 = arith.maximumf %66, %67 : vector<256x128xf32>
    %c0_i32_51 = arith.constant 0 : i32
    %69 = arith.cmpi eq, %arg1, %c0_i32_51 : i32
    %70 = arith.extui %69 : i1 to i32
    %c0_i32_52 = arith.constant 0 : i32
    %71 = arith.cmpi ne, %70, %c0_i32_52 : i32
    scf.if %71 {
      %cst_60 = arith.constant 0xFF800000 : f32
      %80 = vector.broadcast %cst_60 : f32 to vector<1x128xf32>
      %c0_61 = arith.constant 0 : index
      %c0_62 = arith.constant 0 : index
      %81 = vector.load %arg6[%c0_61, %c0_62] : memref<1x128xf32, #tpu.memory_space<vmem>>, vector<1x128xf32>
      tpu.vector_store %arg6[%c0_61, %c0_62], %80 {strides = array<i32>} : memref<1x128xf32, #tpu.memory_space<vmem>>, vector<1x128xf32>,
    } else {
    }
    %c0_53 = arith.constant 0 : index
    %c0_54 = arith.constant 0 : index
    %72 = vector.load %arg6[%c0_53, %c0_54] : memref<1x128xf32, #tpu.memory_space<vmem>>, vector<1x128xf32>
    %cst_55 = arith.constant dense<0xFF800000> : vector<128xf32>
    %73 = vector.multi_reduction <maximumf>, %68, %cst_55 [0] : vector<256x128xf32> to vector<128xf32>
    %74 = vector.shape_cast %73 : vector<128xf32> to vector<1x128xf32>
    %75 = arith.maximumf %72, %74 : vector<1x128xf32>
    %c0_56 = arith.constant 0 : index
    %c0_57 = arith.constant 0 : index
    %76 = vector.load %arg6[%c0_56, %c0_57] : memref<1x128xf32, #tpu.memory_space<vmem>>, vector<1x128xf32>
    tpu.vector_store %arg6[%c0_56, %c0_57], %75 {strides = array<i32>} : memref<1x128xf32, #tpu.memory_space<vmem>>, vector<1x128xf32>,
    %c0_i32_58 = arith.constant 0 : i32
    %77 = arith.cmpi eq, %arg1, %c0_i32_58 : i32
    %78 = arith.extui %77 : i1 to i32
    %c0_i32_59 = arith.constant 0 : i32
    %79 = arith.cmpi ne, %78, %c0_i32_59 : i32
    scf.if %79 {
      %c0_60 = arith.constant 0 : index
      %c0_61 = arith.constant 0 : index
      %80 = vector.load %arg6[%c0_60, %c0_61] : memref<1x128xf32, #tpu.memory_space<vmem>>, vector<1x128xf32>
      %81 = vector.shape_cast %80 : vector<1x128xf32> to vector<1x1x128xf32>
      %c0_62 = arith.constant 0 : index
      %c0_63 = arith.constant 0 : index
      %c0_64 = arith.constant 0 : index
      %82 = vector.load %arg5[%c0_62, %c0_63, %c0_64] : memref<1x1x128xf32, #tpu.memory_space<vmem>>, vector<1x1x128xf32>
      tpu.vector_store %arg5[%c0_62, %c0_63, %c0_64], %81 {strides = array<i32>} : memref<1x1x128xf32, #tpu.memory_space<vmem>>, vector<1x1x128xf32>,
    } else {
    }
    return
  }
  func.func @transform_0(%arg0: i32, %arg1: i32) -> (i32, i32, i32, i32) {
    %c0_i32 = arith.constant 0 : i32
    %c0_i32_0 = arith.constant 0 : i32
    %c0_i32_1 = arith.constant 0 : i32
    %c0_i32_2 = arith.constant 0 : i32
    return %arg0, %c0_i32, %c0_i32_0, %c0_i32_1 : i32, i32, i32, i32
  }
  func.func @transform_1(%arg0: i32, %arg1: i32) -> (i32, i32) {
    %c0_i32 = arith.constant 0 : i32
    %c0_i32_0 = arith.constant 0 : i32
    %c0_i32_1 = arith.constant 0 : i32
    return %c0_i32, %c0_i32_0 : i32, i32
  }
  func.func @transform_2(%arg0: i32, %arg1: i32) -> (i32, i32) {
    %c0_i32 = arith.constant 0 : i32
    %c0_i32_0 = arith.constant 0 : i32
    %c0_i32_1 = arith.constant 0 : i32
    return %c0_i32, %c0_i32_0 : i32, i32
  }
  func.func @transform_3(%arg0: i32, %arg1: i32) -> (i32, i32, i32) {
    %c0_i32 = arith.constant 0 : i32
    %c0_i32_0 = arith.constant 0 : i32
    %c0_i32_1 = arith.constant 0 : i32
    return %arg0, %c0_i32, %c0_i32_0 : i32, i32, i32
  }
}

</mosaic_0001>

<bundles_post_ra>
// kernel: tpu_custom_call.1
= control target key start
LH: loop header
LB: loop body
LE: loop exit
PB: predicated region body
PF: predicated region fallthrough
CT: control target
= control target key end

     0   :  { %8 = vsyncpa [#allocation4], 0  ;;  %s9306_s0 = inlined_call_operand.vmem [shape: bf16[2,18,18,128], index: 0, kind: input, shape index: {}]   ;;  %s9307_s1 = inlined_call_operand.vmem [shape: bf16[1152,128], index: 1, kind: input, shape index: {}]   ;;  %s9308_s2 = inlined_call_operand.vmem [shape: f32[1,128], index: 2, kind: input, shape index: {}]   ;;  %s9309_s3 = inlined_call_operand.hbm [shape: f32[2,1,128], index: 3, kind: output, shape index: {}]  }
   0x1   :  { %10 = vsyncpa [#allocation4 + $0x1], 0  ;;  %s6615_s12 = smov 0   ;;  %s6617_s13 = smov 0  }
   0x2   :  { %s6619_s14 = smov 0   ;;  %s6621_s15 = smov 0  }
   0x3   :  { %s6623_s16 = smov 0   ;;  %s6625_s17 = smov 0  }
   0x4 LB: > { %s5199_s18 = sadd.s32 4294967295, %s6591_s17   ;;  %s5200_s19 = sadd.s32 4294967294, %s6591_s17   ;;  %s6591_s17 = sphi %s6625_s17, %s16_s17   ;;  %s6587_s16 = sphi %s6623_s16, %s9477_s16   ;;  %s6583_s15 = sphi %s6621_s15, %s9476_s15   ;;  %s6579_s14 = sphi %s6619_s14, %s9475_s14   ;;  %s6575_s13 = sphi %s6617_s13, %s9474_s13   ;;  %s6571_s12 = sphi %s6615_s12, %s9473_s12  }
   0x5   : > { %s28_s20 = sadd.s32 1, %s6587_s16  ;;  %s103_s21 = sadd.s32 1, %s6579_s14 }
   0x6   : > { %p30_p0 = scmp.ge.s32.totalorder %s28_s20, 2  ;;  %p113_p1 = scmp.ne.s32.totalorder %s6579_s14, %s6575_s13 }
   0x7   : > { %p114_p2 = scmp.eq.s32.totalorder %s5199_s18, 1  ;;  %p119_p3 = scmp.ne.s32.totalorder %s6575_s13, %s6571_s12 }
   0x8   : > { %s9479_s20 = smov (%p30_p0, %s28_s20), 0  ;;  %p120_p5 = scmp.eq.s32.totalorder %s5200_s19, 1 }
   0x9   : > { %p6655_p4 = por %p114_p2, %p113_p1  ;;  %s100_s23 = ssub.s32 %s6587_s16, %s9479_s20 }
   0xa   : > { %p5203_p6 = scmp.ge.s32.totalorder %s6591_s17, 1  ;;  %p101_p7 = scmp.eq.s32.totalorder %s100_s23, 0 }
   0xb   : > { %p6662_p8 = por %p120_p5, %p119_p3  ;;  %p152_p9 = scmp.lt.s32.totalorder %s6591_s17, 3 }
   0xc   : > { %s6668_s25 = scalar_select %p101_p7, %s6579_s14, %s103_s21  }
   0xd   : > { %p153_p10 = pnand %p5203_p6, %p152_p9 }
   0xf   : > { %156 = sbr.rel (%p153_p10) target bundleno = 606 (0x25e), region = 32 }
  0x14   : > { %v6386_v0 = vld [vmem:[%s9307_s1 + $0x78] sm:$0xff]   ;;  %p175_p11 = scmp.lt.s32.totalorder %s6583_s15, 1  ;;  %v6387_v1 = vld [vmem:[%s9307_s1 + $0x70] sm:$0xff]   ;;  %v6388_v2 = vld [vmem:[%s9307_s1 + $0x68] sm:$0xff]   ;;  %vm249_vm0 = vsmask.f32 3328 }
  0x15   : > { %5881 = vmatprep.subr.bf16.mxu0 %v6386_v0  ;;  %6313 = vmatprep.subr.bf16.mxu1 %v6386_v0  ;;  %v6389_v3 = vld [vmem:[%s9307_s1 + $0x60] sm:$0xff]   ;;  %vm250_vm1 = vsmask.f32 7440  ;;  %v6390_v17 = vld [vmem:[%s9307_s1 + $0x58] sm:$0xff]   ;;  %v6391_v33 = vld [vmem:[%s9307_s1 + $0x50] sm:$0xff]   ;;  %vm1278_vm3 = vcmask 1042432  }
  0x16   : > { %s176_s30 = scalar_select %p175_p11, %s6583_s15, 1  ;;  %5882 = vmatpush3.bf16.msra.mxu0 %v6386_v0  ;;  %6321 = vmatpush3.bf16.msra.mxu1 %v6386_v0  ;;  %vm6715_vm2 = vmor %vm249_vm0, %vm250_vm1  ;;  %v6392_v58 = vld [vmem:[%s9307_s1 + $0x48] sm:$0xff]   ;;  %vm1279_vm4 = vcmask 1046532  }
  0x17   : > { %5883 = vmatprep.subr.bf16.mxu0 %v6387_v1  ;;  %6314 = vmatprep.subr.bf16.mxu1 %v6387_v1  ;;  %vm7026_vm5 = vmor %vm1278_vm3, %vm1279_vm4  ;;  %s173_s4 = sand.u32 1, %s6575_s13   ;;  %s5662_s5 = sshll.u32 %s6583_s15, 4 }
  0x18   : > { %s6329_s6 = smul.u32 216, %s176_s30  ;;  %s9266_s11 = scalar_lea.hbm %s9309_s3, %s5662_s5 }
  0x19   : > { %s5114_s18 = scalar_lea.sflag [#allocation4], %s173_s4  ;;  %s6594_s21 = smov [#allocation3]  }
  0x1a   : > { %s6684_s9 = scalar_lea.vmem %s9306_s0, %s6329_s6  ;;  %5884 = vmatpush3.bf16.msra.mxu0 %v6387_v1  ;;  %6322 = vmatpush3.bf16.msra.mxu1 %v6387_v1  ;;  %s174_s6 = scalar_lea.vmem [#allocation3], %s173_s4 }
  0x1b   : > { %5885 = vmatprep.subr.bf16.mxu0 %v6388_v2  ;;  %6315 = vmatprep.subr.bf16.mxu1 %v6388_v2  ;;  %v6690_v4 = vld [vmem:[%s6684_s9] sm:$0xf]  ;;  %v6693_v5 = vld [vmem:[%s6684_s9 + $0x4] sm:$0xf]  ;;  %v6696_v6 = vld [vmem:[%s6684_s9 + $0x8] sm:$0x1] }
  0x1c   : > { %v253_v7 = vshrl.u32 %v6690_v4, 16  ;;  %v256_v8 = vshll.u32 %v6690_v4, 16  ;;  %v262_v9 = vshll.u32 %v6693_v5, 16  ;;  %v266_v10 = vshrl.u32 %v6693_v5, 16  ;;  %v201_v12 = vld [vmem:[%s6684_s9 + $0x60] sm:$0xf] }
  0x1d   : > { %v272_v11 = vshll.u32 %v6696_v6, 16  ;;  %v202_v15 = vld [vmem:[%s6684_s9 + $0x64] sm:$0xf]  ;;  %v241_v16 = vld [vmem:[%s6684_s9 + $0x68] sm:$0x1]  ;;  %v445_v21 = vshrl.u32 %v201_v12, 16 }
  0x1e   : > { %5886 = vmatpush3.bf16.msra.mxu0 %v6388_v2  ;;  %6323 = vmatpush3.bf16.msra.mxu1 %v6388_v2  ;;  %v255_v13 = vrot.slane %v253_v7, 4  ;;  %v258_v14 = vrot.slane %v256_v8, 5  ;;  %v264_v18 = vrot.slane %v262_v9, 5  ;;  %v268_v19 = vrot.slane %v266_v10, 4  ;;  %v6711_v26 = vld [vmem:[%s6684_s9 + $0xc] sm:$0xf] }
  0x1f   : > { %5887 = vmatprep.subr.bf16.mxu0 %v6389_v3  ;;  %6316 = vmatprep.subr.bf16.mxu1 %v6389_v3  ;;  %v448_v23 = vshll.u32 %v201_v12, 16  ;;  %v454_v24 = vshll.u32 %v202_v15, 16  ;;  %v458_v25 = vshrl.u32 %v202_v15, 16  ;;  %v274_v29 = vrot.slane %v272_v11, 5  ;;  %v6720_v32 = vld [vmem:[%s6684_s9 + $0x10] sm:$0xf] }
  0x20   : > { %v259_v22 = vor.u32 %v258_v14, %v255_v13  ;;  %v269_v28 = vor.u32 %v268_v19, %v264_v18  ;;  %v447_v30 = vrot.slane %v445_v21, 4  ;;  %v464_v31 = vshll.u32 %v241_v16, 16  ;;  %v6726_v40 = vld [vmem:[%s6684_s9 + $0x14] sm:$0x1]  ;;  %v203_v47 = vld [vmem:[%s6684_s9 + $0x6c] sm:$0xf] }
  0x21   : > { %v450_v35 = vrot.slane %v448_v23, 5  ;;  %v456_v36 = vrot.slane %v454_v24, 5  ;;  %v460_v37 = vrot.slane %v458_v25, 4  ;;  %v277_v41 = vshrl.u32 %v6711_v26, 16  ;;  %v204_v52 = vld [vmem:[%s6684_s9 + $0x70] sm:$0xf] }
  0x22   : > { %5888 = vmatpush3.bf16.msra.mxu0 %v6389_v3  ;;  %6324 = vmatpush3.bf16.msra.mxu1 %v6389_v3  ;;  %v260_v34 = vrot.slane %v259_v22, 4  ;;  %v270_v38 = vrot.slane %v269_v28, 4  ;;  %v466_v39 = vrot.slane %v464_v31, 5  ;;  %v280_v42 = vshll.u32 %v6711_v26, 16  ;;  %v242_v57 = vld [vmem:[%s6684_s9 + $0x74] sm:$0x1] }
  0x23   : > { %5889 = vmatprep.subr.bf16.mxu0 %v6390_v17  ;;  %6317 = vmatprep.subr.bf16.mxu1 %v6390_v17  ;;  %v451_v44 = vor.u32 %v450_v35, %v447_v30  ;;  %v461_v45 = vor.u32 %v460_v37, %v456_v36  ;;  %v286_v46 = vshll.u32 %v6720_v32, 16  ;;  %v279_v49 = vrot.slane %v277_v41, 4  ;;  %v6749_v14 = vld [vmem:[%s6684_s9 + $0x18] sm:$0xf]  ;;  %v6393_v15 = vld [vmem:[%s9307_s1 + $0x40] sm:$0xff]   ;;  %s5126_s7 = sshll.u32 %s174_s6, 4  ;;  %s5127_s7 = int_to_ptr.vmem [resolvable:$true] %s5126_s7 }
  0x24   : > { %v265_v43 = vsel %vm6715_vm2, %v260_v34, %v264_v18  ;;  %v275_v48 = vsel %vm6715_vm2, %v270_v38, %v274_v29  ;;  %v282_v50 = vrot.slane %v280_v42, 5  ;;  %v290_v51 = vshrl.u32 %v6720_v32, 16  ;;  %v6757_v19 = vld [vmem:[%s6684_s9 + $0x1c] sm:$0xf]  ;;  %v6762_v25 = vld [vmem:[%s6684_s9 + $0x20] sm:$0x1] }
  0x25   : > { %v5205_v53 = vcombine.low %v265_v43, %v275_v48  ;;  %v452_v54 = vrot.slane %v451_v44, 4  ;;  %v462_v55 = vrot.slane %v461_v45, 4  ;;  %v288_v56 = vrot.slane %v286_v46, 5  ;;  %v205_v34 = vld [vmem:[%s6684_s9 + $0x78] sm:$0xf]  ;;  %s6515_s19 = scalar_lea.vmem %s5127_s7, 16 }
  0x26   : > { %5890 = vmatpush3.bf16.msra.mxu0 %v6390_v17  ;;  %6325 = vmatpush3.bf16.msra.mxu1 %v6390_v17  ;;  %v283_v59 = vor.u32 %v282_v50, %v279_v49  ;;  %v292_v60 = vrot.slane %v290_v51, 4  ;;  %v296_v61 = vshll.u32 %v6726_v40, 16  ;;  %v469_v1 = vshrl.u32 %v203_v47, 16  ;;  %v6394_v41 = vld [vmem:[%s9307_s1 + $0x38] sm:$0xff]   ;;  %v243_v49 = vld [vmem:[%s6684_s9 + $0x80] sm:$0x1]  ;;  %p6516_p12 = scmp.ne.s32.totalorder %s5127_s7, %s6515_s19 }
  0x27   : > { %5891 = vmatprep.subr.bf16.mxu0 %v6391_v33  ;;  %6318 = vmatprep.subr.bf16.mxu1 %v6391_v33  ;;  %v457_v63 = vsel %vm6715_vm2, %v452_v54, %v456_v36  ;;  %v467_v0 = vsel %vm6715_vm2, %v462_v55, %v466_v39  ;;  %v472_v2 = vshll.u32 %v203_v47, 16  ;;  %v478_v12 = vshll.u32 %v204_v52, 16  ;;  %v6771_v39 = vld [vmem:[%s6684_s9 + $0x7c] sm:$0xf]  ;;  %s6519_s23 = sshll.u32 %s6594_s21, 4  ;;  %s6520_s23 = int_to_ptr.vmem [resolvable:$false] %s6519_s23 }
  0x28   : > { %5897 = vmatprep.mubr.bf16.mxu0 %v5205_v53  ;;  %v5213_v3 = vcombine.low %v457_v63, %v467_v0  ;;  %v284_v7 = vrot.slane %v283_v59, 4  ;;  %v293_v8 = vor.u32 %v292_v60, %v288_v56  ;;  %v298_v9 = vrot.slane %v296_v61, 5  ;;  %v6395_v42 = vld [vmem:[%s9307_s1 + $0xb8] sm:$0xff]   ;;  %v6397_v59 = vld [vmem:[%s9307_s1 + $0xb0] sm:$0xff]   ;;  %v6798_v0 = vld [vmem:[%s6684_s9 + $0x28] sm:$0xf]  ;;  %p6517_p13 = pnand %p6516_p12, %p6655_p4  ;;  %p6522_p1 = scmp.lt.s32.totalorder %s5127_s7, %s6520_s23 }
  0x29   : > { %v471_v10 = vrot.slane %v469_v1, 4  ;;  %v474_v11 = vrot.slane %v472_v2, 5  ;;  %v482_v13 = vshrl.u32 %v204_v52, 16  ;;  %v488_v18 = vshll.u32 %v242_v57, 16  ;;  %v6396_v52 = vld [vmem:[%s9307_s1 + $0x30] sm:$0xff]   ;;  %s6521_s15 = scalar_lea.vmem %s6520_s23, 32 }
  0x2a   : > { %5892 = vmatpush3.bf16.msra.mxu0 %v6391_v33  ;;  %6326 = vmatpush3.bf16.msra.mxu1 %v6391_v33  ;;  %v289_v16 = vsel %vm6715_vm2, %v284_v7, %v288_v56  ;;  %v294_v17 = vrot.slane %v293_v8, 4  ;;  %v480_v23 = vrot.slane %v478_v12, 5  ;;  %v301_v28 = vshrl.u32 %v6749_v14, 16  ;;  %v6789_v57 = vld [vmem:[%s6684_s9 + $0x24] sm:$0xf]  ;;  %p6518_p0 = pneg %p6517_p13  ;;  %p6523_p2 = scmp.lt.s32.totalorder %s6521_s15, %s6515_s19 }
  0x2b   : > { %5893 = vmatprep.subr.bf16.mxu0 %v6392_v58  ;;  %6319 = vmatprep.subr.bf16.mxu1 %v6392_v58  ;;  %v475_v22 = vor.u32 %v474_v11, %v471_v10  ;;  %v484_v24 = vrot.slane %v482_v13, 4  ;;  %v490_v30 = vrot.slane %v488_v18, 5  ;;  %v304_v31 = vshll.u32 %v6749_v14, 16  ;;  %v6801_v8 = vld [vmem:[%s6684_s9 + $0x2c] sm:$0x1] }
  0x2c   : > { %5913 = vmatprep.mubr.bf16.mxu1 %v5213_v3  ;;  %v299_v29 = vsel %vm6715_vm2, %v294_v17, %v298_v9  ;;  %v310_v33 = vshll.u32 %v6757_v19, 16  ;;  %v303_v38 = vrot.slane %v301_v28, 4  ;;  %v314_v45 = vshrl.u32 %v6757_v19, 16  ;;  %v6805_v13 = vld [vmem:[%s6684_s9 + $0x84] sm:$0xf]  ;;  %p6524_p3 = por %p6523_p2, %p6522_p1 }
  0x2d   : > { %v5206_v35 = vcombine.low %v289_v16, %v299_v29  ;;  %v476_v36 = vrot.slane %v475_v22, 4  ;;  %v485_v37 = vor.u32 %v484_v24, %v480_v23  ;;  %v306_v43 = vrot.slane %v304_v31, 5  ;;  %v6812_v22 = vld [vmem:[%s6684_s9 + $0x88] sm:$0xf] }
  0x2e   : > { %5894 = vmatpush3.bf16.msra.mxu0 %v6392_v58  ;;  %6327 = vmatpush3.bf16.msra.mxu1 %v6392_v58  ;;  %v312_v44 = vrot.slane %v310_v33, 5  ;;  %v320_v46 = vshll.u32 %v6762_v25, 16  ;;  %v493_v50 = vshrl.u32 %v205_v34, 16  ;;  %v496_v51 = vshll.u32 %v205_v34, 16  ;;  %p6525_p5 = pnand %p6524_p3, %p6518_p0 }
  0x2f   : > { %5895 = vmatprep.subr.bf16.mxu0 %v6393_v15  ;;  %6320 = vmatprep.subr.bf16.mxu1 %v6393_v15  ;;  %v481_v47 = vsel %vm6715_vm2, %v476_v36, %v480_v23  ;;  %v486_v48 = vrot.slane %v485_v37, 4  ;;  %v307_v53 = vor.u32 %v306_v43, %v303_v38  ;;  %v316_v54 = vrot.slane %v314_v45, 4  ;;  %v6821_v36 = vld [vmem:[%s6684_s9 + $0x8c] sm:$0x1] }
  0x30   : > { %v322_v55 = vrot.slane %v320_v46, 5  ;;  %v502_v56 = vshll.u32 %v6771_v39, 16  ;;  %v495_v60 = vrot.slane %v493_v50, 4  ;;  %v498_v61 = vrot.slane %v496_v51, 5  ;;  %v6399_v37 = vld [vmem:[%s9307_s1 + $0xa8] sm:$0xff]  }
  0x31   : > { %v491_v58 = vsel %vm6715_vm2, %v486_v48, %v490_v30  ;;  %v506_v63 = vshrl.u32 %v6771_v39, 16  ;;  %v308_v2 = vrot.slane %v307_v53, 4  ;;  %v317_v3 = vor.u32 %v316_v54, %v312_v44  ;;  %v6398_v30 = vld [vmem:[%s9307_s1 + $0x28] sm:$0xff]   ;;  %v6836_v53 = vld [vmem:[%s6684_s9 + $0x30] sm:$0xf] }
  0x32   : > { %5896 = vmatpush3.bf16.msra.mxu0 %v6393_v15  ;;  %6328 = vmatpush3.bf16.msra.mxu1 %v6393_v15  ;;  %v5214_v1 = vcombine.low %v481_v47, %v491_v58  ;;  %v504_v7 = vrot.slane %v502_v56, 5  ;;  %v499_v9 = vor.u32 %v498_v61, %v495_v60  ;;  %v512_v11 = vshll.u32 %v243_v49, 16  ;;  %v6845_v60 = vld [vmem:[%s6684_s9 + $0x34] sm:$0xf] }
  0x33   : > { %5929 = vmatprep.subr.bf16.mxu1 %v6394_v41  ;;  %5977 = vmatprep.subr.bf16.mxu0 %v6395_v42  ;;  %v508_v10 = vrot.slane %v506_v63, 4  ;;  %v325_v12 = vshrl.u32 %v6789_v57, 16  ;;  %v313_v15 = vsel %vm6715_vm2, %v308_v2, %v312_v44  ;;  %v318_v16 = vrot.slane %v317_v3, 4 }
  0x34   : > { %v328_v17 = vshll.u32 %v6789_v57, 16  ;;  %v334_v18 = vshll.u32 %v6798_v0, 16  ;;  %v500_v23 = vrot.slane %v499_v9, 4  ;;  %v514_v28 = vrot.slane %v512_v11, 5 }
  0x35   : > { %5898 = vmatmul.mubr.bf16.vlgmr.msra.gmra.mxu0 %v5206_v35  ;;  %5914 = vmatmul.mubr.bf16.vlgmr.msra.gmra.mxu1 %v5214_v1  ;;  %v509_v24 = vor.u32 %v508_v10, %v504_v7  ;;  %v327_v29 = vrot.slane %v325_v12, 4  ;;  %v323_v31 = vsel %vm6715_vm2, %v318_v16, %v322_v55  ;;  %v338_v35 = vshrl.u32 %v6798_v0, 16  ;;  %v6853_v16 = vld [vmem:[%s6684_s9 + $0x38] sm:$0x1] }
  0x36   : > { %5930 = vmatpush3.bf16.msra.mxu1 %v6394_v41  ;;  %5978 = vmatpush3.bf16.msra.mxu0 %v6395_v42  ;;  %v330_v33 = vrot.slane %v328_v17, 5  ;;  %v336_v34 = vrot.slane %v334_v18, 5  ;;  %v5207_v38 = vcombine.low %v313_v15, %v323_v31  ;;  %v505_v41 = vsel %vm6715_vm2, %v500_v23, %v504_v7  ;;  %v6857_v18 = vld [vmem:[%s6684_s9 + $0x90] sm:$0xf]  ;;  %v6863_v31 = vld [vmem:[%s6684_s9 + $0x94] sm:$0xf] }
  0x37   : > { %5931 = vmatprep.subr.bf16.mxu1 %v6396_v52  ;;  %5979 = vmatprep.subr.bf16.mxu0 %v6397_v59  ;;  %v510_v42 = vrot.slane %v509_v24, 4  ;;  %v344_v43 = vshll.u32 %v6801_v8, 16  ;;  %v340_v45 = vrot.slane %v338_v35, 4  ;;  %v517_v46 = vshrl.u32 %v6805_v13, 16 }
  0x38   : > { %v331_v44 = vor.u32 %v330_v33, %v327_v29  ;;  %v520_v47 = vshll.u32 %v6805_v13, 16  ;;  %v526_v50 = vshll.u32 %v6812_v22, 16  ;;  %v530_v51 = vshrl.u32 %v6812_v22, 16  ;;  %5901 = vmatprep.mubr.bf16.mxu0 %v5207_v38  ;;  %v6403_v38 = vld [vmem:[%s9307_s1 + $0x98] sm:$0xff]  }
  0x39   : > { %v515_v48 = vsel %vm6715_vm2, %v510_v42, %v514_v28  ;;  %v346_v49 = vrot.slane %v344_v43, 5  ;;  %v341_v56 = vor.u32 %v340_v45, %v336_v34  ;;  %v519_v58 = vrot.slane %v517_v46, 4  ;;  %v6404_v46 = vld [vmem:[%s9307_s1 + $0x10] sm:$0xff]  }
  0x3a   : > { %5932 = vmatpush3.bf16.msra.mxu1 %v6396_v52  ;;  %5980 = vmatpush3.bf16.msra.mxu0 %v6397_v59  ;;  %v5215_v54 = vcombine.low %v505_v41, %v515_v48  ;;  %v332_v55 = vrot.slane %v331_v44, 4  ;;  %v6400_v52 = vld [vmem:[%s9307_s1 + $0x20] sm:$0xff]   ;;  %v522_v61 = vrot.slane %v520_v47, 5  ;;  %v528_v63 = vrot.slane %v526_v50, 5  ;;  %v6873_v44 = vld [vmem:[%s6684_s9 + $0x98] sm:$0x1] }
  0x3b   : > { %5933 = vmatprep.subr.bf16.mxu1 %v6398_v30  ;;  %v6401_v59 = vld [vmem:[%s9307_s1 + $0xa0] sm:$0xff]   ;;  %v532_v1 = vrot.slane %v530_v51, 4  ;;  %v536_v2 = vshll.u32 %v6821_v36, 16  ;;  %5981 = vmatprep.subr.bf16.mxu0 %v6399_v37  ;;  %v342_v7 = vrot.slane %v341_v56, 4  ;;  %v349_v9 = vshrl.u32 %v6836_v53, 16 }
  0x3c   : > { %5917 = vmatprep.mubr.bf16.mxu1 %v5215_v54  ;;  %v337_v3 = vsel %vm6715_vm2, %v332_v55, %v336_v34  ;;  %v352_v10 = vshll.u32 %v6836_v53, 16  ;;  %v523_v11 = vor.u32 %v522_v61, %v519_v58  ;;  %v358_v17 = vshll.u32 %v6845_v60, 16  ;;  %v6886_v51 = vld [vmem:[%s6684_s9 + $0x3c] sm:$0xf]  ;;  %v6889_v54 = vld [vmem:[%s6684_s9 + $0x40] sm:$0xf] }
  0x3d   : > { %v533_v12 = vor.u32 %v532_v1, %v528_v63  ;;  %v538_v15 = vrot.slane %v536_v2, 5  ;;  %v347_v23 = vsel %vm6715_vm2, %v342_v7, %v346_v49  ;;  %v351_v24 = vrot.slane %v349_v9, 4  ;;  %v6405_v55 = vld [vmem:[%s9307_s1 + $0x90] sm:$0xff]   ;;  %v6896_v7 = vld [vmem:[%s6684_s9 + $0x44] sm:$0x1] }
  0x3e   : > { %5934 = vmatpush3.bf16.msra.mxu1 %v6398_v30  ;;  %5982 = vmatpush3.bf16.msra.mxu0 %v6399_v37  ;;  %v354_v28 = vrot.slane %v352_v10, 5  ;;  %v362_v29 = vshrl.u32 %v6845_v60, 16  ;;  %v6402_v30 = vld [vmem:[%s9307_s1 + $0x18] sm:$0xff]   ;;  %v5208_v33 = vcombine.low %v337_v3, %v347_v23  ;;  %v524_v34 = vrot.slane %v523_v11, 4 }
  0x3f   : > { %5935 = vmatprep.subr.bf16.mxu1 %v6400_v52  ;;  %5983 = vmatprep.subr.bf16.mxu0 %v6401_v59  ;;  %v534_v35 = vrot.slane %v533_v12, 4  ;;  %v360_v37 = vrot.slane %v358_v17, 5  ;;  %v368_v43 = vshll.u32 %v6853_v16, 16  ;;  %v541_v45 = vshrl.u32 %v6857_v18, 16  ;;  %v6899_v9 = vld [vmem:[%s6684_s9 + $0x9c] sm:$0xf] }
  0x40   : > { %v355_v41 = vor.u32 %v354_v28, %v351_v24  ;;  %v364_v42 = vrot.slane %v362_v29, 4  ;;  %5902 = vmatmul.mubr.bf16.gmra.mxu0 %v5208_v33  ;;  %v529_v47 = vsel %vm6715_vm2, %v524_v34, %v528_v63  ;;  %v544_v49 = vshll.u32 %v6857_v18, 16  ;;  %v6908_v28 = vld [vmem:[%s6684_s9 + $0xa0] sm:$0xf]  ;;  %v6406_v29 = vld [vmem:[%s9307_s1 + $0x8] sm:$0xff]  }
  0x41   : > { %v539_v48 = vsel %vm6715_vm2, %v534_v35, %v538_v15  ;;  %v550_v50 = vshll.u32 %v6863_v31, 16  ;;  %v370_v63 = vrot.slane %v368_v43, 5  ;;  %v554_v3 = vshrl.u32 %v6863_v31, 16 }
  0x42   : > { %5936 = vmatpush3.bf16.msra.mxu1 %v6400_v52  ;;  %v5216_v56 = vcombine.low %v529_v47, %v539_v48  ;;  %5984 = vmatpush3.bf16.msra.mxu0 %v6401_v59  ;;  %v356_v58 = vrot.slane %v355_v41, 4  ;;  %v365_v61 = vor.u32 %v364_v42, %v360_v37  ;;  %v543_v52 = vrot.slane %v541_v45, 4  ;;  %v6407_v41 = vld [vmem:[%s9307_s1 + $0x88] sm:$0xff]  }
  0x43   : > { %5937 = vmatprep.subr.bf16.mxu1 %v6402_v30  ;;  %v546_v1 = vrot.slane %v544_v49, 5  ;;  %v552_v2 = vrot.slane %v550_v50, 5  ;;  %5985 = vmatprep.subr.bf16.mxu0 %v6403_v38  ;;  %v560_v11 = vshll.u32 %v6873_v44, 16  ;;  %v373_v12 = vshrl.u32 %v6886_v51, 16 }
  0x44   : > { %5918 = vmatmul.mubr.bf16.gmra.mxu1 %v5216_v56  ;;  %v361_v10 = vsel %vm6715_vm2, %v356_v58, %v360_v37  ;;  %v366_v59 = vrot.slane %v365_v61, 4  ;;  %v556_v17 = vrot.slane %v554_v3, 4  ;;  %v376_v23 = vshll.u32 %v6886_v51, 16  ;;  %v6924_v61 = vld [vmem:[%s6684_s9 + $0xa4] sm:$0x1] }
  0x45   : > { %v547_v15 = vor.u32 %v546_v1, %v543_v52  ;;  %v382_v24 = vshll.u32 %v6889_v54, 16  ;;  %v562_v34 = vrot.slane %v560_v11, 5  ;;  %v375_v35 = vrot.slane %v373_v12, 4 }
  0x46   : > { %5938 = vmatpush3.bf16.msra.mxu1 %v6402_v30  ;;  %v371_v33 = vsel %vm6715_vm2, %v366_v59, %v370_v63  ;;  %v386_v37 = vshrl.u32 %v6889_v54, 16  ;;  %5986 = vmatpush3.bf16.msra.mxu0 %v6403_v38  ;;  %v557_v43 = vor.u32 %v556_v17, %v552_v2  ;;  %v378_v45 = vrot.slane %v376_v23, 5  ;;  %v6929_v59 = vld [vmem:[%s6684_s9 + $0x48] sm:$0xf]  ;;  %v6938_v17 = vld [vmem:[%s6684_s9 + $0x4c] sm:$0xf] }
  0x47   : > { %5939 = vmatprep.subr.bf16.mxu1 %v6404_v46  ;;  %v5209_v42 = vcombine.low %v361_v10, %v371_v33  ;;  %v548_v30 = vrot.slane %v547_v15, 4  ;;  %5987 = vmatprep.subr.bf16.mxu0 %v6405_v55  ;;  %v384_v47 = vrot.slane %v382_v24, 5  ;;  %v392_v49 = vshll.u32 %v6896_v7, 16 }
  0x48   : > { %v388_v48 = vrot.slane %v386_v37, 4  ;;  %v565_v50 = vshrl.u32 %v6899_v9, 16  ;;  %v558_v56 = vrot.slane %v557_v43, 4  ;;  %v379_v58 = vor.u32 %v378_v45, %v375_v35 }
  0x49   : > { %5905 = vmatprep.mubr.bf16.mxu0 %v5209_v42  ;;  %v553_v38 = vsel %vm6715_vm2, %v548_v30, %v552_v2  ;;  %v568_v63 = vshll.u32 %v6899_v9, 16  ;;  %v394_v1 = vrot.slane %v392_v49, 5  ;;  %v574_v10 = vshll.u32 %v6908_v28, 16  ;;  %v6408_v2 = vld [vmem:[%s9307_s1] sm:$0xff]   ;;  %v6947_v30 = vld [vmem:[%s6684_s9 + $0x50] sm:$0x1] }
  0x4a   : > { %5940 = vmatpush3.bf16.msra.mxu1 %v6404_v46  ;;  %v389_v52 = vor.u32 %v388_v48, %v384_v47  ;;  %v567_v3 = vrot.slane %v565_v50, 4  ;;  %5988 = vmatpush3.bf16.msra.mxu0 %v6405_v55  ;;  %v563_v11 = vsel %vm6715_vm2, %v558_v56, %v562_v34  ;;  %v380_v12 = vrot.slane %v379_v58, 4  ;;  %v6409_v55 = vld [vmem:[%s9307_s1 + $0x80] sm:$0xff]  }
  0x4b   : > { %5941 = vmatprep.subr.bf16.mxu1 %v6406_v29  ;;  %v570_v15 = vrot.slane %v568_v63, 5  ;;  %v578_v46 = vshrl.u32 %v6908_v28, 16  ;;  %5989 = vmatprep.subr.bf16.mxu0 %v6407_v41  ;;  %v5217_v23 = vcombine.low %v553_v38, %v563_v11  ;;  %v576_v33 = vrot.slane %v574_v10, 5  ;;  %v6955_v38 = vld [vmem:[%s6684_s9 + $0xa8] sm:$0xf] }
  0x4c   : > { %v390_v24 = vrot.slane %v389_v52, 4  ;;  %v584_v35 = vshll.u32 %v6924_v61, 16  ;;  %v385_v34 = vsel %vm6715_vm2, %v380_v12, %v384_v47  ;;  %v397_v43 = vshrl.u32 %v6929_v59, 16  ;;  %9338 = vst [vmem:[#allocation6_spill] sm:$0xff] %v6955_v38  ;;  %v6960_v47 = vld [vmem:[%s9307_s1 + $0xf8] sm:$0xff]  }
  0x4d   : > { %v571_v37 = vor.u32 %v570_v15, %v567_v3  ;;  %v580_v42 = vrot.slane %v578_v46, 4  ;;  %5921 = vmatprep.mubr.bf16.mxu1 %v5217_v23  ;;  %v400_v49 = vshll.u32 %v6929_v59, 16  ;;  %v406_v50 = vshll.u32 %v6938_v17, 16  ;;  %v6963_v52 = vld [vmem:[%s6684_s9 + $0xac] sm:$0xf] }
  0x4e   : > { %5942 = vmatpush3.bf16.msra.mxu1 %v6406_v29  ;;  %v395_v45 = vsel %vm6715_vm2, %v390_v24, %v394_v1  ;;  %v586_v48 = vrot.slane %v584_v35, 5  ;;  %5990 = vmatpush3.bf16.msra.mxu0 %v6407_v41  ;;  %v399_v63 = vrot.slane %v397_v43, 4  ;;  %v6968_v1 = vld [vmem:[%s9307_s1 + $0x138] sm:$0xff]   ;;  %v410_v10 = vshrl.u32 %v6938_v17, 16  ;;  %v6973_v12 = vld [vmem:[%s6684_s9 + $0xb0] sm:$0x1] }
  0x4f   : > { %v5210_v29 = vcombine.low %v385_v34, %v395_v45  ;;  %v572_v56 = vrot.slane %v571_v37, 4  ;;  %v581_v58 = vor.u32 %v580_v42, %v576_v33  ;;  %5943 = vmatprep.subr.bf16.mxu1 %v6408_v2  ;;  %5991 = vmatprep.subr.bf16.mxu0 %v6409_v55  ;;  %v402_v41 = vrot.slane %v400_v49, 5  ;;  %9339 = vst [vmem:[#allocation7_spill] sm:$0xff] %v6973_v12  ;;  %v6976_v15 = vld [vmem:[%s6684_s9 + $0x54] sm:$0xf] }
  0x50   : > { %v408_v3 = vrot.slane %v406_v50, 5  ;;  %v416_v11 = vshll.u32 %v6947_v30, 16  ;;  %v589_v24 = vshrl.u32 %v6955_v38, 16  ;;  %v592_v35 = vshll.u32 %v6955_v38, 16  ;;  %v6983_v34 = vld [vmem:[%s6684_s9 + $0x58] sm:$0xf] }
  0x51   : > { %5906 = vmatmul.mubr.bf16.gmra.mxu0 %v5210_v29  ;;  %v577_v46 = vsel %vm6715_vm2, %v572_v56, %v576_v33  ;;  %v582_v23 = vrot.slane %v581_v58, 4  ;;  %v403_v37 = vor.u32 %v402_v41, %v399_v63  ;;  %v412_v42 = vrot.slane %v410_v10, 4 }
  0x52   : > { %5944 = vmatpush3.bf16.msra.mxu1 %v6408_v2  ;;  %v418_v43 = vrot.slane %v416_v11, 5  ;;  %v598_v45 = vshll.u32 %v6963_v52, 16  ;;  %5992 = vmatpush3.bf16.msra.mxu0 %v6409_v55  ;;  %v591_v49 = vrot.slane %v589_v24, 4  ;;  %v594_v50 = vrot.slane %v592_v35, 5  ;;  %v6992_v55 = vld [vmem:[%s6684_s9 + $0x5c] sm:$0x1] }
  0x53   : > { %6025 = vmatprep.subr.bf16.mxu1 %v6960_v47  ;;  %v587_v33 = vsel %vm6715_vm2, %v582_v23, %v586_v48  ;;  %v602_v29 = vshrl.u32 %v6963_v52, 16  ;;  %6073 = vmatprep.subr.bf16.mxu0 %v6968_v1  ;;  %v404_v56 = vrot.slane %v403_v37, 4  ;;  %v413_v58 = vor.u32 %v412_v42, %v408_v3  ;;  %v6997_v48 = vld [vmem:[%s6684_s9 + $0xb4] sm:$0xf]  ;;  %v7004_v37 = vld [vmem:[%s6684_s9 + $0xb8] sm:$0xf] }
  0x54   : > { %v5218_v2 = vcombine.low %v577_v46, %v587_v33  ;;  %v600_v63 = vrot.slane %v598_v45, 5  ;;  %v595_v41 = vor.u32 %v594_v50, %v591_v49  ;;  %v608_v11 = vshll.u32 %v6973_v12, 16  ;;  %9340 = vst [vmem:[#allocation8_spill] sm:$0xff] %v6997_v48  ;;  %9341 = vst [vmem:[#allocation9_spill] sm:$0xff] %v7004_v37 }
  0x55   : > { %v604_v10 = vrot.slane %v602_v29, 4  ;;  %v421_v21 = vshrl.u32 %v6976_v15, 16  ;;  %v409_v23 = vsel %vm6715_vm2, %v404_v56, %v408_v3  ;;  %v414_v24 = vrot.slane %v413_v58, 4  ;;  %v7010_v3 = vld [vmem:[%s6684_s9 + $0xbc] sm:$0x1] }
  0x56   : > { %5922 = vmatmul.mubr.bf16.gmra.mxu1 %v5218_v2  ;;  %v424_v46 = vshll.u32 %v6976_v15, 16  ;;  %v430_v35 = vshll.u32 %v6983_v34, 16  ;;  %v596_v42 = vrot.slane %v595_v41, 4  ;;  %v610_v33 = vrot.slane %v608_v11, 5  ;;  %9342 = vst [vmem:[#allocation10_spill] sm:$0xff] %v7010_v3 }
  0x57   : > { %v605_v45 = vor.u32 %v604_v10, %v600_v63  ;;  %v423_v49 = vrot.slane %v421_v21, 4  ;;  %v419_v50 = vsel %vm6715_vm2, %v414_v24, %v418_v43  ;;  %v434_v62 = vshrl.u32 %v6983_v34, 16  ;;  %v1230_v10 = vld [vmem:[%s6684_s9] sm:$0xe] }
  0x58   : > { %v426_v29 = vrot.slane %v424_v46, 5  ;;  %v432_v2 = vrot.slane %v430_v35, 5  ;;  %v5211_v56 = vcombine.low %v409_v23, %v419_v50  ;;  %v601_v58 = vsel %vm6715_vm2, %v596_v42, %v600_v63 }
  0x59   : > { %v606_v20 = vrot.slane %v605_v45, 4  ;;  %v440_v41 = vshll.u32 %v6992_v55, 16  ;;  %v436_v21 = vrot.slane %v434_v62, 4  ;;  %v613_v12 = vshrl.u32 %v6997_v48, 16 }
  0x5a   : > { %v427_v11 = vor.u32 %v426_v29, %v423_v49  ;;  %v616_v43 = vshll.u32 %v6997_v48, 16  ;;  %5909 = vmatprep.mubr.bf16.mxu0 %v5211_v56  ;;  %v622_v46 = vshll.u32 %v7004_v37, 16  ;;  %v626_v63 = vshrl.u32 %v7004_v37, 16  ;;  %v1231_v49 = vld [vmem:[%s6684_s9 + $0xc] sm:$0xe] }
  0x5b   : > { %v611_v24 = vsel %vm6715_vm2, %v606_v20, %v610_v33  ;;  %v442_v23 = vrot.slane %v440_v41, 5  ;;  %v437_v45 = vor.u32 %v436_v21, %v432_v2  ;;  %v615_v50 = vrot.slane %v613_v12, 4  ;;  %v1232_v20 = vld [vmem:[%s6684_s9 + $0x18] sm:$0xe] }
  0x5c   : > { %v5219_v35 = vcombine.low %v601_v58, %v611_v24  ;;  %v428_v42 = vrot.slane %v427_v11, 4  ;;  %v618_v62 = vrot.slane %v616_v43, 5  ;;  %v624_v29 = vrot.slane %v622_v46, 5 }
  0x5d   : > { %v628_v38 = vrot.slane %v626_v63, 4  ;;  %v632_v48 = vshll.u32 %v7010_v3, 16  ;;  %v438_v58 = vrot.slane %v437_v45, 4  ;;  %v5253_v41 = vrot.slane %v1230_v10, 9 }
  0x5e   : > { %5925 = vmatprep.mubr.bf16.mxu1 %v5219_v35  ;;  %v433_v33 = vsel %vm6715_vm2, %v428_v42, %v432_v2  ;;  %v1283_v12 = vrot.slane %v6693_v5, 5  ;;  %v619_v11 = vor.u32 %v618_v62, %v615_v50  ;;  %v5254_v24 = vrot.slane %v1231_v49, 9 }
  0x5f   : > { %v629_v21 = vor.u32 %v628_v38, %v624_v29  ;;  %v634_v43 = vrot.slane %v632_v48, 5  ;;  %v443_v46 = vsel %vm6715_vm2, %v438_v58, %v442_v23  ;;  %v1290_v35 = vrot.slane %v6720_v32, 5 }
  0x60   : > { %v1284_v63 = vsel %vm7026_vm5, %v5253_v41, %v1283_v12  ;;  %v1285_v3 = vrot.slane %v1283_v12, 4  ;;  %v5212_v37 = vcombine.low %v433_v33, %v443_v46  ;;  %v620_v2 = vrot.slane %v619_v11, 4  ;;  %v1234_v12 = vld [vmem:[%s6684_s9 + $0x30] sm:$0xe]  ;;  %v1236_v46 = vld [vmem:[%s6684_s9 + $0x48] sm:$0xe] }
  0x61   : > { %v630_v42 = vrot.slane %v629_v21, 4  ;;  %v5229_v10 = vcombine.low %v6690_v4, %v6693_v5  ;;  %v9345_v38 = vrot.slane %v6696_v6, 5  ;;  %v1292_v45 = vrot.slane %v1290_v35, 4 }
  0x62   : > { %v5255_v23 = vrot.slane %v1232_v20, 9  ;;  %5910 = vmatmul.mubr.bf16.gmra.mxu0 %v5212_v37  ;;  %v625_v50 = vsel %vm6715_vm2, %v620_v2, %v624_v29  ;;  %v1297_v33 = vrot.slane %v6757_v19, 5  ;;  %v1291_v4 = vsel %vm7026_vm5, %v5254_v24, %v1290_v35  ;;  %v1235_v24 = vld [vmem:[%s6684_s9 + $0x3c] sm:$0xe] }
  0x63   : > { %v1287_v48 = vsel %vm7026_vm5, %v1285_v3, %v9345_v38  ;;  %v635_v49 = vsel %vm6715_vm2, %v630_v42, %v634_v43  ;;  %v9346_v5 = vrot.slane %v6726_v40, 5  ;;  %v1300_v37 = vrot.slane %v6762_v25, 5  ;;  %v1233_v3 = vld [vmem:[%s6684_s9 + $0x24] sm:$0xe]  ;;  %v6417_v25 = vld [vmem:[%s9307_s1 + $0x130] sm:$0xff]  }
  0x64   : > { %v5269_v62 = vcombine.low %v1284_v63, %v1287_v48  ;;  %v5220_v58 = vcombine.low %v625_v50, %v635_v49  ;;  %v1298_v29 = vsel %vm7026_vm5, %v5255_v23, %v1297_v33  ;;  %v1299_v20 = vrot.slane %v1297_v33, 4  ;;  %v6416_v23 = vld [vmem:[%s9307_s1 + $0xf0] sm:$0xff]  }
  0x65   : > { %v1294_v6 = vsel %vm7026_vm5, %v1292_v45, %v9346_v5  ;;  %v1304_v41 = vrot.slane %v6798_v0, 5  ;;  %v5256_v21 = vrot.slane %v1233_v3, 9  ;;  %v1311_v43 = vrot.slane %v6845_v60, 5  ;;  %v7101_v3 = vld [vmem:[%s6684_s9 + $0x68] sm:$0x1] }
  0x66   : > { %5993 = vmatprep.mubr.bf16.mxu0 %v5269_v62  ;;  %5926 = vmatmul.mubr.bf16.gmra.mxu1 %v5220_v58  ;;  %v5270_v11 = vcombine.low %v1291_v4, %v1294_v6  ;;  %v1301_v40 = vsel %vm7026_vm5, %v1299_v20, %v1300_v37  ;;  %v1307_v2 = vrot.slane %v6801_v8, 5  ;;  %v5257_v42 = vrot.slane %v1234_v12, 9  ;;  %v1237_v37 = vld [vmem:[%s6684_s9 + $0x54] sm:$0xe]  ;;  %v7125_v12 = vld [vmem:[%s6684_s9 + $0x60] sm:$0xe] }
  0x67   : > { %5945 = vmatprep.mubr.bf16.mxu1 %v5229_v10  ;;  %v5271_v63 = vcombine.low %v1298_v29, %v1301_v40  ;;  %v1306_v35 = vrot.slane %v1304_v41, 4  ;;  %v1313_v38 = vrot.slane %v1311_v43, 4  ;;  %v1314_v10 = vrot.slane %v6853_v16, 5 }
  0x68   : > { %v1318_v48 = vrot.slane %v6889_v54, 5  ;;  %v5231_v45 = vcombine.low %v6749_v14, %v6757_v19  ;;  %v1325_v50 = vrot.slane %v6938_v17, 5  ;;  %v5258_v49 = vrot.slane %v1235_v24, 9  ;;  %v6425_v24 = vld [vmem:[%s9307_s1 + $0x120] sm:$0xff]  }
  0x69   : > { %v1321_v8 = vrot.slane %v6896_v7, 5  ;;  %v5259_v33 = vrot.slane %v1236_v46, 9  ;;  %v1305_v14 = vsel %vm7026_vm5, %v5256_v21, %v1304_v41  ;;  %v1308_v19 = vsel %vm7026_vm5, %v1306_v35, %v1307_v2  ;;  %v7137_v46 = vld [vmem:[%s6684_s9 + $0x78] sm:$0xe]  ;;  %v6424_v2 = vld [vmem:[%s9307_s1 + $0xe0] sm:$0xff]  }
  0x6a   : > { %5994 = vmatmul.mubr.bf16.vlgmr.msra.gmra.mxu0 %v5270_v11  ;;  %v1320_v62 = vrot.slane %v1318_v48, 4  ;;  %v1327_v16 = vrot.slane %v1325_v50, 4  ;;  %v1328_v58 = vrot.slane %v6947_v30, 5  ;;  %v1312_v4 = vsel %vm7026_vm5, %v5257_v42, %v1311_v43  ;;  %v7128_v11 = vld [vmem:[%s6684_s9 + $0x6c] sm:$0xe] }
  0x6b   : > { %6074 = vmatpush3.bf16.msra.mxu0 %v6968_v1  ;;  %5997 = vmatprep.mubr.bf16.mxu0 %v5271_v63  ;;  %v1315_v7 = vsel %vm7026_vm5, %v1313_v38, %v1314_v10  ;;  %v6421_v1 = vld [vmem:[%s9307_s1 + $0x128] sm:$0xff]   ;;  %v1332_v5 = vrot.slane %v6983_v34, 5  ;;  %v9347_v6 = vcombine.low %v6711_v26, %v6720_v32  ;;  %v5232_v30 = vcombine.low %v6789_v57, %v6798_v0  ;;  %v1241_v63 = vld [vmem:[%s6684_s9 + $0x84] sm:$0xe]  ;;  %v1242_v42 = vld [vmem:[%s6684_s9 + $0x90] sm:$0xe] }
  0x6c   : > { %6075 = vmatprep.subr.bf16.mxu0 %v6417_v25  ;;  %v1342_v29 = vrot.slane %v7101_v3, 5  ;;  %v5272_v20 = vcombine.low %v1305_v14, %v1308_v19  ;;  %v7107_v41 = vsel %vm7026_vm5, %v5258_v49, %v1318_v48  ;;  %v7111_v26 = vsel %vm7026_vm5, %v1320_v62, %v1321_v8  ;;  %v6420_v32 = vld [vmem:[%s9307_s1 + $0xe8] sm:$0xff]   ;;  %v7156_v48 = vld [vmem:[%s6684_s9 + $0x64] sm:$0xf]  ;;  %v1243_v49 = vld [vmem:[%s6684_s9 + $0x9c] sm:$0xe] }
  0x6d   : > { %v5273_v57 = vcombine.low %v1312_v4, %v1315_v7  ;;  %v7118_v0 = vsel %vm7026_vm5, %v5259_v33, %v1325_v50  ;;  %v5233_v40 = vcombine.low %v6836_v53, %v6845_v60  ;;  %v5260_v21 = vrot.slane %v1237_v37, 9  ;;  %v7178_v4 = vld [vmem:[%s6684_s9 + $0x74] sm:$0x1] }
  0x6e   : > { %5946 = vmatmul.mubr.bf16.vlgmr.msra.gmra.mxu1 %v9347_v6  ;;  %v1335_v43 = vrot.slane %v6992_v55, 5  ;;  %v5234_v35 = vcombine.low %v6886_v51, %v6889_v54  ;;  %v5274_v53 = vcombine.low %v7107_v41, %v7111_v26  ;;  %v5235_v60 = vcombine.low %v6929_v59, %v6938_v17  ;;  %v6510_v54 = vld [vmem:[%s6684_s9 + $0x80] sm:$0x1] }
  0x6f   : > { %6026 = vmatpush3.bf16.msra.mxu1 %v6960_v47  ;;  %5949 = vmatprep.mubr.bf16.mxu1 %v5231_v45  ;;  %v7122_v47 = vsel %vm7026_vm5, %v1327_v16, %v1328_v58  ;;  %v5236_v55 = vcombine.low %v6976_v15, %v6983_v34  ;;  %v5261_v10 = vrot.slane %v7125_v12, 9  ;;  %v1339_v45 = vrot.slane %v7156_v48, 5  ;;  %v7174_v16 = vld [vmem:[%s6684_s9 + $0x70] sm:$0xf]  ;;  %v6511_v17 = vld [vmem:[%s6684_s9 + $0x60] sm:$0xf] }
  0x70   : > { %6027 = vmatprep.subr.bf16.mxu1 %v6416_v23  ;;  %6076 = vmatpush3.bf16.msra.mxu0 %v6417_v25  ;;  %v1334_v25 = vrot.slane %v1332_v5, 4  ;;  %v5275_v38 = vcombine.low %v7118_v0, %v7122_v47  ;;  %v5262_v62 = vrot.slane %v7128_v11, 9  ;;  %v1360_v8 = vrot.slane %v6812_v22, 5  ;;  %v1244_v0 = vld [vmem:[%s6684_s9 + $0xa8] sm:$0xe]  ;;  %v7358_v15 = vld [vmem:[%s9307_s1 + $0x1b8] sm:$0xff]  }
  0x71   : > { %6077 = vmatprep.subr.bf16.mxu0 %v6421_v1  ;;  %v1363_v33 = vrot.slane %v6821_v36, 5  ;;  %v7167_v14 = vsel %vm7026_vm5, %v5260_v21, %v1332_v5  ;;  %v1346_v58 = vrot.slane %v7174_v16, 5  ;;  %v1349_v7 = vrot.slane %v7178_v4, 5  ;;  %v6428_v36 = vld [vmem:[%s9307_s1 + $0xd8] sm:$0xff]  }
  0x72   : > { %5998 = vmatmul.mubr.bf16.gmra.mxu0 %v5272_v20  ;;  %v7171_v19 = vsel %vm7026_vm5, %v1334_v25, %v1335_v43  ;;  %v5263_v5 = vrot.slane %v7137_v46, 9  ;;  %v1362_v37 = vrot.slane %v1360_v8, 4  ;;  %v5265_v41 = vrot.slane %v1242_v42, 9  ;;  %v5349_v42 = vld [vmem:[%s6684_s9 + $0xc] sm:$0xf] }
  0x73   : > { %6028 = vmatpush3.bf16.msra.mxu1 %v6416_v23  ;;  %6001 = vmatprep.mubr.bf16.mxu0 %v5273_v57  ;;  %v5264_v23 = vrot.slane %v1241_v63, 9  ;;  %v1367_v26 = vrot.slane %v6863_v31, 5  ;;  %v1370_v57 = vrot.slane %v6873_v44, 5  ;;  %v1353_v47 = vrot.slane %v6771_v39, 5 }
  0x74   : > { %6029 = vmatprep.subr.bf16.mxu1 %v6420_v32  ;;  %6078 = vmatpush3.bf16.msra.mxu0 %v6421_v1  ;;  %v6429_v1 = vld [vmem:[%s9307_s1 + $0x118] sm:$0xff]   ;;  %v7202_v21 = vsel %vm7026_vm5, %v1362_v37, %v1363_v33  ;;  %v1374_v63 = vrot.slane %v6908_v28, 5  ;;  %v5267_v33 = vrot.slane %v1244_v0, 9  ;;  %v1381_v37 = vrot.slane %v6963_v52, 5  ;;  %v6432_v0 = vld [vmem:[%s9307_s1 + $0xd0] sm:$0xff]  }
  0x75   : > { %6079 = vmatprep.subr.bf16.mxu0 %v6425_v24  ;;  %v7190_v6 = vsel %vm7026_vm5, %v5264_v23, %v1360_v8  ;;  %v7210_v44 = vsel %vm7026_vm5, %v5265_v41, %v1367_v26  ;;  %v1369_v43 = vrot.slane %v1367_v26, 4  ;;  %v6433_v23 = vld [vmem:[%s9307_s1 + $0x110] sm:$0xff]   ;;  %v1377_v8 = vrot.slane %v6924_v61, 5 }
  0x76   : > { %5950 = vmatmul.mubr.bf16.gmra.mxu1 %v5232_v30  ;;  %v1341_v30 = vrot.slane %v1339_v45, 4  ;;  %v1376_v20 = vrot.slane %v1374_v63, 4  ;;  %v9349_v61 = vld [vmem:[#allocation7_spill] sm:$0xff]  ;;  %v2152_v12 = vshrl.u32 %v5349_v42, 16  ;;  %v1348_v51 = vrot.slane %v1346_v58, 4 }
  0x77   : > { %5953 = vmatprep.mubr.bf16.mxu1 %v5233_v40  ;;  %6030 = vmatpush3.bf16.msra.mxu1 %v6420_v32  ;;  %v5266_v40 = vrot.slane %v1243_v49, 9  ;;  %v7222_v32 = vld [vmem:[%s6684_s9 + $0x10] sm:$0xf]  ;;  %v7226_v41 = vsel %vm7026_vm5, %v1369_v43, %v1370_v57  ;;  %v1384_v50 = vrot.slane %v9349_v61, 5  ;;  %v1383_v57 = vrot.slane %v1381_v37, 4 }
  0x78   : > { %6031 = vmatprep.subr.bf16.mxu1 %v6424_v2  ;;  %6080 = vmatpush3.bf16.msra.mxu0 %v6425_v24  ;;  %v9348_v24 = vld [vmem:[#allocation6_spill] sm:$0xff]  ;;  %v9351_v43 = vld [vmem:[#allocation8_spill] sm:$0xff]  ;;  %v1340_v61 = vsel %vm7026_vm5, %v5261_v10, %v1339_v45  ;;  %v2155_v10 = vshll.u32 %v5349_v42, 16  ;;  %v2161_v59 = vshll.u32 %v7222_v32, 16  ;;  %v1350_v11 = vsel %vm7026_vm5, %v1348_v51, %v1349_v7 }
  0x79   : > { %6081 = vmatprep.subr.bf16.mxu0 %v6429_v1  ;;  %v7230_v26 = vsel %vm7026_vm5, %v5266_v40, %v1374_v63  ;;  %v9350_v40 = vld [vmem:[#allocation9_spill] sm:$0xff]  ;;  %v7296_v42 = vld [vmem:[%s6684_s9 + $0x14] sm:$0x1]  ;;  %v2154_v63 = vrot.slane %v2152_v12, 4  ;;  %v1354_v4 = vsel %vm7026_vm5, %v5263_v5, %v1353_v47  ;;  %v9353_v5 = vld [vmem:[#allocation10_spill] sm:$0xff] }
  0x7a   : > { %6002 = vmatmul.mubr.bf16.gmra.mxu0 %v5274_v53  ;;  %v5352_v45 = vld [vmem:[%s6684_s9 + $0x18] sm:$0xf]  ;;  %v2157_v49 = vrot.slane %v2155_v10, 5  ;;  %v5355_v53 = vld [vmem:[%s6684_s9 + $0x24] sm:$0xf] }
  0x7b   : > { %6032 = vmatpush3.bf16.msra.mxu1 %v6424_v2  ;;  %6005 = vmatprep.mubr.bf16.mxu0 %v5275_v38  ;;  %v7240_v2 = vsel %vm7026_vm5, %v5267_v33, %v1381_v37  ;;  %v5276_v38 = vcombine.low %v7167_v14, %v7171_v19  ;;  %v1343_v33 = vsel %vm7026_vm5, %v1341_v30, %v1342_v29  ;;  %v6437_v14 = vld [vmem:[%s9307_s1 + $0x108] sm:$0xff]   ;;  %v6441_v30 = vld [vmem:[%s9307_s1 + $0x100] sm:$0xff]   ;;  %v7315_v19 = vrot.slane %v2161_v59, 5 }
  0x7c   : > { %6033 = vmatprep.subr.bf16.mxu1 %v6428_v36  ;;  %6082 = vmatpush3.bf16.msra.mxu0 %v6429_v1  ;;  %v7258_v37 = vsel %vm7026_vm5, %v1376_v20, %v1377_v8  ;;  %v7270_v29 = vsel %vm7026_vm5, %v1383_v57, %v1384_v50  ;;  %v6436_v50 = vld [vmem:[%s9307_s1 + $0xc8] sm:$0xff]   ;;  %v7285_v1 = vld [vmem:[%s6684_s9 + $0xb4] sm:$0xe]  ;;  %v5277_v20 = vcombine.low %v1340_v61, %v1343_v33  ;;  %v2165_v8 = vshrl.u32 %v7222_v32, 16  ;;  %v7313_v61 = vld [vmem:[%s6684_s9 + $0x1c] sm:$0xf] }
  0x7d   : > { %6083 = vmatprep.subr.bf16.mxu0 %v6433_v23  ;;  %v7300_v57 = vld [vmem:[%s6684_s9 + $0x6c] sm:$0xf]  ;;  %v2176_v33 = vshrl.u32 %v5352_v45, 16  ;;  %v2185_v51 = vshll.u32 %v7313_v61, 16  ;;  %v2189_v39 = vshrl.u32 %v7313_v61, 16  ;;  %v2200_v59 = vshrl.u32 %v5355_v53, 16 }
  0x7e   : > { %5954 = vmatmul.mubr.bf16.gmra.mxu1 %v5234_v35  ;;  %v1356_v35 = vrot.slane %v6510_v54, 5  ;;  %v5238_v54 = vcombine.low %v7300_v57, %v7174_v16  ;;  %v2167_v3 = vrot.slane %v2165_v8, 4  ;;  %v2203_v46 = vshll.u32 %v5355_v53, 16  ;;  %v6514_v8 = vld [vmem:[%s6684_s9 + $0x7c] sm:$0xf] }
  0x7f   : > { %5957 = vmatprep.mubr.bf16.mxu1 %v5235_v60  ;;  %6034 = vmatpush3.bf16.msra.mxu1 %v6428_v36  ;;  %v5237_v60 = vcombine.low %v6511_v17, %v7156_v48  ;;  %v1355_v36 = vrot.slane %v1353_v47, 4  ;;  %v7310_v48 = vsel %vm7026_vm5, %v5262_v62, %v1346_v58  ;;  %v2179_v17 = vshll.u32 %v5352_v45, 16  ;;  %v6440_v58 = vld [vmem:[%s9307_s1 + $0xc0] sm:$0xff]   ;;  %v7340_v45 = vld [vmem:[%s6684_s9 + $0x28] sm:$0xf] }
  0x80   : > { %6035 = vmatprep.subr.bf16.mxu1 %v6432_v0  ;;  %6084 = vmatpush3.bf16.msra.mxu0 %v6433_v23  ;;  %v9319_v62 = vrot.slane %v9350_v40, 5  ;;  %v7327_v23 = vld [vmem:[%s6684_s9 + $0x20] sm:$0x1]  ;;  %v2178_v12 = vrot.slane %v2176_v33, 4  ;;  %9352 = vst [vmem:[#allocation6_spill] sm:$0xff] %v7340_v45  ;;  %v5278_v34 = vcombine.low %v7310_v48, %v1350_v11  ;;  %v2209_v53 = vshll.u32 %v7340_v45, 16 }
  0x81   : > { %6085 = vmatprep.subr.bf16.mxu0 %v6437_v14  ;;  %v2181_v10 = vrot.slane %v2179_v17, 5  ;;  %v1357_v7 = vsel %vm7026_vm5, %v1355_v36, %v1356_v35  ;;  %v2158_v35 = vor.u32 %v2157_v49, %v2154_v63  ;;  %v7353_v36 = vld [vmem:[%s9307_s1 + $0x178] sm:$0xff]   ;;  %v5358_v63 = vld [vmem:[%s6684_s9 + $0x30] sm:$0xf]  ;;  %v7374_v48 = vld [vmem:[%s6684_s9 + $0x34] sm:$0xf] }
  0x82   : > { %6006 = vmatmul.mubr.bf16.gmra.mxu0 %v5276_v38  ;;  %v2171_v38 = vshll.u32 %v7296_v42, 16  ;;  %v5279_v17 = vcombine.low %v1354_v4, %v1357_v7  ;;  %9355 = vst [vmem:[#allocation9_spill] sm:$0xff] %v7374_v48  ;;  %v7376_v11 = vrot.slane %v2185_v51, 5  ;;  %v2205_v47 = vrot.slane %v2203_v46, 5  ;;  %v7395_v46 = vld [vmem:[%s6684_s9 + $0x40] sm:$0xf] }
  0x83   : > { %6036 = vmatpush3.bf16.msra.mxu1 %v6432_v0  ;;  %6009 = vmatprep.mubr.bf16.mxu0 %v5277_v20  ;;  %v2168_v20 = vor.u32 %v2167_v3, %v7315_v19  ;;  %v2182_v49 = vor.u32 %v2181_v10, %v2178_v12  ;;  %v6513_v3 = vld [vmem:[%s6684_s9 + $0x78] sm:$0xf]  ;;  %v2191_v12 = vrot.slane %v2189_v39, 4  ;;  %v2202_v10 = vrot.slane %v2200_v59, 4  ;;  %9356 = vst [vmem:[#allocation8_spill] sm:$0xff] %v7395_v46 }
  0x84   : > { %6037 = vmatprep.subr.bf16.mxu1 %v6436_v50  ;;  %6086 = vmatpush3.bf16.msra.mxu0 %v6437_v14  ;;  %v2195_v14 = vshll.u32 %v7327_v23, 16  ;;  %v5239_v33 = vcombine.low %v6513_v3, %v6514_v8  ;;  %v7367_v25 = vrot.slane %v2171_v38, 5  ;;  %v7379_v0 = vld [vmem:[%s6684_s9 + $0x38] sm:$0x1]  ;;  %v7381_v4 = vrot.slane %v2158_v35, 4 }
  0x85   : > { %6087 = vmatprep.subr.bf16.mxu0 %v6441_v30  ;;  %v7383_v7 = vrot.slane %v2168_v20, 4  ;;  %v2224_v3 = vshrl.u32 %v5358_v63, 16  ;;  %v5361_v8 = vld [vmem:[%s6684_s9 + $0x3c] sm:$0xf]  ;;  %v7391_v51 = vrot.slane %v2209_v53, 5  ;;  %v2227_v39 = vshll.u32 %v5358_v63, 16 }
  0x86   : > { %5958 = vmatmul.mubr.bf16.gmra.mxu1 %v5236_v55  ;;  %v1390_v55 = vrot.slane %v9319_v62, 4  ;;  %v7385_v38 = vrot.slane %v2195_v14, 5  ;;  %v2233_v59 = vshll.u32 %v7374_v48, 16  ;;  %v2237_v20 = vshrl.u32 %v7374_v48, 16 }
  0x87   : > { %5961 = vmatprep.mubr.bf16.mxu1 %v5237_v60  ;;  %6038 = vmatpush3.bf16.msra.mxu1 %v6436_v50  ;;  %v7370_v60 = vld [vmem:[%s6684_s9 + $0x2c] sm:$0x1]  ;;  %v2213_v50 = vshrl.u32 %v7340_v45, 16  ;;  %v2192_v14 = vor.u32 %v2191_v12, %v7376_v11  ;;  %v2226_v53 = vrot.slane %v2224_v3, 4  ;;  %v2229_v63 = vrot.slane %v2227_v39, 5 }
  0x88   : > { %6039 = vmatprep.subr.bf16.mxu1 %v6440_v58  ;;  %9354 = vst [vmem:[#allocation7_spill] sm:$0xff] %v7370_v60  ;;  %6088 = vmatpush3.bf16.msra.mxu0 %v6441_v30  ;;  %v7389_v30 = vrot.slane %v2182_v49, 4  ;;  %v2248_v49 = vshrl.u32 %v5361_v8, 16  ;;  %v2251_v62 = vshll.u32 %v5361_v8, 16  ;;  %v2239_v48 = vrot.slane %v2237_v20, 4 }
  0x89   : > { %6169 = vmatprep.subr.bf16.mxu0 %v7358_v15  ;;  %v2215_v35 = vrot.slane %v2213_v50, 4  ;;  %v7405_v50 = vrot.slane %v2233_v59, 5  ;;  %v7408_v45 = vld [vmem:[%s6684_s9 + $0x44] sm:$0x1]  ;;  %v2261_v12 = vshrl.u32 %v7395_v46, 16  ;;  %v9357_v16 = vrot.slane %v9350_v40, 5 }
  0x8a   : > { %6010 = vmatmul.mubr.bf16.gmra.mxu0 %v5278_v34  ;;  %v2219_v34 = vshll.u32 %v7370_v60, 16  ;;  %v9358_v57 = vrot.slane %v7285_v1, 9  ;;  %v7429_v39 = vld [vmem:[%s6684_s9 + $0x4c] sm:$0xf]  ;;  %v2250_v59 = vrot.slane %v2248_v49, 4  ;;  %v2253_v20 = vrot.slane %v2251_v62, 5 }
  0x8b   : > { %6040 = vmatpush3.bf16.msra.mxu1 %v6440_v58  ;;  %6013 = vmatprep.mubr.bf16.mxu0 %v5279_v17  ;;  %v2206_v58 = vor.u32 %v2205_v47, %v2202_v10  ;;  %v2243_v17 = vshll.u32 %v7379_v0, 16  ;;  %v2257_v47 = vshll.u32 %v7395_v46, 16  ;;  %v5364_v10 = vld [vmem:[%s6684_s9 + $0x48] sm:$0xf]  ;;  %v2216_v8 = vor.u32 %v2215_v35, %v7391_v51 }
  0x8c   : > { %6121 = vmatprep.subr.bf16.mxu1 %v7353_v36  ;;  %v2263_v1 = vrot.slane %v2261_v12, 4  ;;  %v7433_v46 = vrot.slane %v2192_v14, 4  ;;  %v2164_v62 = vsel %vm6715_vm2, %v7381_v4, %v7315_v19  ;;  %v2174_v35 = vsel %vm6715_vm2, %v7383_v7, %v7367_v25  ;;  %v5367_v4 = vld [vmem:[%s6684_s9 + $0x54] sm:$0xf] }
  0x8d   : > { %v7431_v60 = vrot.slane %v2257_v47, 5  ;;  %v2275_v14 = vshll.u32 %v5364_v10, 16  ;;  %v2267_v49 = vshll.u32 %v7408_v45, 16  ;;  %v2285_v19 = vshrl.u32 %v7429_v39, 16 }
  0x8e   : > { %5962 = vmatmul.mubr.bf16.gmra.mxu1 %v5238_v54  ;;  %v7419_v54 = vsel %vm7026_vm5, %v9358_v57, %v9357_v16  ;;  %v7435_v16 = vrot.slane %v2206_v58, 4  ;;  %v7437_v57 = vrot.slane %v2219_v34, 5  ;;  %v2281_v58 = vshll.u32 %v7429_v39, 16 }
  0x8f   : > { %5965 = vmatprep.mubr.bf16.mxu1 %v5239_v33  ;;  %v9359_v33 = vrot.slane %v9353_v5, 5  ;;  %v2272_v5 = vshrl.u32 %v5364_v10, 16  ;;  %v9361_v34 = vcombine.low %v7210_v44, %v7226_v41  ;;  %v7458_v47 = vrot.slane %v2216_v8, 4  ;;  %v7464_v10 = vld [vmem:[%s6684_s9 + $0x58] sm:$0xf] }
  0x90   : > { %v7460_v12 = vrot.slane %v2243_v17, 5  ;;  %v2254_v25 = vor.u32 %v2253_v20, %v2250_v59  ;;  %v2264_v7 = vor.u32 %v2263_v1, %v7431_v60  ;;  %v9362_v44 = vcombine.low %v6805_v13, %v6812_v22  ;;  %v7470_v41 = vld [vmem:[%s6684_s9 + $0x50] sm:$0x1] }
  0x91   : > { %v7425_v3 = vsel %vm7026_vm5, %v1390_v55, %v9359_v33  ;;  %v9360_v55 = vcombine.low %v7190_v6, %v7202_v21  ;;  %v2230_v6 = vor.u32 %v2229_v63, %v2226_v53  ;;  %v2240_v21 = vor.u32 %v2239_v48, %v7405_v50 }
  0x92   : > { %v2274_v48 = vrot.slane %v2272_v5, 4  ;;  %v2277_v53 = vrot.slane %v2275_v14, 5  ;;  %v7472_v63 = vrot.slane %v2281_v58, 5  ;;  %v2287_v17 = vrot.slane %v2285_v19, 4  ;;  %v5370_v5 = vld [vmem:[%s6684_s9 + $0x60] sm:$0xf] }
  0x93   : > { %6014 = vmatmul.mubr.bf16.gmra.mxu0 %v9360_v55  ;;  %v9363_v33 = vcombine.low %v6857_v18, %v6863_v31  ;;  %v2296_v8 = vshrl.u32 %v5367_v4, 16  ;;  %v2299_v59 = vshll.u32 %v5367_v4, 16  ;;  %v7477_v20 = vrot.slane %v2230_v6, 4  ;;  %v7494_v31 = vld [vmem:[%s6684_s9 + $0x64] sm:$0xf] }
  0x94   : > { %6017 = vmatprep.mubr.bf16.mxu0 %v9361_v34  ;;  %v7479_v1 = vrot.slane %v2240_v21, 4  ;;  %v7481_v13 = vrot.slane %v2267_v49, 5  ;;  %v2305_v22 = vshll.u32 %v7464_v10, 16  ;;  %v5284_v55 = vcombine.low %v7419_v54, %v7425_v3  ;;  %v7490_v34 = vld [vmem:[%s6684_s9 + $0x5c] sm:$0x1] }
  0x95   : > { %v5397_v14 = vcombine.low %v2164_v62, %v2174_v35  ;;  %v7487_v58 = vrot.slane %v2254_v25, 4  ;;  %v2309_v18 = vshrl.u32 %v7464_v10, 16  ;;  %v7496_v6 = vrot.slane %v2264_v7, 4 }
  0x96   : > { %5966 = vmatmul.mubr.bf16.gmra.mxu1 %v9362_v44  ;;  %v2291_v21 = vshll.u32 %v7470_v41, 16  ;;  %v2320_v49 = vshrl.u32 %v5370_v5, 16  ;;  %v2323_v19 = vshll.u32 %v5370_v5, 16  ;;  %v9364_v4 = vcombine.low %v7230_v26, %v7258_v37 }
  0x97   : > { %5969 = vmatprep.mubr.bf16.mxu1 %v9363_v33  ;;  %v2278_v54 = vor.u32 %v2277_v53, %v2274_v48  ;;  %v2288_v3 = vor.u32 %v2287_v17, %v7472_v63  ;;  %v2298_v62 = vrot.slane %v2296_v8, 4  ;;  %v2301_v35 = vrot.slane %v2299_v59, 5  ;;  %v7534_v8 = vld [vmem:[%s6684_s9 + $0x70] sm:$0xf] }
  0x98   : > { %v9365_v25 = vcombine.low %v7240_v2, %v7270_v29  ;;  %v7506_v7 = vrot.slane %v2305_v22, 5  ;;  %v2311_v44 = vrot.slane %v2309_v18, 4  ;;  %v2315_v33 = vshll.u32 %v7490_v34, 16 }
  0x99   : > { %v2329_v26 = vshll.u32 %v7494_v31, 16  ;;  %v2188_v37 = vsel %vm6715_vm2, %v7389_v30, %v7376_v11  ;;  %v2198_v2 = vsel %vm6715_vm2, %v7433_v46, %v7385_v38  ;;  %v2322_v29 = vrot.slane %v2320_v49, 4  ;;  %v5373_v46 = vld [vmem:[%s6684_s9 + $0x6c] sm:$0xf] }
  0x9a   : > { %v2325_v48 = vrot.slane %v2323_v19, 5  ;;  %v9366_v53 = vcombine.low %v6899_v9, %v6908_v28  ;;  %v2212_v17 = vsel %vm6715_vm2, %v7435_v16, %v7391_v51  ;;  %v2222_v11 = vsel %vm6715_vm2, %v7458_v47, %v7437_v57  ;;  %v7542_v16 = vld [vmem:[%s6684_s9 + $0x68] sm:$0x1] }
  0x9b   : > { %6018 = vmatmul.mubr.bf16.gmra.mxu0 %v9364_v4  ;;  %v7529_v30 = vrot.slane %v2291_v21, 5  ;;  %v2333_v38 = vshrl.u32 %v7494_v31, 16  ;;  %v9367_v9 = vcombine.low %v9348_v24, %v6963_v52  ;;  %v7539_v28 = vrot.slane %v2278_v54, 4  ;;  %v6442_v52 = vld [vmem:[%s6684_s9 + $0xc] sm:$0xff]  }
  0x9c   : > { %6021 = vmatprep.mubr.bf16.mxu0 %v9365_v25  ;;  %v2302_v51 = vor.u32 %v2301_v35, %v2298_v62  ;;  %v2344_v59 = vshrl.u32 %v5373_v46, 16  ;;  %v2347_v57 = vshll.u32 %v5373_v46, 16  ;;  %v7544_v47 = vrot.slane %v2288_v3, 4  ;;  %v7555_v62 = vld [vmem:[%s6684_s9 + $0x74] sm:$0x1] }
  0x9d   : > { %v2312_v22 = vor.u32 %v2311_v44, %v7506_v7  ;;  %v7547_v5 = vrot.slane %v2315_v33, 5  ;;  %v2353_v18 = vshll.u32 %v7534_v8, 16  ;;  %v2326_v24 = vor.u32 %v2325_v48, %v2322_v29  ;;  %v5376_v25 = vld [vmem:[%s6684_s9 + $0x78] sm:$0xf]  ;;  %v7559_v44 = vld [vmem:[%s6684_s9 + $0x7c] sm:$0xf] }
  0x9e   : > { %5970 = vmatmul.mubr.bf16.gmra.mxu1 %v9366_v53  ;;  %v7551_v21 = vrot.slane %v2329_v26, 5  ;;  %v2335_v49 = vrot.slane %v2333_v38, 4  ;;  %v2357_v19 = vshrl.u32 %v7534_v8, 16  ;;  %v5398_v4 = vcombine.low %v2188_v37, %v2198_v2  ;;  %v7566_v26 = vld [vmem:[%s6684_s9 + $0x80] sm:$0x1] }
  0x9f   : > { %5973 = vmatprep.mubr.bf16.mxu1 %v9367_v9  ;;  %v5399_v54 = vcombine.low %v2212_v17, %v2222_v11  ;;  %v2346_v3 = vrot.slane %v2344_v59, 4  ;;  %v2349_v35 = vrot.slane %v2347_v57, 5  ;;  %v7561_v33 = vrot.slane %v2302_v51, 4 }
  0xa0   : > { %v7563_v53 = vrot.slane %v2353_v18, 5  ;;  %v2359_v29 = vrot.slane %v2357_v19, 4  ;;  %v2368_v48 = vshrl.u32 %v5376_v25, 16  ;;  %v2339_v37 = vshll.u32 %v7542_v16, 16  ;;  %v5379_v19 = vld [vmem:[%s6684_s9 + $0x84] sm:$0xf] }
  0xa1   : > { %v2371_v2 = vshll.u32 %v5376_v25, 16  ;;  %v2377_v17 = vshll.u32 %v7559_v44, 16  ;;  %v2381_v11 = vshrl.u32 %v7559_v44, 16  ;;  %v7571_v38 = vrot.slane %v2312_v22, 4  ;;  %v6446_v25 = vld [vmem:[%s6684_s9 + $0x24] sm:$0xff]  }
  0xa2   : > { %v7573_v46 = vrot.slane %v2326_v24, 4  ;;  %v2370_v9 = vrot.slane %v2368_v48, 4  ;;  %v9368_v51 = vcombine.low %v9351_v43, %v9350_v40  ;;  %v2236_v22 = vsel %vm6715_vm2, %v7477_v20, %v7405_v50 }
  0xa3   : > { %6022 = vmatmul.mubr.bf16.gmra.mxu0 %v5284_v55  ;;  %v2336_v55 = vor.u32 %v2335_v49, %v7551_v21  ;;  %v2373_v59 = vrot.slane %v2371_v2, 5  ;;  %v7579_v57 = vrot.slane %v2377_v17, 5  ;;  %v2383_v18 = vrot.slane %v2381_v11, 4  ;;  %v7628_v17 = vld [vmem:[%s6684_s9 + $0x8c] sm:$0x1] }
  0xa4   : > { %6089 = vmatprep.mubr.bf16.mxu0 %v5397_v14  ;;  %v2350_v14 = vor.u32 %v2349_v35, %v2346_v3  ;;  %v2360_v24 = vor.u32 %v2359_v29, %v7563_v53  ;;  %v2363_v49 = vshll.u32 %v7555_v62, 16  ;;  %v2387_v40 = vshll.u32 %v7566_v26, 16  ;;  %v7602_v3 = vld [vmem:[%s6684_s9 + $0x88] sm:$0xf]  ;;  %v6443_v35 = vld [vmem:[%s6684_s9 + $0x18] sm:$0xff]  }
  0xa5   : > { %v2246_v43 = vsel %vm6715_vm2, %v7479_v1, %v7460_v12  ;;  %v2270_v50 = vsel %vm6715_vm2, %v7496_v6, %v7481_v13  ;;  %v2374_v20 = vor.u32 %v2373_v59, %v2370_v9  ;;  %v6449_v12 = vld [vmem:[%s9307_s1 + $0x1b0] sm:$0xff]   ;;  %v7609_v1 = vrot.slane %v2339_v37, 5  ;;  %v7633_v11 = vld [vmem:[%s9307_s1 + $0x1a8] sm:$0xff]  }
  0xa6   : > { %5974 = vmatmul.mubr.bf16.gmra.mxu1 %v9368_v51  ;;  %v2395_v29 = vshll.u32 %v5379_v19, 16  ;;  %v6448_v13 = vld [vmem:[%s9307_s1 + $0x170] sm:$0xff]   ;;  %v2284_v6 = vsel %vm6715_vm2, %v7539_v28, %v7472_v63  ;;  %v2294_v48 = vsel %vm6715_vm2, %v7544_v47, %v7529_v30  ;;  %v7623_v37 = vrot.slane %v2336_v55, 4 }
  0xa7   : > { %6041 = vmatprep.mubr.bf16.mxu1 %v6442_v52  ;;  %v2260_v52 = vsel %vm6715_vm2, %v7487_v58, %v7431_v60  ;;  %v2384_v60 = vor.u32 %v2383_v18, %v7579_v57  ;;  %v2392_v58 = vshrl.u32 %v5379_v19, 16  ;;  %v7625_v2 = vrot.slane %v2350_v14, 4  ;;  %v5382_v14 = vld [vmem:[%s6684_s9 + $0x90] sm:$0xf]  ;;  %v7656_v59 = vld [vmem:[%s6684_s9 + $0x94] sm:$0xf] }
  0xa8   : > { %v7635_v63 = vrot.slane %v2360_v24, 4  ;;  %v7637_v28 = vrot.slane %v2363_v49, 5  ;;  %v2401_v30 = vshll.u32 %v7602_v3, 16  ;;  %v2405_v47 = vshrl.u32 %v7602_v3, 16  ;;  %9369 = vst [vmem:[#allocation10_spill] sm:$0xff] %v7656_v59 }
  0xa9   : > { %v2318_v55 = vsel %vm6715_vm2, %v7571_v38, %v7547_v5  ;;  %v7650_v9 = vrot.slane %v2374_v20, 4  ;;  %v7652_v51 = vrot.slane %v2387_v40, 5  ;;  %v2397_v18 = vrot.slane %v2395_v29, 5  ;;  %v6452_v5 = vld [vmem:[%s9307_s1 + $0x168] sm:$0xff]  }
  0xaa   : > { %v2419_v38 = vshll.u32 %v5382_v14, 16  ;;  %v2425_v24 = vshll.u32 %v7656_v59, 16  ;;  %v2429_v49 = vshrl.u32 %v7656_v59, 16  ;;  %v5400_v40 = vcombine.low %v2236_v22, %v2246_v43 }
  0xab   : > { %6090 = vmatmul.mubr.bf16.vlgmr.msra.gmra.mxu0 %v5398_v4  ;;  %v2308_v4 = vsel %vm6715_vm2, %v7561_v33, %v7506_v7  ;;  %v2411_v7 = vshll.u32 %v7628_v17, 16  ;;  %v2416_v33 = vshrl.u32 %v5382_v14, 16  ;;  %v5401_v20 = vcombine.low %v2260_v52, %v2270_v50 }
  0xac   : > { %6170 = vmatpush3.bf16.msra.mxu0 %v7358_v15  ;;  %6093 = vmatprep.mubr.bf16.mxu0 %v5399_v54  ;;  %v7658_v15 = vrot.slane %v2384_v60, 4  ;;  %v2394_v54 = vrot.slane %v2392_v58, 4  ;;  %v7667_v19 = vrot.slane %v2401_v30, 5  ;;  %v6447_v60 = vld [vmem:[%s6684_s9 + $0x30] sm:$0xff]   ;;  %v6457_v58 = vld [vmem:[%s9307_s1 + $0x1a0] sm:$0xff]   ;;  %v2421_v14 = vrot.slane %v2419_v38, 5 }
  0xad   : > { %6171 = vmatprep.subr.bf16.mxu0 %v6449_v12  ;;  %v2418_v29 = vrot.slane %v2416_v33, 4  ;;  %v2431_v22 = vrot.slane %v2429_v49, 4  ;;  %v7675_v43 = vcombine.low %v2284_v6, %v2294_v48  ;;  %v7678_v52 = vcombine.low %v2308_v4, %v2318_v55  ;;  %v5385_v30 = vld [vmem:[%s6684_s9 + $0x9c] sm:$0xf]  ;;  %v7700_v4 = vld [vmem:[%s6684_s9 + $0xa4] sm:$0x1] }
  0xae   : > { %6042 = vmatmul.mubr.bf16.vlgmr.msra.gmra.mxu1 %v6443_v35  ;;  %v2407_v35 = vrot.slane %v2405_v47, 4  ;;  %v2398_v48 = vor.u32 %v2397_v18, %v2394_v54  ;;  %v7697_v47 = vld [vmem:[%s6684_s9 + $0xa0] sm:$0xf]  ;;  %9372 = vst [vmem:[#allocation13_spill] sm:$0xff] %v7700_v4  ;;  %v2440_v55 = vshrl.u32 %v5385_v30, 16  ;;  %v2443_v33 = vshll.u32 %v5385_v30, 16 }
  0xaf   : > { %6122 = vmatpush3.bf16.msra.mxu1 %v7353_v36  ;;  %6045 = vmatprep.mubr.bf16.mxu1 %v6446_v25  ;;  %v7673_v36 = vrot.slane %v2425_v24, 5  ;;  %v2342_v25 = vsel %vm6715_vm2, %v7623_v37, %v7609_v1  ;;  %9371 = vst [vmem:[#allocation12_spill] sm:$0xff] %v7697_v47  ;;  %v6450_v38 = vld [vmem:[%s6684_s9 + $0x3c] sm:$0xff]   ;;  %v2449_v37 = vshll.u32 %v7697_v47, 16  ;;  %v2453_v24 = vshrl.u32 %v7697_v47, 16 }
  0xb0   : > { %6123 = vmatprep.subr.bf16.mxu1 %v6448_v13  ;;  %6172 = vmatpush3.bf16.msra.mxu0 %v6449_v12  ;;  %v7689_v12 = vld [vmem:[%s6684_s9 + $0x98] sm:$0x1]  ;;  %v2408_v1 = vor.u32 %v2407_v35, %v7667_v19  ;;  %v6456_v54 = vld [vmem:[%s9307_s1 + $0x160] sm:$0xff]   ;;  %v2422_v18 = vor.u32 %v2421_v14, %v2418_v29  ;;  %v2442_v30 = vrot.slane %v2440_v55, 4  ;;  %v2445_v49 = vrot.slane %v2443_v33, 5 }
  0xb1   : > { %6173 = vmatprep.subr.bf16.mxu0 %v7633_v11  ;;  %9370 = vst [vmem:[#allocation11_spill] sm:$0xff] %v7689_v12  ;;  %v2435_v35 = vshll.u32 %v7689_v12, 16  ;;  %v2455_v6 = vrot.slane %v2453_v24, 4  ;;  %v2459_v50 = vshll.u32 %v7700_v4, 16  ;;  %v5388_v47 = vld [vmem:[%s6684_s9 + $0xa8] sm:$0xf] }
  0xb2   : > { %v6460_v29 = vld [vmem:[%s9307_s1 + $0x158] sm:$0xff]   ;;  %v7723_v14 = vrot.slane %v2398_v48, 4  ;;  %v2464_v55 = vshrl.u32 %v5388_v47, 16  ;;  %v2467_v33 = vshll.u32 %v5388_v47, 16  ;;  %v7736_v4 = vld [vmem:[%s6684_s9 + $0xb0] sm:$0x1] }
  0xb3   : > { %6094 = vmatmul.mubr.bf16.gmra.mxu0 %v5400_v40  ;;  %6124 = vmatpush3.bf16.msra.mxu1 %v6448_v13  ;;  %v6461_v13 = vld [vmem:[%s9307_s1 + $0x198] sm:$0xff]   ;;  %v2432_v40 = vor.u32 %v2431_v22, %v7673_v36  ;;  %v7725_v22 = vrot.slane %v2411_v7, 5  ;;  %v6451_v48 = vld [vmem:[%s6684_s9 + $0x48] sm:$0xff]   ;;  %v7739_v7 = vrot.slane %v2408_v1, 4  ;;  %v7741_v12 = vrot.slane %v2422_v18, 4 }
  0xb4   : > { %6097 = vmatprep.mubr.bf16.mxu0 %v5401_v20  ;;  %6125 = vmatprep.subr.bf16.mxu1 %v6452_v5  ;;  %v7716_v20 = vrot.slane %v2449_v37, 5  ;;  %v2446_v37 = vor.u32 %v2445_v49, %v2442_v30  ;;  %v7743_v59 = vrot.slane %v2435_v35, 5  ;;  %v6464_v49 = vld [vmem:[%s9307_s1 + $0x150] sm:$0xff]   ;;  %v7760_v18 = vrot.slane %v2467_v33, 5 }
  0xb5   : > { %6174 = vmatpush3.bf16.msra.mxu0 %v7633_v11  ;;  %v7728_v11 = vld [vmem:[%s6684_s9 + $0xac] sm:$0xf]  ;;  %v2483_v35 = vshll.u32 %v7736_v4, 16 }
  0xb6   : > { %6046 = vmatmul.mubr.bf16.gmra.mxu1 %v6447_v60  ;;  %6175 = vmatprep.subr.bf16.mxu0 %v6457_v58  ;;  %9373 = vst [vmem:[#allocation14_spill] sm:$0xff] %v7728_v11  ;;  %v2366_v60 = vsel %vm6715_vm2, %v7635_v63, %v7637_v28  ;;  %v2456_v24 = vor.u32 %v2455_v6, %v7716_v20  ;;  %v2473_v47 = vshll.u32 %v7728_v11, 16  ;;  %v6454_v63 = vld [vmem:[%s6684_s9 + $0x54] sm:$0xff]   ;;  %v7750_v28 = vrot.slane %v2432_v40, 4 }
  0xb7   : > { %6049 = vmatprep.mubr.bf16.mxu1 %v6450_v38  ;;  %6126 = vmatpush3.bf16.msra.mxu1 %v6452_v5  ;;  %v6465_v5 = vld [vmem:[%s9307_s1 + $0x190] sm:$0xff]   ;;  %v7752_v6 = vrot.slane %v2459_v50, 5  ;;  %v7754_v38 = vrot.slane %v2464_v55, 4  ;;  %v2477_v1 = vshrl.u32 %v7728_v11, 16  ;;  %v7769_v40 = vrot.slane %v2446_v37, 4 }
  0xb8   : > { %6127 = vmatprep.subr.bf16.mxu1 %v6456_v54  ;;  %v7771_v30 = vrot.slane %v2456_v24, 4  ;;  %v5391_v55 = vld [vmem:[%s6684_s9 + $0xb4] sm:$0xf]  ;;  %v7775_v11 = vld [vmem:[%s6684_s9 + $0xb8] sm:$0xf]  ;;  %v6468_v24 = vld [vmem:[%s9307_s1 + $0x148] sm:$0xff]  }
  0xb9   : > { %6176 = vmatpush3.bf16.msra.mxu0 %v6457_v58  ;;  %v9374_v58 = vsel %vm6715_vm2, %v7573_v46, %v7551_v21  ;;  %9375 = vst [vmem:[#allocation15_spill] sm:$0xff] %v7775_v11  ;;  %v2380_v21 = vsel %vm6715_vm2, %v7650_v9, %v7579_v57  ;;  %v7787_v46 = vrot.slane %v2473_v47, 5  ;;  %v5394_v37 = vld [vmem:[%s6684_s9 + $0xc0] sm:$0xf]  ;;  %v2390_v57 = vsel %vm6715_vm2, %v7658_v15, %v7652_v51  ;;  %v7814_v47 = vld [vmem:[%s6684_s9 + $0xc4] sm:$0xf] }
  0xba   : > { %6177 = vmatprep.subr.bf16.mxu0 %v6461_v13  ;;  %v5404_v50 = vcombine.low %v9374_v58, %v2342_v25  ;;  %v2488_v25 = vshrl.u32 %v5391_v55, 16  ;;  %v2404_v9 = vsel %vm6715_vm2, %v7723_v14, %v7667_v19  ;;  %9378 = vst [vmem:[#allocation17_spill] sm:$0xff] %v7814_v47  ;;  %v7817_v51 = vld [vmem:[%s6684_s9 + $0xc8] sm:$0x1]  ;;  %v2521_v58 = vshll.u32 %v7814_v47, 16 }
  0xbb   : > { %6098 = vmatmul.mubr.bf16.gmra.mxu0 %v7675_v43  ;;  %6128 = vmatpush3.bf16.msra.mxu1 %v6456_v54  ;;  %v9376_v43 = vsel %vm6715_vm2, %v7625_v2, %v7563_v53  ;;  %v2479_v54 = vrot.slane %v2477_v1, 4  ;;  %v2491_v53 = vshll.u32 %v5391_v55, 16  ;;  %v2497_v2 = vshll.u32 %v7775_v11, 16 }
  0xbc   : > { %6101 = vmatprep.mubr.bf16.mxu0 %v7678_v52  ;;  %v5405_v33 = vcombine.low %v9376_v43, %v2366_v60  ;;  %6129 = vmatprep.subr.bf16.mxu1 %v6460_v29  ;;  %v6469_v52 = vld [vmem:[%s9307_s1 + $0x188] sm:$0xff]   ;;  %v2501_v60 = vshrl.u32 %v7775_v11, 16  ;;  %v2490_v15 = vrot.slane %v2488_v25, 4  ;;  %v9379_v55 = vrot.slane %v7222_v32, 5 }
  0xbd   : > { %6178 = vmatpush3.bf16.msra.mxu0 %v6461_v13  ;;  %v2414_v13 = vsel %vm6715_vm2, %v7739_v7, %v7725_v22  ;;  %v2493_v19 = vrot.slane %v2491_v53, 5  ;;  %v7819_v14 = vrot.slane %v2497_v2, 5  ;;  %v2512_v22 = vshrl.u32 %v5394_v37, 16  ;;  %v6455_v2 = vld [vmem:[%s6684_s9 + $0x60] sm:$0xff]  }
  0xbe   : > { %6050 = vmatmul.mubr.bf16.gmra.mxu1 %v6451_v48  ;;  %6179 = vmatprep.subr.bf16.mxu0 %v6465_v5  ;;  %v7811_v48 = vld [vmem:[%s6684_s9 + $0xbc] sm:$0x1]  ;;  %v2503_v1 = vrot.slane %v2501_v60, 4  ;;  %v2515_v7 = vshll.u32 %v5394_v37, 16  ;;  %v7824_v43 = vrot.slane %v9379_v55, 4  ;;  %v7829_v25 = vrot.slane %v2483_v35, 5 }
  0xbf   : > { %9377 = vst [vmem:[#allocation16_spill] sm:$0xff] %v7811_v48  ;;  %6053 = vmatprep.mubr.bf16.mxu1 %v6454_v63  ;;  %6130 = vmatpush3.bf16.msra.mxu1 %v6460_v29  ;;  %v2470_v63 = vor.u32 %v7760_v18, %v7754_v38  ;;  %v2480_v29 = vor.u32 %v2479_v54, %v7787_v46  ;;  %v2525_v53 = vshrl.u32 %v7814_v47, 16  ;;  %v2507_v60 = vshll.u32 %v7811_v48, 16  ;;  %v6458_v38 = vld [vmem:[%s6684_s9 + $0x6c] sm:$0xff]   ;;  %v7849_v48 = vld [vmem:[%s6684_s9 + $0x18] sm:$0xe] }
  0xc0   : > { %6131 = vmatprep.subr.bf16.mxu1 %v6464_v49  ;;  %v2514_v37 = vrot.slane %v2512_v22, 4  ;;  %v2517_v11 = vrot.slane %v2515_v7, 5  ;;  %v7834_v55 = vrot.slane %v2521_v58, 5  ;;  %v2494_v18 = vor.u32 %v2493_v19, %v2490_v15  ;;  %v6472_v22 = vld [vmem:[%s9307_s1 + $0x140] sm:$0xff]   ;;  %v7846_v58 = vld [vmem:[%s6684_s9 + $0xc] sm:$0xe] }
  0xc1   : > { %6180 = vmatpush3.bf16.msra.mxu0 %v6465_v5  ;;  %v6473_v5 = vld [vmem:[%s9307_s1 + $0x180] sm:$0xff]   ;;  %v2504_v35 = vor.u32 %v2503_v1, %v7819_v14  ;;  %v2527_v54 = vrot.slane %v2525_v53, 4  ;;  %v2531_v47 = vshll.u32 %v7817_v51, 16  ;;  %v5406_v15 = vcombine.low %v2380_v21, %v2390_v57 }
  0xc2   : > { %6181 = vmatprep.subr.bf16.mxu0 %v6469_v52  ;;  %v2518_v7 = vor.u32 %v2517_v11, %v2514_v37  ;;  %v5407_v19 = vcombine.low %v2404_v9, %v2414_v13  ;;  %v7857_v1 = vrot.slane %v2470_v63, 4  ;;  %v7859_v11 = vrot.slane %v2480_v29, 4  ;;  %v6459_v9 = vld [vmem:[%s6684_s9 + $0x78] sm:$0xff]   ;;  %v6462_v37 = vld [vmem:[%s6684_s9 + $0x84] sm:$0xff]  }
  0xc3   : > { %6102 = vmatmul.mubr.bf16.gmra.mxu0 %v5404_v50  ;;  %6132 = vmatpush3.bf16.msra.mxu1 %v6464_v49  ;;  %v7854_v49 = vld [vmem:[%s9307_s1 + $0x238] sm:$0xff]   ;;  %v2528_v50 = vor.u32 %v2527_v54, %v7834_v55  ;;  %v7868_v53 = vrot.slane %v2504_v35, 4  ;;  %v7870_v21 = vrot.slane %v2507_v60, 5  ;;  %v7876_v63 = vrot.slane %v2531_v47, 5  ;;  %v5424_v60 = vld [vmem:[%s6684_s9 + $0x30] sm:$0xe] }
  0xc4   : > { %6105 = vmatprep.mubr.bf16.mxu0 %v5405_v33  ;;  %6133 = vmatprep.subr.bf16.mxu1 %v6468_v24  ;;  %v7864_v33 = vld [vmem:[%s9307_s1 + $0x1f8] sm:$0xff]   ;;  %v7874_v13 = vrot.slane %v2518_v7, 4  ;;  %v2925_v29 = vrot.slane %v7296_v42, 5  ;;  %v9380_v35 = vld [vmem:[#allocation6_spill] sm:$0xff]  ;;  %v5440_v47 = vrot.slane %v5424_v60, 9  ;;  %v9383_v60 = vld [vmem:[#allocation7_spill] sm:$0xff] }
  0xc5   : > { %6182 = vmatpush3.bf16.msra.mxu0 %v6469_v52  ;;  %v7866_v52 = vrot.slane %v2494_v18, 4  ;;  %v9381_v7 = vld [vmem:[#allocation9_spill] sm:$0xff]  ;;  %v2946_v18 = vrot.slane %v7379_v0, 5  ;;  %v2462_v0 = vsel %vm6715_vm2, %v7771_v30, %v7752_v6  ;;  %v2960_v30 = vrot.slane %v7470_v41, 5 }
  0xc6   : > { %6054 = vmatmul.mubr.bf16.gmra.mxu1 %v6455_v2  ;;  %6183 = vmatprep.subr.bf16.mxu0 %v6473_v5  ;;  %v2943_v57 = vrot.slane %v9381_v7, 5  ;;  %v9382_v2 = vld [vmem:[#allocation8_spill] sm:$0xff] }
  0xc7   : > { %6057 = vmatprep.mubr.bf16.mxu1 %v6458_v38  ;;  %6134 = vmatpush3.bf16.msra.mxu1 %v6468_v24  ;;  %v7881_v24 = vrot.slane %v2528_v50, 4  ;;  %v2929_v38 = vrot.slane %v7313_v61, 5  ;;  %v2428_v50 = vsel %vm6715_vm2, %v7741_v12, %v7673_v36  ;;  %v2950_v54 = vrot.slane %v9382_v2, 5  ;;  %v5425_v12 = vld [vmem:[%s6684_s9 + $0x3c] sm:$0xe] }
  0xc8   : > { %6135 = vmatprep.subr.bf16.mxu1 %v6472_v22  ;;  %v7903_v7 = vsel %vm7026_vm5, %v5440_v47, %v2943_v57  ;;  %v2945_v36 = vrot.slane %v2943_v57, 4  ;;  %v5441_v2 = vrot.slane %v5425_v12, 9  ;;  %v6463_v47 = vld [vmem:[%s6684_s9 + $0x90] sm:$0xff]   ;;  %v2967_v12 = vrot.slane %v7490_v34, 5 }
  0xc9   : > { %6184 = vmatpush3.bf16.msra.mxu0 %v6473_v5  ;;  %v2438_v5 = vsel %vm6715_vm2, %v7750_v28, %v7743_v59  ;;  %v2452_v59 = vsel %vm6715_vm2, %v7769_v40, %v7716_v20  ;;  %v2952_v28 = vrot.slane %v2950_v54, 4  ;;  %v2957_v20 = vrot.slane %v7429_v39, 5 }
  0xca   : > { %6265 = vmatprep.subr.bf16.mxu0 %v7854_v49  ;;  %v7917_v57 = vsel %vm7026_vm5, %v2945_v36, %v2946_v18  ;;  %v5409_v18 = vcombine.low %v2452_v59, %v2462_v0  ;;  %v7932_v39 = vsel %vm7026_vm5, %v5441_v2, %v2950_v54  ;;  %v2476_v36 = vsel %vm6715_vm2, %v7857_v1, %v7787_v46  ;;  %v5427_v54 = vld [vmem:[%s6684_s9 + $0x54] sm:$0xe] }
  0xcb   : > { %6106 = vmatmul.mubr.bf16.gmra.mxu0 %v5406_v15  ;;  %6136 = vmatpush3.bf16.msra.mxu1 %v6472_v22  ;;  %v2939_v15 = vrot.slane %v9383_v60, 5  ;;  %v2953_v22 = vrot.slane %v7408_v45, 5  ;;  %v5456_v40 = vcombine.low %v7903_v7, %v7917_v57  ;;  %v5426_v45 = vld [vmem:[%s6684_s9 + $0x48] sm:$0xe]  ;;  %v2486_v46 = vsel %vm6715_vm2, %v7859_v11, %v7829_v25  ;;  %v6483_v7 = vld [vmem:[%s6684_s9 + $0x54] sm:$0xff]  }
  0xcc   : > { %6109 = vmatprep.mubr.bf16.mxu0 %v5407_v19  ;;  %6217 = vmatprep.subr.bf16.mxu1 %v7864_v33  ;;  %v5408_v19 = vcombine.low %v2428_v50, %v2438_v5  ;;  %v2959_v50 = vrot.slane %v2957_v20, 4  ;;  %v6466_v5 = vld [vmem:[%s6684_s9 + $0x9c] sm:$0xff]   ;;  %v2971_v2 = vrot.slane %v7494_v31, 5  ;;  %v2500_v34 = vsel %vm6715_vm2, %v7866_v52, %v7819_v14 }
  0xcd   : > { %v7924_v6 = vsel %vm7026_vm5, %v2952_v28, %v2953_v22  ;;  %v5443_v28 = vrot.slane %v5427_v54, 9  ;;  %v5428_v22 = vld [vmem:[%s6684_s9 + $0x60] sm:$0xe]  ;;  %v2974_v25 = vrot.slane %v7542_v16, 5  ;;  %v2510_v11 = vsel %vm6715_vm2, %v7868_v53, %v7870_v21 }
  0xce   : > { %6058 = vmatmul.mubr.bf16.gmra.mxu1 %v6459_v9  ;;  %v2964_v9 = vrot.slane %v7464_v10, 5  ;;  %v5457_v41 = vcombine.low %v7932_v39, %v7924_v6  ;;  %v7947_v59 = vsel %vm7026_vm5, %v2959_v50, %v2960_v30  ;;  %v2978_v14 = vrot.slane %v7534_v8, 5  ;;  %v5606_v6 = vld [vmem:[%s6684_s9 + $0x24] sm:$0xe] }
  0xcf   : > { %6061 = vmatprep.mubr.bf16.mxu1 %v6462_v37  ;;  %v5442_v37 = vrot.slane %v5426_v45, 9  ;;  %v2973_v45 = vrot.slane %v2971_v2, 4  ;;  %v5410_v52 = vcombine.low %v2476_v36, %v2486_v46  ;;  %v2981_v8 = vrot.slane %v7555_v62, 5  ;;  %v5430_v36 = vld [vmem:[%s6684_s9 + $0x78] sm:$0xe] }
  0xd0   : > { %v2966_v0 = vrot.slane %v2964_v9, 4  ;;  %v7974_v31 = vsel %vm7026_vm5, %v5443_v28, %v2964_v9  ;;  %v2980_v9 = vrot.slane %v2978_v14, 4  ;;  %v2985_v54 = vrot.slane %v7559_v44, 5 }
  0xd1   : > { %v7943_v10 = vsel %vm7026_vm5, %v5442_v37, %v2957_v20  ;;  %v5444_v20 = vrot.slane %v5428_v22, 9  ;;  %v7986_v53 = vsel %vm7026_vm5, %v2973_v45, %v2974_v25  ;;  %v5411_v37 = vcombine.low %v2500_v34, %v2510_v11 }
  0xd2   : > { %v8002_v46 = vsel %vm7026_vm5, %v2980_v9, %v2981_v8  ;;  %v5446_v62 = vrot.slane %v5430_v36, 9  ;;  %v2992_v28 = vrot.slane %v7602_v3, 5  ;;  %v2987_v44 = vrot.slane %v2985_v54, 4  ;;  %v6474_v8 = vld [vmem:[%s6684_s9 + $0x18] sm:$0xff]  }
  0xd3   : > { %6110 = vmatmul.mubr.bf16.gmra.mxu0 %v5408_v19  ;;  %v7965_v19 = vsel %vm7026_vm5, %v2966_v0, %v2967_v12  ;;  %v7981_v16 = vsel %vm7026_vm5, %v5444_v20, %v2971_v2  ;;  %v2988_v0 = vrot.slane %v7566_v26, 5  ;;  %v2995_v26 = vrot.slane %v7628_v17, 5  ;;  %v5431_v20 = vld [vmem:[%s6684_s9 + $0x84] sm:$0xe]  ;;  %v9388_v36 = vld [vmem:[#allocation12_spill] sm:$0xff] }
  0xd4   : > { %6113 = vmatprep.mubr.bf16.mxu0 %v5409_v18  ;;  %v5429_v18 = vld [vmem:[%s6684_s9 + $0x6c] sm:$0xe]  ;;  %v2524_v2 = vsel %vm6715_vm2, %v7874_v13, %v7834_v55  ;;  %v8014_v34 = vsel %vm7026_vm5, %v5446_v62, %v2985_v54  ;;  %v2534_v3 = vsel %vm6715_vm2, %v7881_v24, %v7876_v63  ;;  %v5447_v25 = vrot.slane %v5431_v20, 9  ;;  %v9386_v63 = vld [vmem:[#allocation10_spill] sm:$0xff] }
  0xd5   : > { %v5445_v21 = vrot.slane %v5429_v18, 9  ;;  %v8023_v17 = vsel %vm7026_vm5, %v2987_v44, %v2988_v0  ;;  %v2994_v11 = vrot.slane %v2992_v28, 4  ;;  %v9384_v45 = vrot.slane %v7222_v32, 5  ;;  %v5432_v18 = vld [vmem:[%s6684_s9 + $0x90] sm:$0xe]  ;;  %v6486_v62 = vld [vmem:[%s6684_s9 + $0x60] sm:$0xff]  }
  0xd6   : > { %6062 = vmatmul.mubr.bf16.gmra.mxu1 %v6463_v47  ;;  %v6467_v47 = vld [vmem:[%s6684_s9 + $0xa8] sm:$0xff]   ;;  %v9385_v55 = vrot.slane %v7846_v58, 9  ;;  %v2999_v24 = vrot.slane %v9386_v63, 5  ;;  %v8040_v32 = vsel %vm7026_vm5, %v5447_v25, %v2992_v28  ;;  %v3006_v54 = vrot.slane %v9388_v36, 5 }
  0xd7   : > { %6065 = vmatprep.mubr.bf16.mxu1 %v6466_v5  ;;  %v6470_v5 = vld [vmem:[%s6684_s9 + $0xb4] sm:$0xff]   ;;  %v7998_v12 = vsel %vm7026_vm5, %v5445_v21, %v2978_v14  ;;  %v5423_v14 = vld [vmem:[%s6684_s9 + $0x24] sm:$0xe]  ;;  %v9387_v21 = vld [vmem:[#allocation11_spill] sm:$0xff]  ;;  %v8044_v58 = vsel %vm7026_vm5, %v2994_v11, %v2995_v26  ;;  %v5412_v0 = vcombine.low %v2524_v2, %v2534_v3  ;;  %v2926_v28 = vsel %vm7026_vm5, %v7824_v43, %v2925_v29 }
  0xd8   : > { %v2923_v13 = vsel %vm7026_vm5, %v9385_v55, %v9384_v45  ;;  %v3002_v9 = vrot.slane %v9387_v21, 5  ;;  %v3001_v44 = vrot.slane %v2999_v24, 4  ;;  %v6471_v45 = vld [vmem:[%s6684_s9 + $0xc0] sm:$0xff]   ;;  %v2931_v26 = vrot.slane %v2929_v38, 4  ;;  %v5433_v2 = vld [vmem:[%s6684_s9 + $0x9c] sm:$0xe] }
  0xd9   : > { %v3008_v3 = vrot.slane %v3006_v54, 4  ;;  %v5449_v11 = vrot.slane %v5433_v2, 9  ;;  %v9390_v55 = vld [vmem:[#allocation14_spill] sm:$0xff]  ;;  %v5453_v21 = vcombine.low %v2923_v13, %v2926_v28  ;;  %v9394_v28 = vrot.slane %v7849_v48, 9  ;;  %v8188_v43 = vld [vmem:[%s6684_s9 + $0x34] sm:$0xf] }
  0xda   : > { %v8065_v25 = vsel %vm7026_vm5, %v3001_v44, %v3002_v9  ;;  %v3013_v42 = vrot.slane %v9390_v55, 5  ;;  %v5434_v63 = vld [vmem:[%s6684_s9 + $0xa8] sm:$0xe]  ;;  %v3848_v39 = vshll.u32 %v8188_v43, 16 }
  0xdb   : > { %6114 = vmatmul.mubr.bf16.gmra.mxu0 %v5410_v52  ;;  %v8078_v9 = vsel %vm7026_vm5, %v5449_v11, %v3006_v54  ;;  %v5435_v54 = vld [vmem:[%s6684_s9 + $0xb4] sm:$0xe] }
  0xdc   : > { %6117 = vmatprep.mubr.bf16.mxu0 %v5411_v37  ;;  %v5448_v37 = vrot.slane %v5432_v18, 9  ;;  %v5439_v18 = vrot.slane %v5423_v14, 9  ;;  %v3015_v36 = vrot.slane %v3013_v42, 4  ;;  %v9391_v14 = vrot.slane %v9380_v35, 5 }
  0xdd   : > { %v5451_v55 = vrot.slane %v5435_v54, 9 }
  0xde   : > { %6066 = vmatmul.mubr.bf16.gmra.mxu1 %v6467_v47  ;;  %v9389_v47 = vld [vmem:[#allocation13_spill] sm:$0xff]  ;;  %v2938_v44 = vrot.slane %v9391_v14, 4  ;;  %v9396_v61 = vmov %v9391_v14  ;;  %v3030_v14 = vrot.slane %v7817_v51, 5  ;;  %v5539_v51 = vld [vmem:[%s6684_s9 + $0x30] sm:$0xf] }
  0xdf   : > { %6069 = vmatprep.mubr.bf16.mxu1 %v6470_v5  ;;  %v3009_v20 = vrot.slane %v9389_v47, 5  ;;  %v8060_v5 = vsel %vm7026_vm5, %v5448_v37, %v2999_v24  ;;  %v3016_v24 = vrot.slane %v7736_v4, 5  ;;  %v5450_v37 = vrot.slane %v5434_v63, 9 }
  0xe0   : > { %v9395_v63 = vrot.slane %v7327_v23, 5  ;;  %v2937_v48 = vsel %vm7026_vm5, %v5439_v18, %v9396_v61  ;;  %v2940_v23 = vsel %vm7026_vm5, %v2938_v44, %v2939_v15  ;;  %v8158_v61 = vld [vmem:[%s6684_s9 + $0x28] sm:$0xf] }
  0xe1   : > { %v8072_v29 = vsel %vm7026_vm5, %v3008_v3, %v3009_v20  ;;  %v9392_v20 = vld [vmem:[#allocation15_spill] sm:$0xff]  ;;  %v8087_v4 = vsel %vm7026_vm5, %v5450_v37, %v3013_v42  ;;  %v8091_v13 = vsel %vm7026_vm5, %v3015_v36, %v3016_v24  ;;  %v2930_v3 = vsel %vm7026_vm5, %v9394_v28, %v2929_v38  ;;  %v5436_v37 = vld [vmem:[%s6684_s9 + $0xc0] sm:$0xe] }
  0xe2   : > { %v3020_v2 = vrot.slane %v9392_v20, 5  ;;  %v2933_v24 = vsel %vm7026_vm5, %v2931_v26, %v9395_v63  ;;  %v9397_v38 = vld [vmem:[#allocation17_spill] sm:$0xff]  ;;  %v5452_v18 = vrot.slane %v5436_v37, 9  ;;  %v6481_v20 = vld [vmem:[%s9307_s1 + $0x230] sm:$0xff]   ;;  %v5455_v54 = vcombine.low %v2937_v48, %v2940_v23  ;;  %v5536_v63 = vld [vmem:[%s6684_s9 + $0x24] sm:$0xf] }
  0xe3   : > { %6118 = vmatmul.mubr.bf16.gmra.mxu0 %v5412_v0  ;;  %v3027_v36 = vrot.slane %v9397_v38, 5  ;;  %v5454_v15 = vcombine.low %v2930_v3, %v2933_v24  ;;  %v6480_v28 = vld [vmem:[%s9307_s1 + $0x1f0] sm:$0xff]   ;;  %v6479_v48 = vld [vmem:[%s6684_s9 + $0x3c] sm:$0xff]   ;;  %v3815_v37 = vshrl.u32 %v5536_v63, 16  ;;  %v6482_v38 = vld [vmem:[%s6684_s9 + $0x48] sm:$0xff]   ;;  %v3824_v23 = vshll.u32 %v8158_v61, 16 }
  0xe4   : > { %6185 = vmatprep.mubr.bf16.mxu0 %v6474_v8  ;;  %v9393_v8 = vld [vmem:[#allocation16_spill] sm:$0xff]  ;;  %v3022_v42 = vrot.slane %v3020_v2, 4  ;;  %v8122_v26 = vsel %vm7026_vm5, %v5451_v55, %v3020_v2  ;;  %v6485_v55 = vld [vmem:[%s9307_s1 + $0x228] sm:$0xff]  }
  0xe5   : > { %v3023_v0 = vrot.slane %v9393_v8, 5  ;;  %v3029_v60 = vrot.slane %v3027_v36, 4  ;;  %v8135_v44 = vsel %vm7026_vm5, %v5452_v18, %v3027_v36  ;;  %v5533_v2 = vld [vmem:[%s6684_s9 + $0x18] sm:$0xf]  ;;  %v6484_v36 = vld [vmem:[%s9307_s1 + $0x1e8] sm:$0xff]   ;;  %v3817_v11 = vrot.slane %v3815_v37, 4 }
  0xe6   : > { %6070 = vmatmul.mubr.bf16.gmra.mxu1 %v6471_v45  ;;  %v6475_v45 = vld [vmem:[%s6684_s9 + $0x24] sm:$0xff]   ;;  %v3794_v24 = vshll.u32 %v5533_v2, 16  ;;  %v5535_v18 = vld [vmem:[%s6684_s9 + $0x20] sm:$0x1]  ;;  %v3839_v37 = vshrl.u32 %v5539_v51, 16 }
  0xe7   : > { %6137 = vmatprep.mubr.bf16.mxu1 %v5453_v21  ;;  %v6478_v21 = vld [vmem:[%s6684_s9 + $0x30] sm:$0xff]   ;;  %v8126_v35 = vsel %vm7026_vm5, %v3022_v42, %v3023_v0  ;;  %v8140_v8 = vsel %vm7026_vm5, %v3029_v60, %v3030_v14  ;;  %v8143_v0 = vld [vmem:[%s6684_s9 + $0x1c] sm:$0xf]  ;;  %v3791_v42 = vshrl.u32 %v5533_v2, 16  ;;  %v3818_v14 = vshll.u32 %v5536_v63, 16 }
  0xe8   : > { %v4561_v3 = vrot.slane %v8143_v0, 5  ;;  %v8178_v63 = vld [vmem:[%s6684_s9 + $0x2c] sm:$0x1] }
  0xe9   : > { %v3793_v60 = vrot.slane %v3791_v42, 4  ;;  %v3820_v47 = vrot.slane %v3818_v14, 5  ;;  %v6488_v42 = vld [vmem:[%s9307_s1 + $0x1e0] sm:$0xff]  }
  0xeb   : > { %6186 = vmatmul.mubr.bf16.vlgmr.msra.gmra.mxu0 %v6475_v45  ;;  %v3804_v45 = vshrl.u32 %v8143_v0, 16 }
  0xec   : > { %6266 = vmatpush3.bf16.msra.mxu0 %v7854_v49  ;;  %6189 = vmatprep.mubr.bf16.mxu0 %v6478_v21  ;;  %v3800_v49 = vshll.u32 %v8143_v0, 16  ;;  %v3828_v21 = vshrl.u32 %v8158_v61, 16 }
  0xed   : > { %6267 = vmatprep.subr.bf16.mxu0 %v6481_v20 }
  0xee   : > { %6138 = vmatmul.mubr.bf16.vlgmr.msra.gmra.mxu1 %v5454_v15  ;;  %v5605_v15 = vld [vmem:[%s6684_s9 + $0x18] sm:$0xe]  ;;  %v8173_v2 = vrot.slane %v3800_v49, 5  ;;  %v3810_v49 = vshll.u32 %v5535_v18, 16  ;;  %v3830_v0 = vrot.slane %v3828_v21, 4 }
  0xef   : > { %6218 = vmatpush3.bf16.msra.mxu1 %v7864_v33  ;;  %6141 = vmatprep.mubr.bf16.mxu1 %v5455_v54  ;;  %v6489_v33 = vld [vmem:[%s9307_s1 + $0x220] sm:$0xff]   ;;  %v3806_v54 = vrot.slane %v3804_v45, 4  ;;  %v8185_v45 = vrot.slane %v3824_v23, 5  ;;  %v6493_v23 = vld [vmem:[%s9307_s1 + $0x218] sm:$0xff]  }
  0xf0   : > { %6219 = vmatprep.subr.bf16.mxu1 %v6480_v28  ;;  %6268 = vmatpush3.bf16.msra.mxu0 %v6481_v20  ;;  %v3796_v20 = vrot.slane %v3794_v24, 5 }
  0xf1   : > { %6269 = vmatprep.subr.bf16.mxu0 %v6485_v55  ;;  %v3807_v21 = vor.u32 %v3806_v54, %v8173_v2  ;;  %v3831_v54 = vor.u32 %v3830_v0, %v8185_v45 }
  0xf3   : > { %6190 = vmatmul.mubr.bf16.gmra.mxu0 %v6479_v48  ;;  %6220 = vmatpush3.bf16.msra.mxu1 %v6480_v28  ;;  %v5621_v48 = vrot.slane %v5605_v15, 9  ;;  %v4564_v28 = vrot.slane %v5535_v18, 5  ;;  %v4563_v18 = vrot.slane %v4561_v3, 4  ;;  %v3834_v15 = vshll.u32 %v8178_v63, 16 }
  0xf4   : > { %6193 = vmatprep.mubr.bf16.mxu0 %v6482_v38  ;;  %6221 = vmatprep.subr.bf16.mxu1 %v6484_v36  ;;  %v3842_v38 = vshll.u32 %v5539_v51, 16  ;;  %v4568_v51 = vrot.slane %v8158_v61, 5  ;;  %v3852_v61 = vshrl.u32 %v8188_v43, 16 }
  0xf5   : > { %v8183_v24 = vpop.f32.mrf.mxu0  ;;  %6270 = vmatpush3.bf16.msra.mxu0 %v6485_v55  ;;  %v8193_v14 = vpop.f32.mrf.mxu1  ;;  %v3797_v55 = vor.u32 %v3796_v20, %v3793_v60  ;;  %v6492_v60 = vld [vmem:[%s9307_s1 + $0x1d8] sm:$0xff]   ;;  %v8211_v20 = vrot.slane %v3810_v49, 5  ;;  %v6497_v49 = vld [vmem:[%s9307_s1 + $0x210] sm:$0xff]  }
  0xf6   : > { %6142 = vmatmul.mubr.bf16.gmra.mxu1 %v5456_v40  ;;  %6271 = vmatprep.subr.bf16.mxu0 %v6489_v33  ;;  %9398 = vst [vmem:[#allocation6_spill] sm:$0xff] %v8193_v14  ;;  %v3821_v40 = vor.u32 %v3820_v47, %v3817_v11  ;;  %v3841_v47 = vrot.slane %v3839_v37, 4  ;;  %v3844_v11 = vrot.slane %v3842_v38, 5  ;;  %v8238_v37 = vld [vmem:[%s6684_s9 + $0x40] sm:$0xf]  ;;  %v4570_v50 = vrot.slane %v4568_v51, 4 }
  0xf7   : > { %6145 = vmatprep.mubr.bf16.mxu1 %v5457_v41  ;;  %6222 = vmatpush3.bf16.msra.mxu1 %v6484_v36  ;;  %v8204_v57 = vpop.f32.mrf.mxu0  ;;  %v8218_v41 = vsel %vm7026_vm5, %v5621_v48, %v4561_v3  ;;  %v5542_v36 = vld [vmem:[%s6684_s9 + $0x3c] sm:$0xf]  ;;  %v8222_v52 = vpop.f32.mrf.mxu1  ;;  %v8227_v0 = vrot.slane %v3797_v55, 4  ;;  %v8233_v3 = vsel %vm7026_vm5, %v4563_v18, %v4564_v28  ;;  %v8235_v48 = vrot.slane %v3834_v15, 5  ;;  %v6496_v55 = vld [vmem:[%s9307_s1 + $0x1d0] sm:$0xff]  }
  0xf8   : > { %6223 = vmatprep.subr.bf16.mxu1 %v6488_v42  ;;  %9399 = vst [vmem:[#allocation9_spill] sm:$0xff] %v8222_v52  ;;  %v8245_v22 = vrot.slane %v3821_v40, 4  ;;  %v4571_v28 = vrot.slane %v8178_v63, 5  ;;  %v3832_v18 = vrot.slane %v3831_v54, 4  ;;  %v8249_v15 = vld [vmem:[%s6684_s9 + $0x38] sm:$0x1]  ;;  %v3845_v1 = vor.u32 %v3844_v11, %v3841_v47 }
  0xf9   : > { %6272 = vmatpush3.bf16.msra.mxu0 %v6489_v33  ;;  %v8229_v33 = vrot.slane %v3807_v21, 4  ;;  %v8240_v38 = vpop.f32.mrf.mxu0  ;;  %v5622_v21 = vrot.slane %v5606_v6, 9  ;;  %v3866_v30 = vshll.u32 %v5542_v36, 16  ;;  %v8253_v52 = vrot.slane %v3852_v61, 4  ;;  %v5607_v40 = vld [vmem:[%s6684_s9 + $0x30] sm:$0xe]  ;;  %v8261_v54 = vpop.f32.mrf.mxu1 }
  0xfa   : > { %6273 = vmatprep.subr.bf16.mxu0 %v6493_v23  ;;  %v3872_v6 = vshll.u32 %v8238_v37, 16  ;;  %v3876_v63 = vshrl.u32 %v8238_v37, 16  ;;  %9401 = vst [vmem:[#allocation8_spill] sm:$0xff] %v8261_v54  ;;  %v9402_v11 = vcombine.low %v7974_v31, %v7965_v19  ;;  %v6487_v61 = vld [vmem:[%s6684_s9 + $0x6c] sm:$0xff]   ;;  %v8294_v19 = vsel %vm7026_vm5, %v4570_v50, %v4571_v28  ;;  %v8312_v28 = vld [vmem:[%s6684_s9 + $0x44] sm:$0x1] }
  0xfb   : > { %6194 = vmatmul.mubr.bf16.gmra.mxu0 %v6483_v7  ;;  %6224 = vmatpush3.bf16.msra.mxu1 %v6488_v42  ;;  %v8251_v7 = vrot.slane %v3848_v39, 5  ;;  %v3863_v42 = vshrl.u32 %v5542_v36, 16  ;;  %v3803_v39 = vsel %vm6715_vm2, %v8227_v0, %v8173_v2  ;;  %v3813_v47 = vsel %vm6715_vm2, %v8229_v33, %v8211_v20  ;;  %v6490_v36 = vld [vmem:[%s6684_s9 + $0x78] sm:$0xff]   ;;  %v8305_v33 = vld [vmem:[%s6684_s9 + $0x4c] sm:$0xf]  ;;  %v8316_v54 = vpop.f32.mrf.mxu1 }
  0xfc   : > { %6197 = vmatprep.mubr.bf16.mxu0 %v6486_v62  ;;  %6225 = vmatprep.subr.bf16.mxu1 %v6492_v60  ;;  %v9400_v62 = vcombine.low %v7943_v10, %v7947_v59  ;;  %v4575_v59 = vrot.slane %v8188_v43, 5  ;;  %v3827_v2 = vsel %vm6715_vm2, %v8245_v22, %v8185_v45  ;;  %v8290_v20 = vsel %vm7026_vm5, %v5622_v21, %v4568_v51  ;;  %v5545_v43 = vld [vmem:[%s6684_s9 + $0x48] sm:$0xf]  ;;  %v5608_v14 = vld [vmem:[%s6684_s9 + $0x3c] sm:$0xe] }
  0xfd   : > { %6274 = vmatpush3.bf16.msra.mxu0 %v6493_v23  ;;  %v6501_v23 = vld [vmem:[%s9307_s1 + $0x208] sm:$0xff]   ;;  %v3858_v31 = vshll.u32 %v8249_v15, 16  ;;  %v3837_v22 = vsel %vm6715_vm2, %v3832_v18, %v8235_v48  ;;  %v5623_v45 = vrot.slane %v5607_v40, 9  ;;  %v3865_v0 = vrot.slane %v3863_v42, 4  ;;  %9404 = vst [vmem:[#allocation10_spill] sm:$0xff] %v8316_v54  ;;  %v6504_v42 = vld [vmem:[%s9307_s1 + $0x1c0] sm:$0xff]  }
  0xfe   : > { %6146 = vmatmul.mubr.bf16.gmra.mxu1 %v9400_v62  ;;  %6275 = vmatprep.subr.bf16.mxu0 %v6497_v49  ;;  %v8282_v62 = vpop.f32.mrf.mxu0  ;;  %v3868_v51 = vrot.slane %v3866_v30, 5  ;;  %v8307_v50 = vrot.slane %v3845_v1, 4  ;;  %v3855_v21 = vor.u32 %v8253_v52, %v8251_v7  ;;  %v3878_v10 = vrot.slane %v3876_v63, 4  ;;  %v6505_v30 = vld [vmem:[%s9307_s1 + $0x200] sm:$0xff]  }
  0xff   : > { %6149 = vmatprep.mubr.bf16.mxu1 %v9402_v11  ;;  %6226 = vmatpush3.bf16.msra.mxu1 %v6492_v60  ;;  %9403 = vst [vmem:[#allocation7_spill] sm:$0xff] %v8282_v62  ;;  %v6500_v60 = vld [vmem:[%s9307_s1 + $0x1c8] sm:$0xff]   ;;  %v8314_v11 = vrot.slane %v3872_v6, 5  ;;  %v4577_v48 = vrot.slane %v4575_v59, 4  ;;  %v3887_v1 = vshrl.u32 %v5545_v43, 16  ;;  %v3890_v18 = vshll.u32 %v5545_v43, 16 }
 0x100   : > { %6227 = vmatprep.subr.bf16.mxu1 %v6496_v55  ;;  %v8322_v52 = vpop.f32.mrf.mxu0  ;;  %v8327_v40 = vcombine.low %v3803_v39, %v3813_v47  ;;  %v3900_v63 = vshrl.u32 %v8305_v33, 16  ;;  %v8335_v43 = vrot.slane %v3858_v31, 5  ;;  %v3882_v54 = vshll.u32 %v8312_v28, 16  ;;  %v5548_v39 = vld [vmem:[%s6684_s9 + $0x54] sm:$0xf]  ;;  %v6491_v6 = vld [vmem:[%s6684_s9 + $0x84] sm:$0xff]  }
 0x101   : > { %6276 = vmatpush3.bf16.msra.mxu0 %v6497_v49  ;;  %v4578_v49 = vrot.slane %v8249_v15, 5  ;;  %9405 = vst [vmem:[#allocation11_spill] sm:$0xff] %v8322_v52  ;;  %v3896_v15 = vshll.u32 %v8305_v33, 16  ;;  %v4582_v31 = vrot.slane %v8238_v37, 5  ;;  %v9408_v37 = vcombine.low %v7998_v12, %v8002_v46  ;;  %v6494_v47 = vld [vmem:[%s6684_s9 + $0x90] sm:$0xff]  }
 0x102   : > { %6277 = vmatprep.subr.bf16.mxu0 %v6501_v23 }
 0x103   : > { %6198 = vmatmul.mubr.bf16.gmra.mxu0 %v6487_v61  ;;  %6228 = vmatpush3.bf16.msra.mxu1 %v6496_v55  ;;  %v8333_v61 = vcombine.low %v3827_v2, %v3837_v22  ;;  %v3869_v55 = vor.u32 %v3868_v51, %v3865_v0  ;;  %v3879_v2 = vor.u32 %v3878_v10, %v8314_v11  ;;  %v8351_v22 = vld [vmem:[%s6684_s9 + $0x58] sm:$0xf]  ;;  %v8358_v51 = vrot.slane %v3855_v21, 4 }
 0x104   : > { %6201 = vmatprep.mubr.bf16.mxu0 %v6490_v36  ;;  %6229 = vmatprep.subr.bf16.mxu1 %v6500_v60  ;;  %v8346_v36 = vsel %vm7026_vm5, %v5623_v45, %v4575_v59  ;;  %v9406_v0 = vcombine.low %v7981_v16, %v7986_v53  ;;  %v8362_v59 = vsel %vm7026_vm5, %v4577_v48, %v4578_v49  ;;  %v3889_v45 = vrot.slane %v3887_v1, 4  ;;  %v8369_v16 = vpop.f32.mrf.mxu0  ;;  %v5547_v1 = vld [vmem:[%s6684_s9 + $0x50] sm:$0x1] }
 0x105   : > { %6278 = vmatpush3.bf16.msra.mxu0 %v6501_v23  ;;  %v8356_v23 = vpop.f32.mrf.mxu1  ;;  %v3892_v10 = vrot.slane %v3890_v18, 5  ;;  %9409 = vst [vmem:[#allocation13_spill] sm:$0xff] %v8369_v16  ;;  %v5624_v53 = vrot.slane %v5608_v14, 9  ;;  %v3902_v21 = vrot.slane %v3900_v63, 4  ;;  %v3870_v48 = vrot.slane %v3869_v55, 4 }
 0x106   : > { %6150 = vmatmul.mubr.bf16.gmra.mxu1 %v9406_v0  ;;  %9407 = vst [vmem:[#allocation12_spill] sm:$0xff] %v8356_v23  ;;  %6279 = vmatprep.subr.bf16.mxu0 %v6505_v30  ;;  %v8371_v0 = vrot.slane %v3896_v15, 5  ;;  %v3911_v23 = vshrl.u32 %v5548_v39, 16  ;;  %v3884_v49 = vrot.slane %v3882_v54, 5  ;;  %v3914_v18 = vshll.u32 %v5548_v39, 16  ;;  %v8387_v39 = vpop.f32.mrf.mxu0 }
 0x107   : > { %6153 = vmatprep.mubr.bf16.mxu1 %v9408_v37  ;;  %6230 = vmatpush3.bf16.msra.mxu1 %v6500_v60  ;;  %v3920_v52 = vshll.u32 %v8351_v22, 16  ;;  %v3880_v12 = vrot.slane %v3879_v2, 4  ;;  %v4584_v46 = vrot.slane %v4582_v31, 4  ;;  %v4585_v37 = vrot.slane %v8312_v28, 5  ;;  %v8377_v60 = vpop.f32.mrf.mxu1  ;;  %v5551_v55 = vld [vmem:[%s6684_s9 + $0x60] sm:$0xf] }
 0x108   : > { %6231 = vmatprep.subr.bf16.mxu1 %v6504_v42  ;;  %v3924_v14 = vshrl.u32 %v8351_v22, 16  ;;  %9410 = vst [vmem:[#allocation14_spill] sm:$0xff] %v8377_v60  ;;  %v3861_v15 = vsel %vm6715_vm2, %v8358_v51, %v8335_v43  ;;  %v3893_v63 = vor.u32 %v3892_v10, %v3889_v45  ;;  %v3903_v28 = vor.u32 %v3902_v21, %v8371_v0  ;;  %v5609_v60 = vld [vmem:[%s6684_s9 + $0x48] sm:$0xe] }
 0x109   : > { %6280 = vmatpush3.bf16.msra.mxu0 %v6505_v30  ;;  %v4589_v30 = vrot.slane %v8305_v33, 5  ;;  %v3906_v2 = vshll.u32 %v5547_v1, 16  ;;  %v3913_v16 = vrot.slane %v3911_v23, 4  ;;  %v3916_v62 = vrot.slane %v3914_v18, 5  ;;  %v8412_v10 = vpop.f32.mrf.mxu1 }
 0x10a   : > { %v3875_v43 = vsel %vm6715_vm2, %v3870_v48, %v8314_v11  ;;  %v8396_v33 = vsel %vm7026_vm5, %v5624_v53, %v4582_v31  ;;  %v3885_v51 = vsel %vm6715_vm2, %v3880_v12, %v3884_v49  ;;  %v8404_v23 = vsel %vm7026_vm5, %v4584_v46, %v4585_v37  ;;  %9412 = vst [vmem:[#allocation15_spill] sm:$0xff] %v8412_v10  ;;  %v8415_v49 = vld [vmem:[%s6684_s9 + $0x64] sm:$0xf]  ;;  %v6495_v12 = vld [vmem:[%s6684_s9 + $0x9c] sm:$0xff]   ;;  %v8421_v46 = vpop.f32.mrf.mxu0 }
 0x10b   : > { %6202 = vmatmul.mubr.bf16.gmra.mxu0 %v6491_v6  ;;  %6232 = vmatpush3.bf16.msra.mxu1 %v6504_v42  ;;  %v8398_v6 = vrot.slane %v3920_v52, 5  ;;  %v3926_v42 = vrot.slane %v3924_v14, 4  ;;  %v3935_v45 = vshrl.u32 %v5551_v55, 16  ;;  %v3938_v11 = vshll.u32 %v5551_v55, 16  ;;  %v6498_v55 = vld [vmem:[%s6684_s9 + $0xa8] sm:$0xff]  }
 0x10c   : > { %6205 = vmatprep.mubr.bf16.mxu0 %v6494_v47  ;;  %v8407_v47 = vld [vmem:[%s6684_s9 + $0x5c] sm:$0x1]  ;;  %v9411_v31 = vcombine.low %v8014_v34, %v8023_v17  ;;  %v3894_v52 = vrot.slane %v3893_v63, 4  ;;  %v5625_v53 = vrot.slane %v5609_v60, 9  ;;  %v4591_v21 = vrot.slane %v4589_v30, 4 }
 0x10d   : > { %v4592_v48 = vrot.slane %v5547_v1, 5  ;;  %v9413_v18 = vcombine.low %v8040_v32, %v8044_v58  ;;  %v3904_v37 = vrot.slane %v3903_v28, 4  ;;  %v3908_v14 = vrot.slane %v3906_v2, 5  ;;  %v5610_v63 = vld [vmem:[%s6684_s9 + $0x54] sm:$0xe]  ;;  %v8439_v28 = vpop.f32.mrf.mxu1 }
 0x10e   : > { %6154 = vmatmul.mubr.bf16.gmra.mxu1 %v9411_v31  ;;  %v3917_v34 = vor.u32 %v3916_v62, %v3913_v16  ;;  %v4596_v17 = vrot.slane %v8351_v22, 5  ;;  %v3927_v60 = vor.u32 %v3926_v42, %v8398_v6  ;;  %v3930_v1 = vshll.u32 %v8407_v47, 16  ;;  %9415 = vst [vmem:[#allocation16_spill] sm:$0xff] %v8439_v28  ;;  %v5611_v62 = vld [vmem:[%s6684_s9 + $0x60] sm:$0xe] }
 0x10f   : > { %6157 = vmatprep.mubr.bf16.mxu1 %v9413_v18  ;;  %v3937_v31 = vrot.slane %v3935_v45, 4  ;;  %v3940_v54 = vrot.slane %v3938_v11, 5  ;;  %v9414_v32 = vsel %vm6715_vm2, %v8307_v50, %v8251_v7  ;;  %v3944_v22 = vshll.u32 %v8415_v49, 16 }
 0x110   : > { %v8433_v58 = vcombine.low %v9414_v32, %v3861_v15  ;;  %v3948_v16 = vshrl.u32 %v8415_v49, 16  ;;  %v8441_v2 = vcombine.low %v3875_v43, %v3885_v51  ;;  %v3899_v42 = vsel %vm6715_vm2, %v3894_v52, %v8371_v0  ;;  %v5554_v15 = vld [vmem:[%s6684_s9 + $0x6c] sm:$0xf]  ;;  %v8459_v32 = vld [vmem:[%s6684_s9 + $0x70] sm:$0xf] }
 0x111   : > { %v8448_v7 = vsel %vm7026_vm5, %v5625_v53, %v4589_v30  ;;  %v8452_v50 = vsel %vm7026_vm5, %v4591_v21, %v4592_v48  ;;  %v8455_v45 = vpop.f32.mrf.mxu0  ;;  %v3918_v43 = vrot.slane %v3917_v34, 4  ;;  %v5626_v51 = vrot.slane %v5610_v63, 9  ;;  %v5553_v53 = vld [vmem:[%s6684_s9 + $0x68] sm:$0x1] }
 0x112   : > { %9416 = vst [vmem:[#allocation17_spill] sm:$0xff] %v8455_v45  ;;  %v4598_v11 = vrot.slane %v4596_v17, 4  ;;  %v4599_v18 = vrot.slane %v8407_v47, 5  ;;  %v3909_v0 = vsel %vm6715_vm2, %v3904_v37, %v3908_v14  ;;  %v3928_v30 = vrot.slane %v3927_v60, 4  ;;  %v5613_v45 = vld [vmem:[%s6684_s9 + $0x78] sm:$0xe] }
 0x113   : > { %6206 = vmatmul.mubr.bf16.gmra.mxu0 %v6495_v12  ;;  %v3932_v52 = vrot.slane %v3930_v1, 5  ;;  %v3941_v21 = vor.u32 %v3940_v54, %v3937_v31  ;;  %v8464_v48 = vrot.slane %v3944_v22, 5  ;;  %v3950_v12 = vrot.slane %v3948_v16, 4  ;;  %v6499_v31 = vld [vmem:[%s6684_s9 + $0xb4] sm:$0xff]  }
 0x114   : > { %6209 = vmatprep.mubr.bf16.mxu0 %v6498_v55  ;;  %v3959_v34 = vshrl.u32 %v5554_v15, 16  ;;  %v3962_v63 = vshll.u32 %v5554_v15, 16  ;;  %v9417_v47 = vcombine.low %v8060_v5, %v8065_v25  ;;  %v4603_v14 = vrot.slane %v8415_v49, 5  ;;  %v8481_v5 = vpop.f32.mrf.mxu0 }
 0x115   : > { %v3968_v54 = vshll.u32 %v8459_v32, 16  ;;  %v3972_v60 = vshrl.u32 %v8459_v32, 16  ;;  %v9419_v1 = vcombine.low %v8078_v9, %v8072_v29  ;;  %9420 = vst [vmem:[#allocation19_spill] sm:$0xff] %v8481_v5  ;;  %v8483_v25 = vcombine.low %v3899_v42, %v3909_v0  ;;  %v5557_v29 = vld [vmem:[%s6684_s9 + $0x78] sm:$0xf]  ;;  %v6502_v9 = vld [vmem:[%s6684_s9 + $0xc0] sm:$0xff]  }
 0x116   : > { %6158 = vmatmul.mubr.bf16.gmra.mxu1 %v9417_v47  ;;  %v8470_v55 = vpop.f32.mrf.mxu1  ;;  %v3923_v22 = vsel %vm6715_vm2, %v3918_v43, %v8398_v6  ;;  %v8490_v49 = vsel %vm7026_vm5, %v5626_v51, %v4596_v17  ;;  %v8494_v16 = vsel %vm7026_vm5, %v4598_v11, %v4599_v18  ;;  %v3933_v15 = vsel %vm6715_vm2, %v3928_v30, %v3932_v52  ;;  %v8507_v43 = vld [vmem:[%s6684_s9 + $0x74] sm:$0x1]  ;;  %v8564_v5 = vld [vmem:[%s6684_s9 + $0x8c] sm:$0x1] }
 0x117   : > { %9418 = vst [vmem:[#allocation18_spill] sm:$0xff] %v8470_v55  ;;  %6161 = vmatprep.mubr.bf16.mxu1 %v9419_v1  ;;  %v8500_v47 = vrot.slane %v3941_v21, 4  ;;  %v3954_v42 = vshll.u32 %v5553_v53, 16  ;;  %v5627_v0 = vrot.slane %v5611_v62, 9  ;;  %v8503_v1 = vld [vmem:[%s6684_s9 + $0x7c] sm:$0xf]  ;;  %v3951_v6 = vor.u32 %v3950_v12, %v8464_v48  ;;  %v8513_v21 = vpop.f32.mrf.mxu0 }
 0x118   : > { %v4606_v17 = vrot.slane %v5553_v53, 5  ;;  %v3961_v51 = vrot.slane %v3959_v34, 4  ;;  %v3964_v11 = vrot.slane %v3962_v63, 5  ;;  %v8509_v18 = vpop.f32.mrf.mxu1  ;;  %v4605_v37 = vrot.slane %v4603_v14, 4  ;;  %9422 = vst [vmem:[#allocation21_spill] sm:$0xff] %v8513_v21 }
 0x119   : > { %9421 = vst [vmem:[#allocation20_spill] sm:$0xff] %v8509_v18  ;;  %v8511_v55 = vrot.slane %v3968_v54, 5  ;;  %v3974_v30 = vrot.slane %v3972_v60, 4  ;;  %v3983_v52 = vshrl.u32 %v5557_v29, 16  ;;  %v5612_v53 = vld [vmem:[%s6684_s9 + $0x6c] sm:$0xe]  ;;  %v8520_v18 = vcombine.low %v3923_v22, %v3933_v15 }
 0x11a   : > { %v3986_v12 = vshll.u32 %v5557_v29, 16  ;;  %v3992_v34 = vshll.u32 %v8503_v1, 16  ;;  %v3996_v63 = vshrl.u32 %v8503_v1, 16  ;;  %v8522_v54 = vrot.slane %v3954_v42, 5  ;;  %v5560_v62 = vld [vmem:[%s6684_s9 + $0x84] sm:$0xf]  ;;  %v8543_v42 = vpop.f32.mrf.mxu1 }
 0x11b   : > { %6210 = vmatmul.mubr.bf16.gmra.mxu0 %v6499_v31  ;;  %9423 = vst [vmem:[#allocation22_spill] sm:$0xff] %v8520_v18  ;;  %v8526_v60 = vsel %vm7026_vm5, %v5627_v0, %v4603_v14  ;;  %v3978_v31 = vshll.u32 %v8507_v43, 16  ;;  %v8534_v28 = vrot.slane %v3951_v6, 4  ;;  %v4610_v22 = vrot.slane %v8459_v32, 5  ;;  %v8538_v15 = vld [vmem:[%s6684_s9 + $0x88] sm:$0xf] }
 0x11c   : > { %6213 = vmatprep.mubr.bf16.mxu0 %v6502_v9  ;;  %v3965_v9 = vor.u32 %v3964_v11, %v3961_v51  ;;  %v9424_v14 = vcombine.low %v8087_v4, %v8091_v13  ;;  %9425 = vst [vmem:[#allocation23_spill] sm:$0xff] %v8543_v42  ;;  %v6503_v0 = vld [vmem:[%s6684_s9 + $0xcc] sm:$0xff]   ;;  %v8548_v10 = vsel %vm7026_vm5, %v4605_v37, %v4606_v17  ;;  %v5628_v6 = vrot.slane %v5612_v53, 9  ;;  %v8551_v11 = vpop.f32.mrf.mxu0  ;;  %v8557_v4 = vld [vmem:[%s6684_s9 + $0x80] sm:$0x1] }
 0x11d   : > { %v3975_v29 = vor.u32 %v3974_v30, %v8511_v55  ;;  %v3985_v51 = vrot.slane %v3983_v52, 4  ;;  %9426 = vst [vmem:[#allocation24_spill] sm:$0xff] %v8551_v11  ;;  %v9427_v32 = vcombine.low %v8122_v26, %v8126_v35  ;;  %v3988_v13 = vrot.slane %v3986_v12, 5 }
 0x11e   : > { %6162 = vmatmul.mubr.bf16.gmra.mxu1 %v9424_v14  ;;  %v8559_v14 = vrot.slane %v3992_v34, 5  ;;  %v3998_v42 = vrot.slane %v3996_v63, 4  ;;  %v4007_v21 = vshrl.u32 %v5560_v62, 16  ;;  %v3980_v37 = vrot.slane %v3978_v31, 5 }
 0x11f   : > { %6165 = vmatprep.mubr.bf16.mxu1 %v9427_v32  ;;  %v4613_v17 = vrot.slane %v8507_v43, 5  ;;  %v4010_v30 = vshll.u32 %v5560_v62, 16  ;;  %v4016_v52 = vshll.u32 %v8538_v15, 16  ;;  %v3966_v53 = vrot.slane %v3965_v9, 4  ;;  %v8567_v32 = vpop.f32.mrf.mxu1 }
 0x120   : > { %v4612_v11 = vrot.slane %v4610_v22, 4  ;;  %v4009_v26 = vrot.slane %v4007_v21, 4  ;;  %v4020_v35 = vshrl.u32 %v8538_v15, 16  ;;  %v3976_v12 = vrot.slane %v3975_v29, 4 }
 0x121   : > { %v4002_v34 = vshll.u32 %v8557_v4, 16  ;;  %v4012_v63 = vrot.slane %v4010_v30, 5  ;;  %v8570_v31 = vrot.slane %v4016_v52, 5  ;;  %v3989_v62 = vor.u32 %v3988_v13, %v3985_v51  ;;  %v5614_v52 = vld [vmem:[%s6684_s9 + $0x84] sm:$0xe] }
 0x122   : > { %v8572_v43 = vpop.f32.mrf.mxu0  ;;  %v3999_v9 = vor.u32 %v3998_v42, %v8559_v14  ;;  %v4617_v21 = vrot.slane %v8503_v1, 5  ;;  %v4022_v18 = vrot.slane %v4020_v35, 4  ;;  %v9428_v29 = vcombine.low %v8218_v41, %v8233_v3 }
 0x123   : > { %6214 = vmatmul.mubr.bf16.gmra.mxu0 %v6503_v0  ;;  %v3957_v30 = vsel %vm6715_vm2, %v8534_v28, %v8522_v54  ;;  %v8588_v51 = vsel %vm7026_vm5, %v5628_v6, %v4610_v22  ;;  %v4026_v42 = vshll.u32 %v8564_v5, 16  ;;  %v3971_v41 = vsel %vm6715_vm2, %v3966_v53, %v8511_v55  ;;  %v5563_v54 = vld [vmem:[%s6684_s9 + $0x90] sm:$0xf] }
 0x124   : > { %6281 = vmatprep.mubr.bf16.mxu0 %v9428_v29  ;;  %v8591_v1 = vpop.f32.mrf.mxu0  ;;  %v4013_v3 = vor.u32 %v4012_v63, %v4009_v26  ;;  %v4023_v13 = vor.u32 %v4022_v18, %v8570_v31  ;;  %v4624_v28 = vrot.slane %v8538_v15, 5  ;;  %v9430_v22 = vcombine.low %v8135_v44, %v8140_v8 }
 0x125   : > { %v3981_v6 = vsel %vm6715_vm2, %v3976_v12, %v3980_v37  ;;  %v8609_v55 = vsel %vm7026_vm5, %v4612_v11, %v4613_v17  ;;  %v4004_v53 = vrot.slane %v4002_v34, 5  ;;  %v5629_v18 = vrot.slane %v5613_v45, 9  ;;  %v8618_v12 = vld [vmem:[%s6684_s9 + $0x94] sm:$0xf] }
 0x126   : > { %v8600_v35 = vpop.f32.mrf.mxu1  ;;  %6166 = vmatmul.mubr.bf16.gmra.mxu1 %v9430_v22  ;;  %v8611_v26 = vpop.f32.mrf.mxu0  ;;  %v3990_v15 = vrot.slane %v3989_v62, 4  ;;  %v4000_v63 = vrot.slane %v3999_v9, 4  ;;  %v4619_v29 = vrot.slane %v4617_v21, 4  ;;  %v4620_v0 = vrot.slane %v8557_v4, 5 }
 0x127   : > { %9429 = vst [vmem:[#allocation25_spill] sm:$0xff] %v8600_v35  ;;  %6233 = vmatprep.mubr.bf16.mxu1 %v8327_v40  ;;  %v4028_v8 = vrot.slane %v4026_v42, 5  ;;  %v5630_v37 = vrot.slane %v5614_v52, 9  ;;  %v4031_v11 = vshrl.u32 %v5563_v54, 16  ;;  %v4034_v17 = vshll.u32 %v5563_v54, 16 }
 0x128   : > { %v8615_v44 = vpop.f32.mrf.mxu1  ;;  %v8620_v34 = vpop.f32.mrf.mxu0  ;;  %v4014_v45 = vrot.slane %v4013_v3, 4  ;;  %v4024_v22 = vrot.slane %v4023_v13, 4  ;;  %v4626_v40 = vrot.slane %v4624_v28, 4  ;;  %v4627_v62 = vrot.slane %v8564_v5, 5  ;;  %v8641_v54 = vld [vmem:[%s6684_s9 + $0x98] sm:$0x1] }
 0x129   : > { %9431 = vst [vmem:[#allocation26_spill] sm:$0xff] %v8615_v44  ;;  %v9433_v4 = vsel %vm6715_vm2, %v8500_v47, %v8464_v48  ;;  %v8632_v52 = vcombine.low %v3971_v41, %v3981_v6  ;;  %v8638_v13 = vsel %vm7026_vm5, %v5629_v18, %v4617_v21  ;;  %v3995_v48 = vsel %vm6715_vm2, %v3990_v15, %v8559_v14  ;;  %v5566_v41 = vld [vmem:[%s6684_s9 + $0x9c] sm:$0xf]  ;;  %v8658_v6 = vld [vmem:[%s6684_s9 + $0xa0] sm:$0xf] }
 0x12a   : > { %v8623_v9 = vpop.f32.mrf.mxu1  ;;  %v8630_v42 = vcombine.low %v9433_v4, %v3957_v30  ;;  %v5995_v5 = vpop.f32.mrf.mxu0  ;;  %v4005_v47 = vsel %vm6715_vm2, %v4000_v63, %v4004_v53  ;;  %v8653_v30 = vsel %vm7026_vm5, %v4619_v29, %v4620_v0  ;;  %v4040_v21 = vshll.u32 %v8618_v12, 16  ;;  %v8745_v35 = vld [vmem:[%s6684_s9 + $0xb0] sm:$0x1] }
 0x12b   : > { %9432 = vst [vmem:[#allocation27_spill] sm:$0xff] %v8623_v9  ;;  %v9434_v9 = vcombine.low %v8290_v20, %v8294_v19  ;;  %v9436_v20 = vcombine.low %v8346_v36, %v8362_v59  ;;  %v8667_v19 = vsel %vm7026_vm5, %v5630_v37, %v4624_v28  ;;  %v4033_v14 = vrot.slane %v4031_v11, 4  ;;  %v8682_v37 = vld [vmem:[%s6684_s9 + $0x90] sm:$0xe] }
 0x12c   : > { %v8660_v18 = vpop.f32.mrf.mxu1  ;;  %v4036_v53 = vrot.slane %v4034_v17, 5  ;;  %v4044_v0 = vshrl.u32 %v8618_v12, 16  ;;  %v1555_v15 = vpop.f32.mrf.mxu0  ;;  %v4019_v63 = vsel %vm6715_vm2, %v4014_v45, %v8570_v31  ;;  %v4029_v29 = vsel %vm6715_vm2, %v4024_v22, %v4028_v8 }
 0x12d   : > { %6282 = vmatmul.mubr.bf16.vlgmr.msra.gmra.mxu0 %v9434_v9  ;;  %9435 = vst [vmem:[#allocation28_spill] sm:$0xff] %v8660_v18  ;;  %v8677_v36 = vsel %vm7026_vm5, %v4626_v40, %v4627_v62  ;;  %v4050_v59 = vshll.u32 %v8641_v54, 16  ;;  %v4055_v11 = vshrl.u32 %v5566_v41, 16  ;;  %v4058_v17 = vshll.u32 %v5566_v41, 16 }
 0x12e   : > { %6285 = vmatprep.mubr.bf16.mxu0 %v9436_v20  ;;  %v5947_v28 = vpop.f32.mrf.mxu1  ;;  %6234 = vmatmul.mubr.bf16.vlgmr.msra.gmra.mxu1 %v8333_v61  ;;  %v4064_v9 = vshll.u32 %v8658_v6, 16  ;;  %v4068_v31 = vshrl.u32 %v8658_v6, 16  ;;  %v5996_v45 = vpop.f32.mrf.mxu0  ;;  %v8688_v22 = vcombine.low %v3995_v48, %v4005_v47  ;;  %v8692_v40 = vrot.slane %v4040_v21, 5  ;;  %v8706_v61 = vld [vmem:[%s6684_s9 + $0xa4] sm:$0x1] }
 0x12f   : > { %v1112_v8 = vadd.f32 %v5947_v28, %v8183_v24  ;;  %6237 = vmatprep.mubr.bf16.mxu1 %v8433_v58  ;;  %v8694_v4 = vcombine.low %v4019_v63, %v4029_v29  ;;  %v4037_v20 = vor.u32 %v4036_v53, %v4033_v14  ;;  %v4046_v24 = vrot.slane %v4044_v0, 4  ;;  %v5569_v28 = vld [vmem:[%s6684_s9 + $0xa8] sm:$0xf]  ;;  %v8711_v14 = vld [vmem:[%s6684_s9 + $0xac] sm:$0xf] }
 0x130   : > { %v1103_v62 = vpop.f32.mrf.mxu1  ;;  %v1558_v48 = vpop.f32.mrf.mxu0  ;;  %v8702_v47 = vrot.slane %v4050_v59, 5  ;;  %v5631_v21 = vrot.slane %v8682_v37, 9  ;;  %v4057_v29 = vrot.slane %v4055_v11, 4  ;;  %v4060_v18 = vrot.slane %v4058_v17, 5 }
 0x131   : > { %v8699_v3 = vadd.f32 %v5995_v5, %v1112_v8  ;;  %v1104_v58 = vadd.f32 %v1103_v62, %v8204_v57  ;;  %v8708_v44 = vrot.slane %v4064_v9, 5  ;;  %v4070_v41 = vrot.slane %v4068_v31, 4  ;;  %v9442_v62 = vld [vmem:[#allocation7_spill] sm:$0xff] }
 0x132   : > { %v5948_v63 = vpop.f32.mrf.mxu1  ;;  %v5999_v5 = vpop.f32.mrf.mxu0  ;;  %v9439_v0 = vcombine.low %v8396_v33, %v8404_v23  ;;  %v4079_v59 = vshrl.u32 %v5569_v28, 16  ;;  %v4082_v37 = vshll.u32 %v5569_v28, 16  ;;  %v9440_v11 = vcombine.low %v8448_v7, %v8452_v50 }
 0x133   : > { %9437 = vst [vmem:[#allocation29_spill] sm:$0xff] %v8699_v3  ;;  %v8713_v53 = vadd.f32 %v1555_v15, %v1104_v58  ;;  %v1115_v57 = vadd.f32 %v5948_v63, %v8240_v38  ;;  %v8722_v17 = vrot.slane %v4037_v20, 4  ;;  %v4047_v15 = vor.u32 %v4046_v24, %v8692_v40  ;;  %v5616_v58 = vld [vmem:[%s6684_s9 + $0x9c] sm:$0xe] }
 0x134   : > { %v1106_v8 = vpop.f32.mrf.mxu1  ;;  %v4631_v9 = vrot.slane %v8618_v12, 5  ;;  %v4074_v38 = vshll.u32 %v8706_v61, 16  ;;  %v1571_v23 = vpop.f32.mrf.mxu0  ;;  %v4634_v28 = vrot.slane %v8641_v54, 5  ;;  %v4088_v63 = vshll.u32 %v8711_v14, 16 }
 0x135   : > { %9438 = vst [vmem:[#allocation30_spill] sm:$0xff] %v8713_v53  ;;  %6286 = vmatmul.mubr.bf16.gmra.mxu0 %v9439_v0  ;;  %v8727_v31 = vadd.f32 %v5996_v45, %v1115_v57  ;;  %v1107_v33 = vadd.f32 %v1106_v8, %v9442_v62  ;;  %v4061_v50 = vor.u32 %v4060_v18, %v4057_v29  ;;  %v4638_v12 = vrot.slane %v8658_v6, 5  ;;  %v9443_v57 = vld [vmem:[#allocation11_spill] sm:$0xff]  ;;  %v9444_v6 = vld [vmem:[#allocation13_spill] sm:$0xff] }
 0x136   : > { %6289 = vmatprep.mubr.bf16.mxu0 %v9440_v11  ;;  %v5951_v7 = vpop.f32.mrf.mxu1  ;;  %6238 = vmatmul.mubr.bf16.gmra.mxu1 %v8441_v2  ;;  %v4071_v20 = vor.u32 %v4070_v41, %v8708_v44  ;;  %v4092_v45 = vshrl.u32 %v8711_v14, 16  ;;  %v6000_v8 = vpop.f32.mrf.mxu0  ;;  %v4081_v54 = vrot.slane %v4079_v59, 4  ;;  %v4084_v11 = vrot.slane %v4082_v37, 5 }
 0x137   : > { %9441 = vst [vmem:[#allocation31_spill] sm:$0xff] %v8727_v31  ;;  %v8737_v24 = vadd.f32 %v1558_v48, %v1107_v33  ;;  %v1128_v0 = vadd.f32 %v5951_v7, %v9443_v57  ;;  %6241 = vmatprep.mubr.bf16.mxu1 %v8483_v25  ;;  %v4048_v31 = vrot.slane %v4047_v15, 4  ;;  %v4633_v2 = vrot.slane %v4631_v9, 4 }
 0x138   : > { %v1119_v62 = vpop.f32.mrf.mxu1  ;;  %v4076_v18 = vrot.slane %v4074_v38, 5  ;;  %v5632_v29 = vrot.slane %v5616_v58, 9  ;;  %v1574_v3 = vpop.f32.mrf.mxu0  ;;  %v8747_v48 = vrot.slane %v4088_v63, 5  ;;  %v4094_v33 = vrot.slane %v4092_v45, 4 }
 0x139   : > { %v8741_v41 = vadd.f32 %v5999_v5, %v1128_v0  ;;  %v1120_v53 = vadd.f32 %v1119_v62, %v9444_v6  ;;  %v4062_v57 = vrot.slane %v4061_v50, 4  ;;  %v4072_v25 = vrot.slane %v4071_v20, 4 }
 0x13a   : > { %v5952_v7 = vpop.f32.mrf.mxu1  ;;  %v4640_v59 = vrot.slane %v4638_v12, 4  ;;  %v4641_v37 = vrot.slane %v8706_v61, 5  ;;  %v6003_v38 = vpop.f32.mrf.mxu0  ;;  %v9445_v58 = vcombine.low %v8490_v49, %v8494_v16  ;;  %v8758_v63 = vsel %vm7026_vm5, %v5631_v21, %v4631_v9  ;;  %v5617_v21 = vld [vmem:[%s6684_s9 + $0xa8] sm:$0xe] }
 0x13b   : > { %v8750_v15 = vadd.f32 %v1571_v23, %v1120_v53  ;;  %v1131_v5 = vadd.f32 %v5952_v7, %v8387_v39  ;;  %v4085_v50 = vor.u32 %v4084_v11, %v4081_v54  ;;  %v9446_v20 = vcombine.low %v8526_v60, %v8548_v10 }
 0x13c   : > { %v1122_v45 = vpop.f32.mrf.mxu1  ;;  %v4043_v39 = vsel %vm6715_vm2, %v8722_v17, %v8692_v40  ;;  %v4053_v49 = vsel %vm6715_vm2, %v4048_v31, %v8702_v47  ;;  %v8772_v16 = vsel %vm7026_vm5, %v4633_v2, %v4634_v28  ;;  %v4098_v61 = vshll.u32 %v8745_v35, 16  ;;  %v1587_v60 = vpop.f32.mrf.mxu0  ;;  %v5572_v17 = vld [vmem:[%s6684_s9 + $0xb4] sm:$0xf]  ;;  %v9447_v47 = vld [vmem:[#allocation22_spill] sm:$0xff]  ;;  %v8801_v2 = vld [vmem:[%s6684_s9 + $0xb8] sm:$0xf] }
 0x13d   : > { %6290 = vmatmul.mubr.bf16.gmra.mxu0 %v9445_v58  ;;  %v8776_v53 = vadd.f32 %v6000_v8, %v1131_v5  ;;  %v1123_v10 = vadd.f32 %v1122_v45, %v8421_v46  ;;  %v4095_v9 = vor.u32 %v4094_v33, %v8747_v48  ;;  %v4645_v40 = vrot.slane %v8711_v14, 5  ;;  %v9448_v8 = vld [vmem:[#allocation17_spill] sm:$0xff] }
 0x13e   : > { %6293 = vmatprep.mubr.bf16.mxu0 %v9446_v20  ;;  %v5955_v23 = vpop.f32.mrf.mxu1  ;;  %6242 = vmatmul.mubr.bf16.gmra.mxu1 %v9447_v47  ;;  %v4067_v31 = vsel %vm6715_vm2, %v4062_v57, %v8708_v44  ;;  %v4077_v28 = vsel %vm6715_vm2, %v4072_v25, %v4076_v18  ;;  %v8790_v46 = vsel %vm7026_vm5, %v5632_v29, %v4638_v12  ;;  %v6004_v11 = vpop.f32.mrf.mxu0  ;;  %v4086_v62 = vrot.slane %v4085_v50, 4  ;;  %v9449_v57 = vld [vmem:[#allocation19_spill] sm:$0xff]  ;;  %v9453_v47 = vld [vmem:[#allocation24_spill] sm:$0xff] }
 0x13f   : > { %v8794_v0 = vsel %vm7026_vm5, %v4640_v59, %v4641_v37  ;;  %v8796_v14 = vadd.f32 %v1574_v3, %v1123_v10  ;;  %v1144_v54 = vadd.f32 %v5955_v23, %v9448_v8  ;;  %6245 = vmatprep.mubr.bf16.mxu1 %v8630_v42  ;;  %v5633_v44 = vrot.slane %v5617_v21, 9 }
 0x140   : > { %v1135_v18 = vpop.f32.mrf.mxu1  ;;  %v4100_v6 = vrot.slane %v4098_v61, 5  ;;  %v4648_v12 = vrot.slane %v8745_v35, 5  ;;  %v4103_v29 = vshrl.u32 %v5572_v17, 16  ;;  %v4106_v33 = vshll.u32 %v5572_v17, 16  ;;  %v1590_v25 = vpop.f32.mrf.mxu0 }
 0x141   : > { %v8804_v7 = vadd.f32 %v6003_v38, %v1144_v54  ;;  %v1136_v3 = vadd.f32 %v1135_v18, %v9449_v57  ;;  %v4096_v59 = vrot.slane %v4095_v9, 4  ;;  %v4647_v37 = vrot.slane %v4645_v40, 4  ;;  %v9450_v38 = vld [vmem:[#allocation21_spill] sm:$0xff] }
 0x142   : > { %v5956_v42 = vpop.f32.mrf.mxu1  ;;  %v8807_v5 = vcombine.low %v4043_v39, %v4053_v49  ;;  %v5647_v58 = vcombine.low %v8758_v63, %v8772_v16  ;;  %v8811_v50 = vcombine.low %v4067_v31, %v4077_v28  ;;  %v4112_v35 = vshll.u32 %v8801_v2, 16  ;;  %v6007_v61 = vpop.f32.mrf.mxu0  ;;  %v5575_v49 = vld [vmem:[%s6684_s9 + $0xc0] sm:$0xf]  ;;  %v8825_v16 = vld [vmem:[%s6684_s9 + $0xc4] sm:$0xf] }
 0x143   : > { %v8814_v45 = vadd.f32 %v1587_v60, %v1136_v3  ;;  %v1147_v20 = vadd.f32 %v5956_v42, %v9450_v38  ;;  %v9451_v21 = vcombine.low %v8588_v51, %v8609_v55  ;;  %v5648_v39 = vcombine.low %v8790_v46, %v8794_v0  ;;  %v9458_v46 = vld [vmem:[#allocation10_spill] sm:$0xff] }
 0x144   : > { %v4116_v63 = vshrl.u32 %v8801_v2, 16  ;;  %v1138_v10 = vpop.f32.mrf.mxu1  ;;  %v9452_v60 = vcombine.low %v8638_v13, %v8653_v30  ;;  %v4091_v51 = vsel %vm6715_vm2, %v4086_v62, %v8747_v48  ;;  %v8835_v55 = vsel %vm7026_vm5, %v5633_v44, %v4645_v40  ;;  %v1603_v28 = vpop.f32.mrf.mxu0  ;;  %v8847_v30 = vld [vmem:[%s6684_s9 + $0xbc] sm:$0x1]  ;;  %v5618_v48 = vld [vmem:[%s6684_s9 + $0xb4] sm:$0xe] }
 0x145   : > { %6294 = vmatmul.mubr.bf16.gmra.mxu0 %v9451_v21  ;;  %v4105_v9 = vrot.slane %v4103_v29, 4  ;;  %v4108_v17 = vrot.slane %v4106_v33, 5  ;;  %v8837_v23 = vadd.f32 %v6004_v11, %v1147_v20  ;;  %v1139_v31 = vadd.f32 %v1138_v10, %v9453_v47  ;;  %v8869_v20 = vld [vmem:[%s6684_s9 + $0xc8] sm:$0x1] }
 0x146   : > { %6297 = vmatprep.mubr.bf16.mxu0 %v9452_v60  ;;  %v4101_v8 = vsel %vm6715_vm2, %v4096_v59, %v4100_v6  ;;  %v8844_v13 = vsel %vm7026_vm5, %v4647_v37, %v4648_v12  ;;  %v5959_v54 = vpop.f32.mrf.mxu1  ;;  %6246 = vmatmul.mubr.bf16.gmra.mxu1 %v8632_v52  ;;  %v8851_v40 = vrot.slane %v4112_v35, 5  ;;  %v4127_v11 = vshrl.u32 %v5575_v49, 16  ;;  %v6008_v29 = vpop.f32.mrf.mxu0 }
 0x147   : > { %v4130_v62 = vshll.u32 %v5575_v49, 16  ;;  %v4136_v44 = vshll.u32 %v8825_v16, 16  ;;  %v8854_v18 = vadd.f32 %v1590_v25, %v1139_v31  ;;  %v1160_v6 = vadd.f32 %v5959_v54, %v8572_v43  ;;  %6249 = vmatprep.mubr.bf16.mxu1 %v8688_v22 }
 0x148   : > { %v4118_v12 = vrot.slane %v4116_v63, 4  ;;  %v4140_v33 = vshrl.u32 %v8825_v16, 16  ;;  %v1151_v57 = vpop.f32.mrf.mxu1  ;;  %v4109_v3 = vor.u32 %v4108_v17, %v4105_v9  ;;  %v4122_v52 = vshll.u32 %v8847_v30, 16  ;;  %v1606_v43 = vpop.f32.mrf.mxu0  ;;  %v5578_v9 = vld [vmem:[%s6684_s9 + $0xcc] sm:$0xf] }
 0x149   : > { %v5634_v59 = vrot.slane %v5618_v48, 9  ;;  %v4652_v37 = vrot.slane %v8801_v2, 5  ;;  %v8861_v42 = vadd.f32 %v6007_v61, %v1160_v6  ;;  %v1152_v25 = vadd.f32 %v1151_v57, %v8591_v1  ;;  %v5619_v48 = vld [vmem:[%s6684_s9 + $0xc0] sm:$0xe] }
 0x14a   : > { %v8864_v35 = vcombine.low %v4091_v51, %v4101_v8  ;;  %v5649_v22 = vcombine.low %v8835_v55, %v8844_v13  ;;  %v5960_v38 = vpop.f32.mrf.mxu1  ;;  %v4129_v21 = vrot.slane %v4127_v11, 4  ;;  %v4132_v63 = vrot.slane %v4130_v62, 5  ;;  %v6011_v10 = vpop.f32.mrf.mxu0  ;;  %v8891_v8 = vld [vmem:[%s6684_s9 + $0xd0] sm:$0xf] }
 0x14b   : > { %v8871_v49 = vrot.slane %v4136_v44, 5  ;;  %v4142_v2 = vrot.slane %v4140_v33, 4  ;;  %v8873_v61 = vadd.f32 %v1603_v28, %v1152_v25  ;;  %v1163_v1 = vadd.f32 %v5960_v38, %v8611_v26 }
 0x14c   : > { %v9454_v60 = vcombine.low %v8667_v19, %v8677_v36  ;;  %v4119_v51 = vor.u32 %v4118_v12, %v8851_v40  ;;  %v4655_v55 = vrot.slane %v8847_v30, 5  ;;  %v1154_v17 = vpop.f32.mrf.mxu1  ;;  %v8882_v47 = vrot.slane %v4109_v3, 4  ;;  %v1619_v13 = vpop.f32.mrf.mxu0 }
 0x14d   : > { %v8884_v31 = vrot.slane %v4122_v52, 5  ;;  %v8888_v26 = vsel %vm7026_vm5, %v5634_v59, %v4652_v37  ;;  %v4654_v28 = vrot.slane %v4652_v37, 4  ;;  %v8893_v19 = vadd.f32 %v6008_v29, %v1163_v1  ;;  %v9455_v29 = vld [vmem:[#allocation6_spill] sm:$0xff] }
 0x14e   : > { %6298 = vmatmul.mubr.bf16.gmra.mxu0 %v9454_v60  ;;  %v1155_v36 = vadd.f32 %v1154_v17, %v8620_v34  ;;  %v4146_v30 = vshll.u32 %v8869_v20, 16  ;;  %v5963_v54 = vpop.f32.mrf.mxu1  ;;  %6250 = vmatmul.mubr.bf16.gmra.mxu1 %v8694_v4  ;;  %v4133_v11 = vor.u32 %v4132_v63, %v4129_v21  ;;  %v4143_v62 = vor.u32 %v4142_v2, %v8871_v49  ;;  %v6012_v57 = vpop.f32.mrf.mxu0 }
 0x14f   : > { %6301 = vmatprep.mubr.bf16.mxu0 %v5647_v58  ;;  %v4659_v58 = vrot.slane %v8825_v16, 5  ;;  %v4151_v44 = vshrl.u32 %v5578_v9, 16  ;;  %v4154_v6 = vshll.u32 %v5578_v9, 16  ;;  %v1176_v33 = vadd.f32 %v5963_v54, %v9455_v29  ;;  %6253 = vmatprep.mubr.bf16.mxu1 %v8807_v5 }
 0x150   : > { %v8901_v12 = vadd.f32 %v1606_v43, %v1155_v36  ;;  %v4160_v34 = vshll.u32 %v8891_v8, 16  ;;  %v4164_v3 = vshrl.u32 %v8891_v8, 16  ;;  %v1167_v16 = vpop.f32.mrf.mxu1  ;;  %v4120_v52 = vrot.slane %v4119_v51, 4  ;;  %v9456_v43 = vld [vmem:[#allocation9_spill] sm:$0xff]  ;;  %v1622_v21 = vpop.f32.mrf.mxu0  ;;  %v9457_v36 = vld [vmem:[#allocation8_spill] sm:$0xff] }
 0x151   : > { %v4656_v4 = vsel %vm7026_vm5, %v4654_v28, %v4655_v55  ;;  %v5635_v59 = vrot.slane %v5619_v48, 9  ;;  %v4662_v37 = vrot.slane %v8869_v20, 5  ;;  %v8910_v25 = vadd.f32 %v6011_v10, %v1176_v33  ;;  %v5580_v20 = vld [vmem:[%s6684_s9 + $0xd4] sm:$0x1] }
 0x152   : > { %v1168_v38 = vadd.f32 %v1167_v16, %v9456_v43  ;;  %v4148_v63 = vrot.slane %v4146_v30, 5  ;;  %v4661_v5 = vrot.slane %v4659_v58, 4  ;;  %v5964_v2 = vpop.f32.mrf.mxu1  ;;  %v4134_v1 = vrot.slane %v4133_v11, 4 }
 0x153   : > { %v4144_v60 = vrot.slane %v4143_v62, 4  ;;  %v4153_v9 = vrot.slane %v4151_v44, 4  ;;  %v4156_v17 = vrot.slane %v4154_v6, 5  ;;  %v1179_v55 = vadd.f32 %v5964_v2, %v9457_v36  ;;  %v6015_v28 = vpop.f32.mrf.mxu0  ;;  %v5620_v6 = vld [vmem:[%s6684_s9 + $0xcc] sm:$0xe] }
 0x154   : > { %v8913_v51 = vadd.f32 %v1619_v13, %v1168_v38  ;;  %v8920_v10 = vrot.slane %v4160_v34, 5  ;;  %v4166_v30 = vrot.slane %v4164_v3, 4  ;;  %v1170_v48 = vpop.f32.mrf.mxu1  ;;  %v4115_v13 = vsel %vm6715_vm2, %v8882_v47, %v8851_v40 }
 0x155   : > { %v4125_v54 = vsel %vm6715_vm2, %v4120_v52, %v8884_v31  ;;  %v4666_v11 = vrot.slane %v8891_v8, 5  ;;  %v8930_v62 = vadd.f32 %v6012_v57, %v1179_v55  ;;  %v1171_v0 = vadd.f32 %v1170_v48, %v9458_v46  ;;  %v9459_v57 = vld [vmem:[#allocation12_spill] sm:$0xff] }
 0x156   : > { %6302 = vmatmul.mubr.bf16.gmra.mxu0 %v5648_v39  ;;  %v1635_v39 = vpop.f32.mrf.mxu0  ;;  %v4660_v44 = vsel %vm7026_vm5, %v5635_v59, %v4659_v58  ;;  %v5967_v29 = vpop.f32.mrf.mxu1  ;;  %6254 = vmatmul.mubr.bf16.gmra.mxu1 %v8811_v50  ;;  %v5650_v40 = vcombine.low %v8888_v26, %v4656_v4  ;;  %v4139_v47 = vsel %vm6715_vm2, %v4134_v1, %v8871_v49  ;;  %v4170_v8 = vshll.u32 %v5580_v20, 16  ;;  %v9462_v48 = vld [vmem:[#allocation16_spill] sm:$0xff] }
 0x157   : > { %6305 = vmatprep.mubr.bf16.mxu0 %v5649_v22  ;;  %v4663_v22 = vsel %vm7026_vm5, %v4661_v5, %v4662_v37  ;;  %v4157_v31 = vor.u32 %v4156_v17, %v4153_v9  ;;  %v8943_v33 = vadd.f32 %v1622_v21, %v1171_v0  ;;  %v1192_v34 = vadd.f32 %v5967_v29, %v9459_v57  ;;  %v9460_v37 = vld [vmem:[#allocation14_spill] sm:$0xff]  ;;  %v9461_v9 = vld [vmem:[#allocation15_spill] sm:$0xff] }
 0x158   : > { %v6016_v58 = vpop.f32.mrf.mxu0  ;;  %6257 = vmatprep.mubr.bf16.mxu1 %v8864_v35  ;;  %v4149_v3 = vsel %vm6715_vm2, %v4144_v60, %v4148_v63  ;;  %v4167_v50 = vor.u32 %v4166_v30, %v8920_v10  ;;  %v1183_v16 = vpop.f32.mrf.mxu1  ;;  %v5651_v26 = vcombine.low %v4660_v44, %v4663_v22  ;;  %v5636_v52 = vrot.slane %v5620_v6, 9  ;;  %v9463_v44 = vld [vmem:[#allocation18_spill] sm:$0xff] }
 0x159   : > { %v4668_v4 = vrot.slane %v4666_v11, 4  ;;  %v4669_v59 = vrot.slane %v5580_v20, 5  ;;  %v8950_v49 = vadd.f32 %v6015_v28, %v1192_v34  ;;  %v1184_v43 = vadd.f32 %v1183_v16, %v9460_v37  ;;  %v9466_v37 = vld [vmem:[#allocation25_spill] sm:$0xff] }
 0x15a   : > { %v1638_v38 = vpop.f32.mrf.mxu0  ;;  %v5968_v21 = vpop.f32.mrf.mxu1  ;;  %v5594_v5 = vcombine.low %v4115_v13, %v4125_v54  ;;  %v5595_v2 = vcombine.low %v4139_v47, %v4149_v3  ;;  %v4158_v1 = vrot.slane %v4157_v31, 4  ;;  %v4168_v17 = vrot.slane %v4167_v50, 4  ;;  %v9464_v47 = vld [vmem:[#allocation20_spill] sm:$0xff] }
 0x15b   : > { %v8953_v35 = vadd.f32 %v1635_v39, %v1184_v43  ;;  %v1195_v63 = vadd.f32 %v5968_v21, %v9461_v9  ;;  %v4172_v36 = vrot.slane %v4170_v8, 5  ;;  %v4667_v28 = vsel %vm7026_vm5, %v5636_v52, %v4666_v11 }
 0x15c   : > { %v6019_v60 = vpop.f32.mrf.mxu0  ;;  %v1186_v55 = vpop.f32.mrf.mxu1  ;;  %v4670_v20 = vsel %vm7026_vm5, %v4668_v4, %v4669_v59  ;;  %v4163_v0 = vsel %vm6715_vm2, %v4158_v1, %v8920_v10  ;;  %v9465_v10 = vld [vmem:[#allocation23_spill] sm:$0xff] }
 0x15d   : > { %v8960_v30 = vadd.f32 %v6016_v58, %v1195_v63  ;;  %v1187_v13 = vadd.f32 %v1186_v55, %v9462_v48  ;;  %v4173_v56 = vsel %vm6715_vm2, %v4168_v17, %v4172_v36  ;;  %v5652_v11 = vcombine.low %v4667_v28, %v4670_v20  ;;  %v9468_v17 = vld [vmem:[#allocation27_spill] sm:$0xff]  ;;  %v9469_v20 = vld [vmem:[#allocation28_spill] sm:$0xff] }
 0x15e   : > { %6306 = vmatmul.mubr.bf16.gmra.mxu0 %v5650_v40  ;;  %v1651_v54 = vpop.f32.mrf.mxu0  ;;  %v5971_v46 = vpop.f32.mrf.mxu1  ;;  %6258 = vmatmul.mubr.bf16.gmra.mxu1 %v5594_v5  ;;  %v5596_v34 = vcombine.low %v4163_v0, %v4173_v56  ;;  %v9470_v0 = vld [vmem:[#allocation29_spill] sm:$0xff] }
 0x15f   : > { %6309 = vmatprep.mubr.bf16.mxu0 %v5651_v26  ;;  %v8966_v39 = vadd.f32 %v1638_v38, %v1187_v13  ;;  %v1208_v22 = vadd.f32 %v5971_v46, %v9463_v44  ;;  %6261 = vmatprep.mubr.bf16.mxu1 %v5595_v2  ;;  %v9467_v2 = vld [vmem:[#allocation26_spill] sm:$0xff] }
 0x160   : > { %v6020_v6 = vpop.f32.mrf.mxu0  ;;  %v1199_v29 = vpop.f32.mrf.mxu1 }
 0x161   : > { %v8971_v40 = vadd.f32 %v6019_v60, %v1208_v22  ;;  %v1200_v31 = vadd.f32 %v1199_v29, %v9464_v47 }
 0x162   : > { %v1654_v8 = vpop.f32.mrf.mxu0  ;;  %v5972_v57 = vpop.f32.mrf.mxu1 }
 0x163   : > { %v8974_v58 = vadd.f32 %v1651_v54, %v1200_v31  ;;  %v1211_v3 = vadd.f32 %v5972_v57, %v9465_v10  ;;  %v9472_v57 = vld [vmem:[#allocation31_spill] sm:$0xff] }
 0x164   : > { %v6023_v50 = vpop.f32.mrf.mxu0  ;;  %v1202_v16 = vpop.f32.mrf.mxu1 }
 0x165   : > { %v8977_v26 = vadd.f32 %v6020_v6, %v1211_v3  ;;  %v1203_v27 = vadd.f32 %v1202_v16, %v8567_v32 }
 0x166   : > { %6310 = vmatmul.mubr.bf16.gmra.mxu0 %v5652_v11  ;;  %v1667_v52 = vpop.f32.mrf.mxu0  ;;  %v5975_v4 = vpop.f32.mrf.mxu1  ;;  %6262 = vmatmul.mubr.bf16.gmra.mxu1 %v5596_v34  ;;  %v9471_v11 = vld [vmem:[#allocation30_spill] sm:$0xff] }
 0x167   : > { %v8980_v59 = vadd.f32 %v1654_v8, %v1203_v27  ;;  %v1224_v43 = vadd.f32 %v5975_v4, %v9466_v37 }
 0x168   : > { %v6024_v38 = vpop.f32.mrf.mxu0  ;;  %v1215_v21 = vpop.f32.mrf.mxu1 }
 0x169   : > { %v8983_v5 = vadd.f32 %v6023_v50, %v1224_v43  ;;  %v1216_v1 = vadd.f32 %v1215_v21, %v9467_v2 }
 0x16a   : > { %v1670_v9 = vpop.f32.mrf.mxu0  ;;  %v5976_v63 = vpop.f32.mrf.mxu1 }
 0x16b   : > { %v8986_v60 = vadd.f32 %v1667_v52, %v1216_v1  ;;  %v1227_v36 = vadd.f32 %v5976_v63, %v9468_v17 }
 0x16c   : > { %v6091_v32 = vpop.f32.mrf.mxu0  ;;  %v1218_v55 = vpop.f32.mrf.mxu1 }
 0x16d   : > { %v8989_v28 = vadd.f32 %v6024_v38, %v1227_v36  ;;  %v1219_v48 = vadd.f32 %v1218_v55, %v9469_v20 }
 0x16e   : > { %v2697_v13 = vpop.f32.mrf.mxu0  ;;  %v6043_v54 = vpop.f32.mrf.mxu1 }
 0x16f   : > { %v8992_v46 = vadd.f32 %v1670_v9, %v1219_v48  ;;  %v2073_v44 = vadd.f32 %v6043_v54, %v9470_v0 }
 0x170   : > { %v6092_v22 = vpop.f32.mrf.mxu0  ;;  %v1944_v6 = vpop.f32.mrf.mxu1 }
 0x171   : > { %v8995_v56 = vadd.f32 %v6091_v32, %v2073_v44  ;;  %v2071_v29 = vadd.f32 %v1944_v6, %v9471_v11 }
 0x172   : > { %v2700_v47 = vpop.f32.mrf.mxu0  ;;  %v6044_v31 = vpop.f32.mrf.mxu1 }
 0x173   : > { %v8998_v8 = vadd.f32 %v2697_v13, %v2071_v29  ;;  %v2074_v34 = vadd.f32 %v6044_v31, %v9472_v57 }
 0x174   : > { %v6095_v10 = vpop.f32.mrf.mxu0  ;;  %v1947_v3 = vpop.f32.mrf.mxu1 }
 0x175   : > { %v9001_v50 = vadd.f32 %v6092_v22, %v2074_v34  ;;  %v2072_v16 = vadd.f32 %v1947_v3, %v8737_v24 }
 0x176   : > { %v2713_v27 = vpop.f32.mrf.mxu0  ;;  %v6047_v52 = vpop.f32.mrf.mxu1 }
 0x177   : > { %v9004_v4 = vadd.f32 %v2700_v47, %v2072_v16  ;;  %v2077_v37 = vadd.f32 %v6047_v52, %v8741_v41 }
 0x178   : > { %v6096_v43 = vpop.f32.mrf.mxu0  ;;  %v1960_v38 = vpop.f32.mrf.mxu1 }
 0x179   : > { %v9007_v21 = vadd.f32 %v6095_v10, %v2077_v37  ;;  %v2075_v2 = vadd.f32 %v1960_v38, %v8750_v15 }
 0x17a   : > { %v2716_v1 = vpop.f32.mrf.mxu0  ;;  %v6048_v9 = vpop.f32.mrf.mxu1 }
 0x17b   : > { %v9010_v63 = vadd.f32 %v2713_v27, %v2075_v2  ;;  %v2078_v17 = vadd.f32 %v6048_v9, %v8776_v53 }
 0x17c   : > { %v6099_v36 = vpop.f32.mrf.mxu0  ;;  %v1963_v24 = vpop.f32.mrf.mxu1 }
 0x17d   : > { %v9013_v32 = vadd.f32 %v6096_v43, %v2078_v17  ;;  %v2076_v55 = vadd.f32 %v1963_v24, %v8796_v14 }
 0x17e   : > { %v2729_v20 = vpop.f32.mrf.mxu0  ;;  %v6051_v41 = vpop.f32.mrf.mxu1 }
 0x17f   : > { %v9016_v48 = vadd.f32 %v2716_v1, %v2076_v55  ;;  %v2081_v13 = vadd.f32 %v6051_v41, %v8804_v7 }
 0x180   : > { %v6100_v54 = vpop.f32.mrf.mxu0  ;;  %v1976_v15 = vpop.f32.mrf.mxu1 }
 0x181   : > { %v9019_v0 = vadd.f32 %v6099_v36, %v2081_v13  ;;  %v2079_v44 = vadd.f32 %v1976_v15, %v8814_v45 }
 0x182   : > { %v2732_v22 = vpop.f32.mrf.mxu0  ;;  %v6052_v53 = vpop.f32.mrf.mxu1 }
 0x183   : > { %v9022_v6 = vadd.f32 %v2729_v20, %v2079_v44  ;;  %v2082_v11 = vadd.f32 %v6052_v53, %v8837_v23 }
 0x184   : > { %v6103_v29 = vpop.f32.mrf.mxu0  ;;  %v1979_v14 = vpop.f32.mrf.mxu1 }
 0x185   : > { %v9025_v47 = vadd.f32 %v6100_v54, %v2082_v11  ;;  %v2080_v31 = vadd.f32 %v1979_v14, %v8854_v18 }
 0x186   : > { %v2745_v57 = vpop.f32.mrf.mxu0  ;;  %v6055_v7 = vpop.f32.mrf.mxu1 }
 0x187   : > { %v9028_v34 = vadd.f32 %v2732_v22, %v2080_v31  ;;  %v2085_v10 = vadd.f32 %v6055_v7, %v8861_v42 }
 0x188   : > { %v6104_v3 = vpop.f32.mrf.mxu0  ;;  %v1992_v45 = vpop.f32.mrf.mxu1 }
 0x189   : > { %v9031_v16 = vadd.f32 %v6103_v29, %v2085_v10  ;;  %v2083_v27 = vadd.f32 %v1992_v45, %v8873_v61 }
 0x18a   : > { %v2748_v52 = vpop.f32.mrf.mxu0  ;;  %v6056_v23 = vpop.f32.mrf.mxu1 }
 0x18b   : > { %v9034_v37 = vadd.f32 %v2745_v57, %v2083_v27  ;;  %v2086_v43 = vadd.f32 %v6056_v23, %v8893_v19 }
 0x18c   : > { %v6107_v38 = vpop.f32.mrf.mxu0  ;;  %v1995_v18 = vpop.f32.mrf.mxu1 }
 0x18d   : > { %v9037_v2 = vadd.f32 %v6104_v3, %v2086_v43  ;;  %v2084_v1 = vadd.f32 %v1995_v18, %v8901_v12 }
 0x18e   : > { %v2761_v9 = vpop.f32.mrf.mxu0  ;;  %v6059_v42 = vpop.f32.mrf.mxu1 }
 0x18f   : > { %v9040_v17 = vadd.f32 %v2748_v52, %v2084_v1  ;;  %v2089_v36 = vadd.f32 %v6059_v42, %v8910_v25 }
 0x190   : > { %v6108_v24 = vpop.f32.mrf.mxu0  ;;  %v2008_v61 = vpop.f32.mrf.mxu1 }
 0x191   : > { %v9043_v55 = vadd.f32 %v6107_v38, %v2089_v36  ;;  %v2087_v20 = vadd.f32 %v2008_v61, %v8913_v51 }
 0x192   : > { %v2764_v41 = vpop.f32.mrf.mxu0  ;;  %v6060_v19 = vpop.f32.mrf.mxu1 }
 0x193   : > { %v9046_v13 = vadd.f32 %v2761_v9, %v2087_v20  ;;  %v2090_v54 = vadd.f32 %v6060_v19, %v8930_v62 }
 0x194   : > { %v6111_v15 = vpop.f32.mrf.mxu0  ;;  %v2011_v12 = vpop.f32.mrf.mxu1 }
 0x195   : > { %v9049_v44 = vadd.f32 %v6108_v24, %v2090_v54  ;;  %v2088_v22 = vadd.f32 %v2011_v12, %v8943_v33 }
 0x196   : > { %v2777_v53 = vpop.f32.mrf.mxu0  ;;  %v6063_v25 = vpop.f32.mrf.mxu1 }
 0x197   : > { %v9052_v11 = vadd.f32 %v2764_v41, %v2088_v22  ;;  %v2093_v29 = vadd.f32 %v6063_v25, %v8950_v49 }
 0x198   : > { %v6112_v14 = vpop.f32.mrf.mxu0  ;;  %v2024_v51 = vpop.f32.mrf.mxu1 }
 0x199   : > { %v9055_v31 = vadd.f32 %v6111_v15, %v2093_v29  ;;  %v2091_v57 = vadd.f32 %v2024_v51, %v8953_v35 }
 0x19a   : > { %v2780_v7 = vpop.f32.mrf.mxu0  ;;  %v6064_v62 = vpop.f32.mrf.mxu1 }
 0x19b   : > { %v9058_v10 = vadd.f32 %v2777_v53, %v2091_v57  ;;  %v2094_v3 = vadd.f32 %v6064_v62, %v8960_v30 }
 0x19c   : > { %v6115_v45 = vpop.f32.mrf.mxu0  ;;  %v2027_v33 = vpop.f32.mrf.mxu1 }
 0x19d   : > { %v9061_v27 = vadd.f32 %v6112_v14, %v2094_v3  ;;  %v2092_v52 = vadd.f32 %v2027_v33, %v8966_v39 }
 0x19e   : > { %v2793_v23 = vpop.f32.mrf.mxu0  ;;  %v6067_v49 = vpop.f32.mrf.mxu1 }
 0x19f   : > { %v9064_v43 = vadd.f32 %v2780_v7, %v2092_v52  ;;  %v2097_v38 = vadd.f32 %v6067_v49, %v8971_v40 }
 0x1a0   : > { %v6116_v18 = vpop.f32.mrf.mxu0  ;;  %v2040_v35 = vpop.f32.mrf.mxu1 }
 0x1a1   : > { %v9067_v1 = vadd.f32 %v6115_v45, %v2097_v38  ;;  %v2095_v9 = vadd.f32 %v2040_v35, %v8974_v58 }
 0x1a2   : > { %v2796_v42 = vpop.f32.mrf.mxu0  ;;  %v6068_v30 = vpop.f32.mrf.mxu1 }
 0x1a3   : > { %v9070_v36 = vadd.f32 %v2793_v23, %v2095_v9  ;;  %v2098_v24 = vadd.f32 %v6068_v30, %v8977_v26 }
 0x1a4   : > { %v6119_v61 = vpop.f32.mrf.mxu0  ;;  %v2043_v39 = vpop.f32.mrf.mxu1 }
 0x1a5   : > { %v9073_v20 = vadd.f32 %v6116_v18, %v2098_v24  ;;  %v2096_v41 = vadd.f32 %v2043_v39, %v8980_v59  ;;  %v6593_v24 = vmov -inf  }
 0x1a6   : > { %v2809_v19 = vpop.f32.mrf.mxu0  ;;  %v6071_v40 = vpop.f32.mrf.mxu1  ;;  %5067 = vst [vmem:[#allocation2] sm:$0x1] %v6593_v24 }
 0x1a7   : > { %v9076_v54 = vadd.f32 %v2796_v42, %v2096_v41  ;;  %v2101_v15 = vadd.f32 %v6071_v40, %v8983_v5 }
 0x1a8   : > { %v6120_v12 = vpop.f32.mrf.mxu0  ;;  %v2056_v58 = vpop.f32.mrf.mxu1 }
 0x1a9   : > { %v9079_v22 = vadd.f32 %v6119_v61, %v2101_v15  ;;  %v2099_v53 = vadd.f32 %v2056_v58, %v8986_v60 }
 0x1aa   : > { %v2812_v25 = vpop.f32.mrf.mxu0  ;;  %v6072_v26 = vpop.f32.mrf.mxu1 }
 0x1ab   : > { %v9082_v29 = vadd.f32 %v2809_v19, %v2099_v53  ;;  %v2102_v14 = vadd.f32 %v6072_v26, %v8989_v28 }
 0x1ac   : > { %v6187_v51 = vpop.f32.mrf.mxu0  ;;  %v2059_v59 = vpop.f32.mrf.mxu1 }
 0x1ad   : > { %v9085_v57 = vadd.f32 %v6120_v12, %v2102_v14  ;;  %v2100_v7 = vadd.f32 %v2059_v59, %v8992_v46 }
 0x1ae   : > { %v3583_v62 = vpop.f32.mrf.mxu0  ;;  %v6139_v5 = vpop.f32.mrf.mxu1 }
 0x1af   : > { %v9088_v3 = vadd.f32 %v2812_v25, %v2100_v7  ;;  %v3323_v45 = vadd.f32 %v6139_v5, %v8995_v56 }
 0x1b0   : > { %v6188_v33 = vpop.f32.mrf.mxu0  ;;  %v3194_v60 = vpop.f32.mrf.mxu1 }
 0x1b1   : > { %v9091_v52 = vadd.f32 %v6187_v51, %v3323_v45  ;;  %v3321_v23 = vadd.f32 %v3194_v60, %v8998_v8 }
 0x1b2   : > { %v3586_v49 = vpop.f32.mrf.mxu0  ;;  %v6140_v28 = vpop.f32.mrf.mxu1 }
 0x1b3   : > { %v9094_v38 = vadd.f32 %v3583_v62, %v3321_v23  ;;  %v3324_v18 = vadd.f32 %v6140_v28, %v9001_v50 }
 0x1b4   : > { %v6191_v35 = vpop.f32.mrf.mxu0  ;;  %v3197_v46 = vpop.f32.mrf.mxu1 }
 0x1b5   : > { %v9097_v9 = vadd.f32 %v6188_v33, %v3324_v18  ;;  %v3322_v42 = vadd.f32 %v3197_v46, %v9004_v4 }
 0x1b6   : > { %v3599_v30 = vpop.f32.mrf.mxu0  ;;  %v6143_v56 = vpop.f32.mrf.mxu1 }
 0x1b7   : > { %v9100_v61 = vadd.f32 %v3586_v49, %v3322_v42  ;;  %v3327_v8 = vadd.f32 %v6143_v56, %v9007_v21 }
 0x1b8   : > { %v6192_v39 = vpop.f32.mrf.mxu0  ;;  %v3210_v41 = vpop.f32.mrf.mxu1 }
 0x1b9   : > { %v9103_v19 = vadd.f32 %v6191_v35, %v3327_v8  ;;  %v3325_v50 = vadd.f32 %v3210_v41, %v9010_v63 }
 0x1ba   : > { %v3602_v40 = vpop.f32.mrf.mxu0  ;;  %v6144_v15 = vpop.f32.mrf.mxu1 }
 0x1bb   : > { %v9106_v12 = vadd.f32 %v3599_v30, %v3325_v50  ;;  %v3328_v4 = vadd.f32 %v6144_v15, %v9013_v32 }
 0x1bc   : > { %v6195_v58 = vpop.f32.mrf.mxu0  ;;  %v3213_v53 = vpop.f32.mrf.mxu1 }
 0x1bd   : > { %v9109_v25 = vadd.f32 %v6192_v39, %v3328_v4  ;;  %v3326_v26 = vadd.f32 %v3213_v53, %v9016_v48 }
 0x1be   : > { %v3615_v14 = vpop.f32.mrf.mxu0  ;;  %v6147_v21 = vpop.f32.mrf.mxu1 }
 0x1bf   : > { %v9112_v51 = vadd.f32 %v3602_v40, %v3326_v26  ;;  %v3331_v59 = vadd.f32 %v6147_v21, %v9019_v0 }
 0x1c0   : > { %v6196_v7 = vpop.f32.mrf.mxu0  ;;  %v3226_v63 = vpop.f32.mrf.mxu1 }
 0x1c1   : > { %v9115_v62 = vadd.f32 %v6195_v58, %v3331_v59  ;;  %v3329_v5 = vadd.f32 %v3226_v63, %v9022_v6 }
 0x1c2   : > { %v3618_v45 = vpop.f32.mrf.mxu0  ;;  %v6148_v32 = vpop.f32.mrf.mxu1 }
 0x1c3   : > { %v9118_v33 = vadd.f32 %v3615_v14, %v3329_v5  ;;  %v3332_v60 = vadd.f32 %v6148_v32, %v9025_v47 }
 0x1c4   : > { %v6199_v23 = vpop.f32.mrf.mxu0  ;;  %v3229_v48 = vpop.f32.mrf.mxu1 }
 0x1c5   : > { %v9121_v49 = vadd.f32 %v6196_v7, %v3332_v60  ;;  %v3330_v28 = vadd.f32 %v3229_v48, %v9028_v34 }
 0x1c6   : > { %v3631_v18 = vpop.f32.mrf.mxu0  ;;  %v6151_v0 = vpop.f32.mrf.mxu1 }
 0x1c7   : > { %v9124_v35 = vadd.f32 %v3618_v45, %v3330_v28  ;;  %v3335_v46 = vadd.f32 %v6151_v0, %v9031_v16 }
 0x1c8   : > { %v6200_v42 = vpop.f32.mrf.mxu0  ;;  %v3242_v6 = vpop.f32.mrf.mxu1 }
 0x1c9   : > { %v9127_v30 = vadd.f32 %v6199_v23, %v3335_v46  ;;  %v3333_v56 = vadd.f32 %v3242_v6, %v9034_v37 }
 0x1ca   : > { %v3634_v24 = vpop.f32.mrf.mxu0  ;;  %v6152_v47 = vpop.f32.mrf.mxu1 }
 0x1cb   : > { %v9130_v8 = vadd.f32 %v3631_v18, %v3333_v56  ;;  %v3336_v39 = vadd.f32 %v6152_v47, %v9037_v2 }
 0x1cc   : > { %v6203_v41 = vpop.f32.mrf.mxu0  ;;  %v3245_v34 = vpop.f32.mrf.mxu1 }
 0x1cd   : > { %v9133_v50 = vadd.f32 %v6200_v42, %v3336_v39  ;;  %v3334_v40 = vadd.f32 %v3245_v34, %v9040_v17 }
 0x1ce   : > { %v3647_v15 = vpop.f32.mrf.mxu0  ;;  %v6155_v16 = vpop.f32.mrf.mxu1 }
 0x1cf   : > { %v9136_v4 = vadd.f32 %v3634_v24, %v3334_v40  ;;  %v3339_v58 = vadd.f32 %v6155_v16, %v9043_v55 }
 0x1d0   : > { %v6204_v53 = vpop.f32.mrf.mxu0  ;;  %v3258_v37 = vpop.f32.mrf.mxu1 }
 0x1d1   : > { %v9139_v26 = vadd.f32 %v6203_v41, %v3339_v58  ;;  %v3337_v14 = vadd.f32 %v3258_v37, %v9046_v13 }
 0x1d2   : > { %v3650_v21 = vpop.f32.mrf.mxu0  ;;  %v6156_v2 = vpop.f32.mrf.mxu1 }
 0x1d3   : > { %v9142_v59 = vadd.f32 %v3647_v15, %v3337_v14  ;;  %v3340_v7 = vadd.f32 %v6156_v2, %v9049_v44 }
 0x1d4   : > { %v6207_v63 = vpop.f32.mrf.mxu0  ;;  %v3261_v17 = vpop.f32.mrf.mxu1 }
 0x1d5   : > { %v9145_v5 = vadd.f32 %v6204_v53, %v3340_v7  ;;  %v3338_v45 = vadd.f32 %v3261_v17, %v9052_v11 }
 0x1d6   : > { %v3663_v32 = vpop.f32.mrf.mxu0  ;;  %v6159_v55 = vpop.f32.mrf.mxu1 }
 0x1d7   : > { %v9148_v60 = vadd.f32 %v3650_v21, %v3338_v45  ;;  %v3343_v23 = vadd.f32 %v6159_v55, %v9055_v31 }
 0x1d8   : > { %v6208_v48 = vpop.f32.mrf.mxu0  ;;  %v3274_v13 = vpop.f32.mrf.mxu1 }
 0x1d9   : > { %v9151_v28 = vadd.f32 %v6207_v63, %v3343_v23  ;;  %v3341_v18 = vadd.f32 %v3274_v13, %v9058_v10 }
 0x1da   : > { %v3666_v0 = vpop.f32.mrf.mxu0  ;;  %v6160_v44 = vpop.f32.mrf.mxu1 }
 0x1db   : > { %v9154_v46 = vadd.f32 %v3663_v32, %v3341_v18  ;;  %v3344_v42 = vadd.f32 %v6160_v44, %v9061_v27 }
 0x1dc   : > { %v6211_v6 = vpop.f32.mrf.mxu0  ;;  %v3277_v11 = vpop.f32.mrf.mxu1 }
 0x1dd   : > { %v9157_v56 = vadd.f32 %v6208_v48, %v3344_v42  ;;  %v3342_v24 = vadd.f32 %v3277_v11, %v9064_v43 }
 0x1de   : > { %v3679_v47 = vpop.f32.mrf.mxu0  ;;  %v6163_v31 = vpop.f32.mrf.mxu1 }
 0x1df   : > { %v9160_v39 = vadd.f32 %v3666_v0, %v3342_v24  ;;  %v3347_v41 = vadd.f32 %v6163_v31, %v9067_v1 }
 0x1e0   : > { %v6212_v34 = vpop.f32.mrf.mxu0  ;;  %v3290_v10 = vpop.f32.mrf.mxu1 }
 0x1e1   : > { %v9163_v40 = vadd.f32 %v6211_v6, %v3347_v41  ;;  %v3345_v15 = vadd.f32 %v3290_v10, %v9070_v36  ;;  %v9194_v41 = vld [vmem:[%s9308_s2] ss:$0 sm:$0xff] }
 0x1e2   : > { %v3682_v16 = vpop.f32.mrf.mxu0  ;;  %v6164_v27 = vpop.f32.mrf.mxu1 }
 0x1e3   : > { %v9166_v58 = vadd.f32 %v3679_v47, %v3345_v15  ;;  %v3348_v53 = vadd.f32 %v6164_v27, %v9073_v20 }
 0x1e4   : > { %v6215_v37 = vpop.f32.mrf.mxu0  ;;  %v3293_v43 = vpop.f32.mrf.mxu1 }
 0x1e5   : > { %v9169_v14 = vadd.f32 %v6212_v34, %v3348_v53  ;;  %v3346_v21 = vadd.f32 %v3293_v43, %v9076_v54 }
 0x1e6   : > { %v3695_v2 = vpop.f32.mrf.mxu0  ;;  %v6167_v1 = vpop.f32.mrf.mxu1 }
 0x1e7   : > { %v9172_v7 = vadd.f32 %v3682_v16, %v3346_v21  ;;  %v3351_v63 = vadd.f32 %v6167_v1, %v9079_v22 }
 0x1e8   : > { %v9175_v17 = vpop.f32.mrf.mxu0  ;;  %v3306_v36 = vpop.f32.mrf.mxu1 }
 0x1e9   : > { %v9177_v45 = vadd.f32 %v6215_v37, %v3351_v63  ;;  %v3349_v32 = vadd.f32 %v3306_v36, %v9082_v29 }
 0x1ea   : > { %v9180_v20 = vpop.f32.mrf.mxu0  ;;  %v9182_v55 = vpop.f32.mrf.mxu1 }
 0x1eb   : > { %v9184_v23 = vadd.f32 %v3695_v2, %v3349_v32 }
 0x1ec   : > { %v9186_v48 = vpop.f32.mrf.mxu1 }
 0x1ed   : > { %v6283_v54 = vpop.f32.mrf.mxu0 }
 0x1ee   : > { %v6235_v18 = vpop.f32.mrf.mxu1 }
 0x1ef   : > { %v4833_v13 = vpop.f32.mrf.mxu0  ;;  %v4465_v22 = vadd.f32 %v6235_v18, %v9091_v52 }
 0x1f0   : > { %v4336_v44 = vpop.f32.mrf.mxu1 }
 0x1f1   : > { %v6284_v0 = vpop.f32.mrf.mxu0  ;;  %v4463_v6 = vadd.f32 %v4336_v44, %v9094_v38  ;;  %v4962_v24 = vadd.f32 %v6283_v54, %v4465_v22 }
 0x1f2   : > { %v6236_v11 = vpop.f32.mrf.mxu1 }
 0x1f3   : > { %v4836_v42 = vpop.f32.mrf.mxu0  ;;  %v4466_v47 = vadd.f32 %v6236_v11, %v9097_v9  ;;  %v4960_v10 = vadd.f32 %v4833_v13, %v4463_v6  ;;  %v5001_v38 = vadd.f32 %v9194_v41, %v4962_v24 }
 0x1f4   : > { %v4339_v31 = vpop.f32.mrf.mxu1 }
 0x1f5   : > { %v6287_v29 = vpop.f32.mrf.mxu0  ;;  %v4464_v15 = vadd.f32 %v4339_v31, %v9100_v61  ;;  %v4963_v53 = vadd.f32 %v6284_v0, %v4466_v47  ;;  %v4999_v2 = vadd.f32 %v9194_v41, %v4960_v10 }
 0x1f6   : > { %v6239_v52 = vpop.f32.mrf.mxu1 }
 0x1f7   : > { %v4849_v34 = vpop.f32.mrf.mxu0  ;;  %v4469_v16 = vadd.f32 %v6239_v52, %v9103_v19  ;;  %v4961_v1 = vadd.f32 %v4836_v42, %v4464_v15  ;;  %v5033_v19 = vmax.f32 %v5001_v38, 0.0  ;;  %v5002_v13 = vadd.f32 %v9194_v41, %v4963_v53 }
 0x1f8   : > { %v4352_v37 = vpop.f32.mrf.mxu1  ;;  %v5031_v11 = vmax.f32 %v4999_v2, 0.0 }
 0x1f9   : > { %v6288_v27 = vpop.f32.mrf.mxu0  ;;  %v4966_v43 = vadd.f32 %v6287_v29, %v4469_v16  ;;  %v4467_v9 = vadd.f32 %v4352_v37, %v9106_v12  ;;  %v5000_v42 = vadd.f32 %v9194_v41, %v4961_v1  ;;  %v5034_v10 = vmax.f32 %v5002_v13, 0.0 }
 0x1fa   : > { %v6240_v63 = vpop.f32.mrf.mxu1 }
 0x1fb   : > { %v4852_v21 = vpop.f32.mrf.mxu0  ;;  %v5005_v36 = vadd.f32 %v9194_v41, %v4966_v43  ;;  %v4964_v32 = vadd.f32 %v4849_v34, %v4467_v9  ;;  %v4470_v61 = vadd.f32 %v6240_v63, %v9109_v25  ;;  %v5032_v37 = vmax.f32 %v5000_v42, 0.0 }
 0x1fc   : > { %v4355_v18 = vpop.f32.mrf.mxu1 }
 0x1fd   : > { %v6291_v54 = vpop.f32.mrf.mxu0  ;;  %v5037_v0 = vmax.f32 %v5005_v36, 0.0  ;;  %v5003_v22 = vadd.f32 %v9194_v41, %v4964_v32  ;;  %v4967_v44 = vadd.f32 %v6288_v27, %v4470_v61  ;;  %v4468_v12 = vadd.f32 %v4355_v18, %v9112_v51 }
 0x1fe   : > { %v6243_v29 = vpop.f32.mrf.mxu1 }
 0x1ff   : > { %v4865_v6 = vpop.f32.mrf.mxu0  ;;  %v5071_v24 = vmax.f32 %v5033_v19, %v5037_v0  ;;  %v5035_v47 = vmax.f32 %v5003_v22, 0.0  ;;  %v5006_v25 = vadd.f32 %v9194_v41, %v4967_v44  ;;  %v4965_v31 = vadd.f32 %v4852_v21, %v4468_v12 }
 0x200   : > { %v4473_v15 = vadd.f32 %v6243_v29, %v9115_v62  ;;  %v4368_v52 = vpop.f32.mrf.mxu1 }
 0x201   : > { %v6292_v34 = vpop.f32.mrf.mxu0  ;;  %v5069_v16 = vmax.f32 %v5031_v11, %v5035_v47  ;;  %v5038_v38 = vmax.f32 %v5006_v25, 0.0  ;;  %v5004_v27 = vadd.f32 %v9194_v41, %v4965_v31  ;;  %v4471_v51 = vadd.f32 %v4368_v52, %v9118_v33 }
 0x202   : > { %v4970_v43 = vadd.f32 %v6291_v54, %v4473_v15  ;;  %v6244_v9 = vpop.f32.mrf.mxu1 }
 0x203   : > { %v4868_v53 = vpop.f32.mrf.mxu0  ;;  %v5072_v2 = vmax.f32 %v5034_v10, %v5038_v38  ;;  %v5036_v1 = vmax.f32 %v5004_v27, 0.0  ;;  %v4968_v63 = vadd.f32 %v4865_v6, %v4471_v51  ;;  %v4474_v21 = vadd.f32 %v6244_v9, %v9121_v49 }
 0x204   : > { %v5009_v32 = vadd.f32 %v9194_v41, %v4970_v43  ;;  %v4371_v62 = vpop.f32.mrf.mxu1 }
 0x205   : > { %v6295_v36 = vpop.f32.mrf.mxu0  ;;  %v5070_v61 = vmax.f32 %v5032_v37, %v5036_v1  ;;  %v5007_v19 = vadd.f32 %v9194_v41, %v4968_v63  ;;  %v4971_v13 = vadd.f32 %v6292_v34, %v4474_v21  ;;  %v4472_v18 = vadd.f32 %v4371_v62, %v9124_v35 }
 0x206   : > { %v5041_v0 = vmax.f32 %v5009_v32, 0.0  ;;  %v6247_v22 = vpop.f32.mrf.mxu1 }
 0x207   : > { %v4881_v33 = vpop.f32.mrf.mxu0  ;;  %v5039_v54 = vmax.f32 %v5007_v19, 0.0  ;;  %v5010_v44 = vadd.f32 %v9194_v41, %v4971_v13  ;;  %v4969_v12 = vadd.f32 %v4868_v53, %v4472_v18  ;;  %v4477_v6 = vadd.f32 %v6247_v22, %v9127_v30 }
 0x208   : > { %v5075_v11 = vmax.f32 %v5071_v24, %v5041_v0  ;;  %v4384_v42 = vpop.f32.mrf.mxu1 }
 0x209   : > { %v6296_v49 = vpop.f32.mrf.mxu0  ;;  %v5073_v29 = vmax.f32 %v5069_v16, %v5039_v54  ;;  %v5042_v47 = vmax.f32 %v5010_v44, 0.0  ;;  %v5008_v25 = vadd.f32 %v9194_v41, %v4969_v12  ;;  %v4974_v31 = vadd.f32 %v6295_v36, %v4477_v6 }
 0x20a   : > { %v4475_v35 = vadd.f32 %v4384_v42, %v9130_v8  ;;  %v6248_v10 = vpop.f32.mrf.mxu1 }
 0x20b   : > { %v4884_v34 = vpop.f32.mrf.mxu0  ;;  %v5076_v15 = vmax.f32 %v5072_v2, %v5042_v47  ;;  %v5040_v52 = vmax.f32 %v5008_v25, 0.0  ;;  %v5013_v38 = vadd.f32 %v9194_v41, %v4974_v31  ;;  %v4478_v27 = vadd.f32 %v6248_v10, %v9133_v50 }
 0x20c   : > { %v4972_v30 = vadd.f32 %v4881_v33, %v4475_v35  ;;  %v4387_v53 = vpop.f32.mrf.mxu1 }
 0x20d   : > { %v5074_v24 = vmax.f32 %v5070_v61, %v5040_v52  ;;  %v5045_v37 = vmax.f32 %v5013_v38, 0.0  ;;  %v4975_v16 = vadd.f32 %v6296_v49, %v4478_v27  ;;  %v4476_v43 = vadd.f32 %v4387_v53, %v9136_v4 }
 0x20e   : > { %v6299_v51 = vpop.f32.mrf.mxu0  ;;  %v5011_v1 = vadd.f32 %v9194_v41, %v4972_v30  ;;  %v6251_v63 = vpop.f32.mrf.mxu1 }
 0x20f   : > { %v5079_v8 = vmax.f32 %v5075_v11, %v5045_v37  ;;  %v5014_v2 = vadd.f32 %v9194_v41, %v4975_v16  ;;  %v4973_v21 = vadd.f32 %v4884_v34, %v4476_v43  ;;  %v4481_v36 = vadd.f32 %v6251_v63, %v9139_v26 }
 0x210   : > { %v4897_v9 = vpop.f32.mrf.mxu0  ;;  %v5043_v50 = vmax.f32 %v5011_v1, 0.0  ;;  %v4400_v62 = vpop.f32.mrf.mxu1 }
 0x211   : > { %v5046_v19 = vmax.f32 %v5014_v2, 0.0  ;;  %v5012_v61 = vadd.f32 %v9194_v41, %v4973_v21  ;;  %v4978_v13 = vadd.f32 %v6299_v51, %v4481_v36  ;;  %v4479_v18 = vadd.f32 %v4400_v62, %v9142_v59 }
 0x212   : > { %v6300_v32 = vpop.f32.mrf.mxu0  ;;  %v5077_v33 = vmax.f32 %v5073_v29, %v5043_v50  ;;  %v6252_v0 = vpop.f32.mrf.mxu1 }
 0x213   : > { %v5080_v22 = vmax.f32 %v5076_v15, %v5046_v19  ;;  %v5044_v54 = vmax.f32 %v5012_v61, 0.0  ;;  %v5017_v44 = vadd.f32 %v9194_v41, %v4978_v13  ;;  %v4976_v12 = vadd.f32 %v4897_v9, %v4479_v18 }
 0x214   : > { %v4900_v4 = vpop.f32.mrf.mxu0  ;;  %v4482_v26 = vadd.f32 %v6252_v0, %v9145_v5  ;;  %v4403_v49 = vpop.f32.mrf.mxu1 }
 0x215   : > { %v5078_v11 = vmax.f32 %v5074_v24, %v5044_v54  ;;  %v5049_v42 = vmax.f32 %v5017_v44, 0.0  ;;  %v5015_v47 = vadd.f32 %v9194_v41, %v4976_v12  ;;  %v4480_v25 = vadd.f32 %v4403_v49, %v9148_v60 }
 0x216   : > { %v6303_v6 = vpop.f32.mrf.mxu0  ;;  %v4979_v59 = vadd.f32 %v6300_v32, %v4482_v26  ;;  %v6255_v34 = vpop.f32.mrf.mxu1 }
 0x217   : > { %v5083_v29 = vmax.f32 %v5079_v8, %v5049_v42  ;;  %v5047_v35 = vmax.f32 %v5015_v47, 0.0  ;;  %v4977_v10 = vadd.f32 %v4900_v4, %v4480_v25  ;;  %v4485_v15 = vadd.f32 %v6255_v34, %v9151_v28 }
 0x218   : > { %v4913_v31 = vpop.f32.mrf.mxu0  ;;  %v5018_v38 = vadd.f32 %v9194_v41, %v4979_v59  ;;  %v4416_v27 = vpop.f32.mrf.mxu1 }
 0x219   : > { %v5081_v5 = vmax.f32 %v5077_v33, %v5047_v35  ;;  %v5016_v51 = vadd.f32 %v9194_v41, %v4977_v10  ;;  %v4982_v30 = vadd.f32 %v6303_v6, %v4485_v15  ;;  %v4483_v53 = vadd.f32 %v4416_v27, %v9154_v46 }
 0x21a   : > { %v6304_v52 = vpop.f32.mrf.mxu0  ;;  %v5050_v60 = vmax.f32 %v5018_v38, 0.0  ;;  %v6256_v37 = vpop.f32.mrf.mxu1  ;;  %v3350_v35 = vadd.f32 %v9186_v48, %v9088_v3 }
 0x21b   : > { %v5048_v16 = vmax.f32 %v5016_v51, 0.0  ;;  %v5021_v43 = vadd.f32 %v9194_v41, %v4982_v30  ;;  %v4980_v9 = vadd.f32 %v4913_v31, %v4483_v53  ;;  %v4486_v1 = vadd.f32 %v6256_v37, %v9157_v56 }
 0x21c   : > { %v4916_v24 = vpop.f32.mrf.mxu0  ;;  %v5084_v63 = vmax.f32 %v5080_v22, %v5050_v60  ;;  %v4419_v8 = vpop.f32.mrf.mxu1  ;;  %v3739_v3 = vadd.f32 %v9180_v20, %v3350_v35 }
 0x21d   : > { %v5082_v2 = vmax.f32 %v5078_v11, %v5048_v16  ;;  %v5053_v21 = vmax.f32 %v5021_v43, 0.0  ;;  %v5019_v36 = vadd.f32 %v9194_v41, %v4980_v9  ;;  %v4983_v32 = vadd.f32 %v6304_v52, %v4486_v1 }
 0x21e   : > { %v6307_v28 = vpop.f32.mrf.mxu0  ;;  %v4484_v46 = vadd.f32 %v4419_v8, %v9160_v39  ;;  %v6259_v62 = vpop.f32.mrf.mxu1 }
 0x21f   : > { %v5087_v19 = vmax.f32 %v5083_v29, %v5053_v21  ;;  %v5051_v61 = vmax.f32 %v5019_v36, 0.0  ;;  %v5022_v13 = vadd.f32 %v9194_v41, %v4983_v32  ;;  %v4489_v18 = vadd.f32 %v6259_v62, %v9163_v40 }
 0x220   : > { %v4929_v50 = vpop.f32.mrf.mxu0  ;;  %v4981_v56 = vadd.f32 %v4916_v24, %v4484_v46  ;;  %v4432_v33 = vpop.f32.mrf.mxu1  ;;  %v3352_v40 = vadd.f32 %v9182_v55, %v9085_v57 }
 0x221   : > { %v5085_v0 = vmax.f32 %v5081_v5, %v5051_v61  ;;  %v5054_v22 = vmax.f32 %v5022_v13, 0.0  ;;  %v4986_v54 = vadd.f32 %v6307_v28, %v4489_v18  ;;  %v4487_v44 = vadd.f32 %v4432_v33, %v9166_v58 }
 0x222   : > { %v6308_v4 = vpop.f32.mrf.mxu0  ;;  %v5020_v6 = vadd.f32 %v9194_v41, %v4981_v56  ;;  %v6260_v26 = vpop.f32.mrf.mxu1  ;;  %v3741_v57 = vadd.f32 %v9175_v17, %v3352_v40 }
 0x223   : > { %v5088_v39 = vmax.f32 %v5084_v63, %v5054_v22  ;;  %v5025_v49 = vadd.f32 %v9194_v41, %v4986_v54  ;;  %v4984_v11 = vadd.f32 %v4929_v50, %v4487_v44  ;;  %v4490_v42 = vadd.f32 %v6260_v26, %v9169_v14 }
 0x224   : > { %v4932_v12 = vpop.f32.mrf.mxu0  ;;  %v5052_v25 = vmax.f32 %v5020_v6, 0.0  ;;  %v4435_v31 = vpop.f32.mrf.mxu1  ;;  %v5068_v6 = vld [vmem:[#allocation2] sm:$0x1] }
 0x225   : > { %v5057_v59 = vmax.f32 %v5025_v49, 0.0  ;;  %v5023_v34 = vadd.f32 %v9194_v41, %v4984_v11  ;;  %v4987_v58 = vadd.f32 %v6308_v4, %v4490_v42  ;;  %v4488_v29 = vadd.f32 %v4435_v31, %v9172_v7 }
 0x226   : > { %v6311_v47 = vpop.f32.mrf.mxu0  ;;  %v5086_v10 = vmax.f32 %v5082_v2, %v5052_v25  ;;  %v6263_v15 = vpop.f32.mrf.mxu1 }
 0x227   : > { %v5091_v38 = vmax.f32 %v5087_v19, %v5057_v59  ;;  %v5055_v14 = vmax.f32 %v5023_v34, 0.0  ;;  %v5026_v27 = vadd.f32 %v9194_v41, %v4987_v58  ;;  %v4985_v5 = vadd.f32 %v4932_v12, %v4488_v29 }
 0x228   : > { %v4945_v52 = vpop.f32.mrf.mxu0  ;;  %v4493_v55 = vadd.f32 %v6263_v15, %v9177_v45  ;;  %v4448_v51 = vpop.f32.mrf.mxu1 }
 0x229   : > { %v5089_v30 = vmax.f32 %v5085_v0, %v5055_v14  ;;  %v5058_v53 = vmax.f32 %v5026_v27, 0.0  ;;  %v5024_v7 = vadd.f32 %v9194_v41, %v4985_v5  ;;  %v4491_v24 = vadd.f32 %v4448_v51, %v9184_v23 }
 0x22a   : > { %v4990_v48 = vadd.f32 %v6311_v47, %v4493_v55  ;;  %v6264_v60 = vpop.f32.mrf.mxu1  ;;  %v6312_v37 = vpop.f32.mrf.mxu0 }
 0x22b   : > { %v5092_v16 = vmax.f32 %v5088_v39, %v5058_v53  ;;  %v5056_v43 = vmax.f32 %v5024_v7, 0.0  ;;  %v4988_v9 = vadd.f32 %v4945_v52, %v4491_v24  ;;  %v4494_v1 = vadd.f32 %v6264_v60, %v3741_v57 }
 0x22c   : > { %v5029_v17 = vadd.f32 %v9194_v41, %v4990_v48  ;;  %v4451_v28 = vpop.f32.mrf.mxu1  ;;  %v4948_v36 = vpop.f32.mrf.mxu0 }
 0x22d   : > { %v5090_v45 = vmax.f32 %v5086_v10, %v5056_v43  ;;  %v5027_v63 = vadd.f32 %v9194_v41, %v4988_v9  ;;  %v4991_v8 = vadd.f32 %v6312_v37, %v4494_v1  ;;  %v4492_v2 = vadd.f32 %v4451_v28, %v3739_v3 }
 0x22e   : > { %v5061_v21 = vmax.f32 %v5029_v17, 0.0 }
 0x22f   : > { %v5059_v23 = vmax.f32 %v5027_v63, 0.0  ;;  %v5030_v20 = vadd.f32 %v9194_v41, %v4991_v8  ;;  %v4989_v32 = vadd.f32 %v4948_v36, %v4492_v2 }
 0x230   : > { %v5095_v50 = vmax.f32 %v5091_v38, %v5061_v21 }
 0x231   : > { %v5093_v46 = vmax.f32 %v5089_v30, %v5059_v23  ;;  %v5062_v62 = vmax.f32 %v5030_v20, 0.0  ;;  %v5028_v19 = vadd.f32 %v9194_v41, %v4989_v32 }
 0x233   : > { %v5096_v61 = vmax.f32 %v5092_v16, %v5062_v62  ;;  %v5060_v13 = vmax.f32 %v5028_v19, 0.0 }
 0x235   : > { %v5098_v18 = vmax.f32 %v5095_v50, %v5096_v61  ;;  %v5094_v4 = vmax.f32 %v5090_v45, %v5060_v13 }
 0x237   : > { %v5097_v56 = vmax.f32 %v5093_v46, %v5094_v4 }
 0x239   : > { %v5099_v33 = vmax.f32 %v5097_v56, %v5098_v18 }
 0x23b   : > { %v5100_v0 = vrot.slane %v5099_v33, 4 }
 0x23d   : > { %v5101_v22 = vmax.f32 %v5099_v33, %v5100_v0 }
 0x23f   : > { %v5102_v54 = vrot.slane %v5101_v22, 2 }
 0x241   : > { %v5103_v44 = vmax.f32 %v5101_v22, %v5102_v54 }
 0x243   : > { %v5104_v12 = vrot.slane %v5103_v44, 1 }
 0x245   : > { %v5105_v26 = vmax.f32 %v5103_v44, %v5104_v12 }
 0x247   : > { %v5106_v39 = vmax.f32 %v5068_v6, %v5105_v26 }
 0x249   : > { %5107 = vst [vmem:[#allocation2] sm:$0x1] %v5106_v39 }
 0x250   : > { %v5111_v41 = vld [vmem:[#allocation2] sm:$0x1] }
 0x251   : > { %5112 = vst [vmem:[%s174_s6] sm:$0x1] %v5111_v41 }
 0x252   : > { %6528 = shalt.err (!%p6525_p5)
}
 0x253   : > { %s6529_s26 = scalar_lea.hbm %s9266_s11, 16  ;;  %s6533_s29 = scalar_lea.hbm %s9309_s3, 32 }
 0x254   : > { %p6530_p6 = scmp.ne.s32.totalorder %s9266_s11, %s6529_s26  ;;  %p6534_p10 = scmp.lt.s32.totalorder %s9266_s11, %s9309_s3 }
 0x255   : > { %p6535_p11 = scmp.lt.s32.totalorder %s6533_s29, %s6529_s26 }
 0x256   : > { %p6531_p7 = pnand %p6530_p6, %p6655_p4 }
 0x257   : > { %p6536_p12 = por %p6535_p11, %p6534_p10 }
 0x258   : > { %p6532_p9 = pneg %p6531_p7 }
 0x25a   : > { %p6537_p13 = pnand %p6536_p12, %p6532_p9 }
 0x25c   : > { %6540 = shalt.err (!%p6537_p13)
}
 0x25d   : > { %6330 = dma.vmem_to_hbm [thread:$0]  (%p6655_p4), %s5127_s7, 16, %s9266_s11, %s5114_s18  }
 0x25e PF: > { %p6336_p0 = scmp.ge.s32.totalorder %s6591_s17, 2  ;;  %s5138_s4 = sand.u32 1, %s6571_s12  }
 0x25f   : > { %s5139_s5 = scalar_lea.sflag [#allocation4], %s5138_s4 }
 0x260   : > { %p6333_p1 = pnand %p6336_p0, %p6662_p8 }
 0x262   : > { %p6334_p2 = pneg %p6333_p1 }
 0x264   : > { %6566 = dma.done.wait (%p6334_p2), %s5139_s5, 16  }
 0x265   : > { %6568 = vsyncadd (%p6334_p2), %s5139_s5, 4294967280  ;;  %s16_s17 = sadd.s32 1, %s6591_s17   ;;  %s9473_s12 = smov %s6575_s13 }
 0x266   : > { %p13_p3 = scmp.ge.s32.totalorder %s16_s17, 4   ;;  %s9474_s13 = smov %s6579_s14 }
 0x267   : > { %s9475_s14 = smov %s6668_s25  ;;  %s9476_s15 = smov %s6587_s16 }
 0x268   : > { %s9477_s16 = smov %s9479_s20  ;;  %15 = sbr.rel (!%p13_p3) target bundleno = 4 (0x4), region = 78 }
 0x26d   :  { %5143 = vsyncpa [#allocation4], 1 }
 0x26e   :  { %5145 = vsyncpa [#allocation4 + $0x1], 1 }

</bundles_post_ra>
